<compile_context>
chip_gen: v5e
topology: v5e:2x2
jax: 0.10.0
libtpu: 0.0.40
codegen_flags: <defaults>
</compile_context>

<pallas_src>
import numpy as np

import jax
import jax.numpy as jnp
from jax.experimental import pallas as pl
from jax.experimental.pallas import tpu as pltpu


_VMEM = pl.BlockSpec(memory_space=pltpu.MemorySpace.VMEM)
_K = 5          # conv kernel size (fixed by the module)
_S = 2          # conv stride     (fixed by the module)
_TAPS = _K * _K


# ----------------------------- fused Pallas kernel --------------------------

def _bn_relu(y, gamma, beta):
    """y: (C, R) f32, channels on sublanes, N*OH*OW lane-dense.

    Training-mode BatchNorm2d (biased batch stats, eps=1e-5) + ReLU.
    Shifted two-pass variance (review correctness note)."""
    inv_r = 1.0 / y.shape[1]
    mean = jnp.sum(y, axis=1, keepdims=True) * inv_r            # (C, 1)
    cen = y - mean
    var = jnp.sum(cen * cen, axis=1, keepdims=True) * inv_r     # (C, 1)
    scale = gamma * jax.lax.rsqrt(var + 1e-5)
    return jnp.maximum(cen * scale + beta, 0.0)


def dqn_fused_kernel(p1_ref, w1_ref, g1_ref, b1_ref,
                     s2_ref, w2_ref, g2_ref, b2_ref,
                     s3_ref, w3_ref, g3_ref, b3_ref,
                     wh_ref, bh_ref, o_ref):
    f32, bf16 = jnp.float32, jnp.bfloat16

    hw1 = s2_ref.shape[0]                  # layer-1 output spatial (= 17*17)
    n = p1_ref.shape[1] // hw1             # batch
    ohw2 = s2_ref.shape[1] // _TAPS        # layer-2 output spatial (= 7*7)
    hw2 = s3_ref.shape[0]                  # == ohw2
    ohw3 = s3_ref.shape[1] // _TAPS        # layer-3 output spatial (= 2*2)

    # ---- layer 1: conv as one MXU matmul on pre-gathered input patches -----
    y1 = jnp.dot(w1_ref[...], p1_ref[...], preferred_element_type=f32)
    a1 = _bn_relu(y1, g1_ref[...], b1_ref[...]).astype(bf16)    # (16, n*hw1)

    def conv_layer(a, s_ref, w_ref, hw_in, ohw):
        """a: (C_in, n*hw_in) bf16 -> (C_out, n*ohw) f32 via
        one spatial gather matmul per sample + ONE big-K weight matmul."""
        s_big = s_ref[...]                                       # (hw_in, 25*ohw)
        cols = []
        for b in range(n):
            a_b = a[:, b * hw_in:(b + 1) * hw_in]                # (C_in, hw_in)
            # exact 0/1 gather of bf16 activations; single cast per sample
            g = jnp.dot(a_b, s_big, preferred_element_type=f32).astype(bf16)
            # (C_in, 25*ohw) -> (25*C_in, ohw) patch block (im2col layout)
            cols.append(jnp.concatenate(
                [g[:, t * ohw:(t + 1) * ohw] for t in range(_TAPS)], axis=0))
        patches = jnp.concatenate(cols, axis=1)                  # (25*C_in, n*ohw)
        return jnp.dot(w_ref[...], patches, preferred_element_type=f32)

    # ---- layers 2 & 3 -------------------------------------------------------
    y2 = conv_layer(a1, s2_ref, w2_ref, hw1, ohw2)               # (32, n*ohw2)
    a2 = _bn_relu(y2, g2_ref[...], b2_ref[...]).astype(bf16)

    y3 = conv_layer(a2, s3_ref, w3_ref, hw2, ohw3)               # (32, n*ohw3)
    a3 = _bn_relu(y3, g3_ref[...], b3_ref[...])                  # f32

    # ---- head: single (outputs, spat*C3) x (spat*C3, n) bf16 matmul --------
    # head_in rows are ordered s*C3 + c to match wh_ref's init-time layout.
    head_cols = []
    for s in range(ohw3):
        head_cols.append(jnp.concatenate(
            [a3[:, b * ohw3 + s: b * ohw3 + s + 1] for b in range(n)], axis=1))
    head_in = jnp.concatenate(head_cols, axis=0).astype(bf16)    # (spat*C3, n)
    out = jnp.dot(wh_ref[...], head_in, preferred_element_type=f32) + bh_ref[...]
    o_ref[...] = out                                             # (outputs, n)


# --------------------------- init-time preparation ---------------------------

def _spatial_selection(h, w, k=_K, s=_S):
    """Batch/channel-independent 0/1 gather matrix:
    sel[src_hw, t*OH*OW + p] = 1 iff output spatial p reads input spatial
    src_hw for kernel tap t = ki*k + kj (row-major spatial linearization)."""
    oh = (h - k) // s + 1
    ow = (w - k) // s + 1
    sel = np.zeros((h * w, k * k * oh * ow), np.float32)
    for ki in range(k):
        for kj in range(k):
            t = ki * k + kj
            for i in range(oh):
                for j in range(ow):
                    src = (s * i + ki) * w + (s * j + kj)
                    dst = t * oh * ow + i * ow + j
                    sel[src, dst] = 1.0
    return sel


def dqn_init_params(key, h, w, outputs):
    """Raw, PyTorch-shaped parameters of the DQN module."""
    def conv_size(v, k=_K, st=_S):
        return (v - (k - 1) - 1) // st + 1
    convw = conv_size(conv_size(conv_size(w)))
    convh = conv_size(conv_size(conv_size(h)))
    linear_in = convw * convh * 32

    ks = jax.random.split(key, 12)
    f32 = jnp.float32
    return {
        "conv1_w": jax.random.normal(ks[0], (16, 3, 5, 5), f32) * 0.1,
        "conv1_b": jax.random.normal(ks[1], (16,), f32) * 0.01,   # cancelled by BN
        "bn1_g": 1.0 + 0.1 * jax.random.normal(ks[2], (16,), f32),
        "bn1_b": 0.1 * jax.random.normal(ks[3], (16,), f32),
        "conv2_w": jax.random.normal(ks[4], (32, 16, 5, 5), f32) * 0.05,
        "conv2_b": jax.random.normal(ks[5], (32,), f32) * 0.01,   # cancelled by BN
        "bn2_g": 1.0 + 0.1 * jax.random.normal(ks[6], (32,), f32),
        "bn2_b": 0.1 * jax.random.normal(ks[7], (32,), f32),
        "conv3_w": jax.random.normal(ks[8], (32, 32, 5, 5), f32) * 0.05,
        "conv3_b": jax.random.normal(ks[9], (32,), f32) * 0.01,   # cancelled by BN
        "bn3_g": 1.0 + 0.1 * jax.random.normal(ks[10], (32,), f32),
        "bn3_b": 0.1 * jax.random.normal(ks[11], (32,), f32),
        "head_w": jax.random.normal(ks[0], (outputs, linear_in), f32) * 0.05,
        "head_b": jax.random.normal(ks[1], (outputs,), f32) * 0.01,
    }


def dqn_prepare(raw, h, w):
    """Pre-flatten/transpose weights and build spatial gather matrices ONCE.
    Note: no longer depends on the batch size."""
    def cs(v):
        return (v - (_K - 1) - 1) // _S + 1
    h1, w1 = cs(h), cs(w)
    h2, w2 = cs(h1), cs(w1)
    h3, w3 = cs(h2), cs(w2)

    oc1, ic1 = raw["conv1_w"].shape[:2]
    oc2 = raw["conv2_w"].shape[0]
    oc3 = raw["conv3_w"].shape[0]
    outputs = raw["head_w"].shape[0]
    spat = h3 * w3
    bf16, f32 = jnp.bfloat16, jnp.float32

    def tap_major(wt):  # (OC, IC, 5, 5) -> (OC, 25*IC); col = (ki*5+kj)*IC + ic
        oc, ic = wt.shape[:2]
        return jnp.transpose(wt, (0, 2, 3, 1)).reshape(oc, _TAPS * ic)

    # head_w[o, c*spat + s] rearranged so column index is s*C3 + c
    whr = jnp.transpose(raw["head_w"].reshape(outputs, oc3, spat),
                        (0, 2, 1)).reshape(outputs, spat * oc3)

    return {
        "w1f": raw["conv1_w"].reshape(oc1, ic1 * _TAPS).astype(bf16),
        "g1": raw["bn1_g"].reshape(oc1, 1).astype(f32),
        "b1": raw["bn1_b"].reshape(oc1, 1).astype(f32),
        "s2": jnp.asarray(_spatial_selection(h1, w1), dtype=bf16),
        "w2f": tap_major(raw["conv2_w"]).astype(bf16),
        "g2": raw["bn2_g"].reshape(oc2, 1).astype(f32),
        "b2": raw["bn2_b"].reshape(oc2, 1).astype(f32),
        "s3": jnp.asarray(_spatial_selection(h2, w2), dtype=bf16),
        "w3f": tap_major(raw["conv3_w"]).astype(bf16),
        "g3": raw["bn3_g"].reshape(oc3, 1).astype(f32),
        "b3": raw["bn3_b"].reshape(oc3, 1).astype(f32),
        "whr": whr.astype(bf16),
        "bh": raw["head_b"].reshape(outputs, 1).astype(f32),
    }


# ------------------------------- forward wrapper -----------------------------

def _im2col_T(x, k=_K, s=_S):
    """x: (N,C,H,W) -> (C*k*k, N*OH*OW); row = c*25 + ki*5 + kj (matches
    conv1_w.reshape(OC,-1)), col = n*OH*OW + oh*OW + ow."""
    n, c, h, w = x.shape
    oh = (h - k) // s + 1
    ow = (w - k) // s + 1
    taps = []
    for ki in range(k):
        for kj in range(k):
            taps.append(x[:, :, ki:ki + s * oh:s, kj:kj + s * ow:s])  # (N,C,OH,OW)
    p = jnp.stack(taps, axis=2)              # (N, C, k*k, OH, OW)
    p = p.transpose(1, 2, 0, 3, 4)           # (C, k*k, N, OH, OW)
    return p.reshape(c * k * k, n * oh * ow)


def dqn_forward(x, p):
    """x: (N, 3, H, W) f32 NCHW -> (N, outputs).  One fused pallas_call."""
    p1t = _im2col_T(x).astype(jnp.bfloat16)   # only per-forward glue (raw input)
    args = (p1t, p["w1f"], p["g1"], p["b1"],
            p["s2"], p["w2f"], p["g2"], p["b2"],
            p["s3"], p["w3f"], p["g3"], p["b3"],
            p["whr"], p["bh"])
    outputs = p["whr"].shape[0]
    n = x.shape[0]
    out_t = pl.pallas_call(
        dqn_fused_kernel,
        out_shape=jax.ShapeDtypeStruct((outputs, n), jnp.float32),
        in_specs=[_VMEM] * len(args),
        out_specs=_VMEM,
    )(*args)
    return out_t.T                            # (N, outputs)


# ------------------------------ pure-JAX reference ---------------------------

def dqn_reference(x, raw):
    hp = jax.lax.Precision.HIGHEST

    def layer(z, wt, b, gamma, beta):
        y = jax.lax.conv_general_dilated(
            z, wt, window_strides=(2, 2), padding="VALID",
            dimension_numbers=("NCHW", "OIHW", "NCHW"), precision=hp)
        y = y + b.reshape(1, -1, 1, 1)
        mean = y.mean(axis=(0, 2, 3), keepdims=True)
        var = ((y - mean) ** 2).mean(axis=(0, 2, 3), keepdims=True)
        yn = (y - mean) * jax.lax.rsqrt(var + 1e-5)
        return jnp.maximum(
            yn * gamma.reshape(1, -1, 1, 1) + beta.reshape(1, -1, 1, 1), 0.0)

    z = layer(x, raw["conv1_w"], raw["conv1_b"], raw["bn1_g"], raw["bn1_b"])
    z = layer(z, raw["conv2_w"], raw["conv2_b"], raw["bn2_g"], raw["bn2_b"])
    z = layer(z, raw["conv3_w"], raw["conv3_b"], raw["bn3_g"], raw["bn3_b"])
    flat = z.reshape(z.shape[0], -1)
    return jnp.dot(flat, raw["head_w"].T, precision=hp) + raw["head_b"]


# ----------------------------------- driver ----------------------------------

if __name__ == "__main__":
    H, W = 38, 38            # 38 -> 17 -> 7 -> 2 ; linear_in = 2*2*32 = 128
    N, OUTPUTS = 2, 4

    key = jax.random.PRNGKey(0)
    kx, kp = jax.random.split(key)
    x = jax.random.normal(kx, (N, 3, H, W), jnp.float32)

    raw = dqn_init_params(kp, H, W, OUTPUTS)
    params = dqn_prepare(raw, H, W)

    fwd = jax.jit(dqn_forward)
    out = fwd(x, params)
    jax.block_until_ready(out)
    assert out.shape == (N, OUTPUTS), out.shape

    # Numerical sanity check vs. plain-JAX reference (bf16 MXU operands ->
    # loose-ish tolerance; structural bugs would be O(1) off).
    ref = dqn_reference(x, raw)
    np.testing.assert_allclose(np.asarray(out), np.asarray(ref),
                               rtol=5e-2, atol=5e-2)
    print("KERNEL_OK")
</pallas_src>

<mosaic_0001>
module attributes {stable_mosaic.version = 11 : i64} {
  func.func @dqn_fused_kernel(%arg0: memref<75x578xbf16, #tpu.memory_space<vmem>>, %arg1: memref<16x75xbf16, #tpu.memory_space<vmem>>, %arg2: memref<16x1xf32, #tpu.memory_space<vmem>>, %arg3: memref<16x1xf32, #tpu.memory_space<vmem>>, %arg4: memref<289x1225xbf16, #tpu.memory_space<vmem>>, %arg5: memref<32x400xbf16, #tpu.memory_space<vmem>>, %arg6: memref<32x1xf32, #tpu.memory_space<vmem>>, %arg7: memref<32x1xf32, #tpu.memory_space<vmem>>, %arg8: memref<49x100xbf16, #tpu.memory_space<vmem>>, %arg9: memref<32x800xbf16, #tpu.memory_space<vmem>>, %arg10: memref<32x1xf32, #tpu.memory_space<vmem>>, %arg11: memref<32x1xf32, #tpu.memory_space<vmem>>, %arg12: memref<4x128xbf16, #tpu.memory_space<vmem>>, %arg13: memref<4x1xf32, #tpu.memory_space<vmem>>, %arg14: memref<4x2xf32, #tpu.memory_space<vmem>>) attributes {dimension_semantics = [], scalar_prefetch = 0 : i64, scratch_operands = 0 : i64, tpu.core_type = #tpu.core_type<tc>} {
    %c0 = arith.constant 0 : index
    %c0_0 = arith.constant 0 : index
    %0 = vector.load %arg1[%c0, %c0_0] : memref<16x75xbf16, #tpu.memory_space<vmem>>, vector<16x75xbf16>
    %c0_1 = arith.constant 0 : index
    %c0_2 = arith.constant 0 : index
    %1 = vector.load %arg0[%c0_1, %c0_2] : memref<75x578xbf16, #tpu.memory_space<vmem>>, vector<75x578xbf16>
    %cst = arith.constant dense<0.000000e+00> : vector<16x578xf32>
    %2 = tpu.matmul %0, %1, %cst {dimension_numbers = #tpu.dot_dimension_numbers<[1], [0], [0], [1], [0, 0, 1, 1], [], []>} : vector<16x75xbf16>, vector<75x578xbf16>, vector<16x578xf32> -> vector<16x578xf32>
    %c0_3 = arith.constant 0 : index
    %c0_4 = arith.constant 0 : index
    %3 = vector.load %arg2[%c0_3, %c0_4] : memref<16x1xf32, #tpu.memory_space<vmem>>, vector<16x1xf32>
    %c0_5 = arith.constant 0 : index
    %c0_6 = arith.constant 0 : index
    %4 = vector.load %arg3[%c0_5, %c0_6] : memref<16x1xf32, #tpu.memory_space<vmem>>, vector<16x1xf32>
    %cst_7 = arith.constant dense<0.000000e+00> : vector<16xf32>
    %5 = vector.multi_reduction <add>, %2, %cst_7 [1] : vector<16x578xf32> to vector<16xf32>
    %6 = vector.shape_cast %5 : vector<16xf32> to vector<16x1xf32>
    %cst_8 = arith.constant 0.00173010386 : f32
    %7 = vector.broadcast %cst_8 : f32 to vector<16x1xf32>
    %8 = arith.mulf %6, %7 : vector<16x1xf32>
    %9 = vector.broadcast %8 : vector<16x1xf32> to vector<16x578xf32>
    %10 = arith.subf %2, %9 : vector<16x578xf32>
    %11 = arith.mulf %10, %10 : vector<16x578xf32>
    %cst_9 = arith.constant dense<0.000000e+00> : vector<16xf32>
    %12 = vector.multi_reduction <add>, %11, %cst_9 [1] : vector<16x578xf32> to vector<16xf32>
    %13 = vector.shape_cast %12 : vector<16xf32> to vector<16x1xf32>
    %cst_10 = arith.constant 0.00173010386 : f32
    %14 = vector.broadcast %cst_10 : f32 to vector<16x1xf32>
    %15 = arith.mulf %13, %14 : vector<16x1xf32>
    %cst_11 = arith.constant 9.99999974E-6 : f32
    %16 = vector.broadcast %cst_11 : f32 to vector<16x1xf32>
    %17 = arith.addf %15, %16 : vector<16x1xf32>
    %18 = math.rsqrt %17 : vector<16x1xf32>
    %19 = arith.mulf %3, %18 : vector<16x1xf32>
    %20 = vector.broadcast %19 : vector<16x1xf32> to vector<16x578xf32>
    %21 = arith.mulf %10, %20 : vector<16x578xf32>
    %22 = vector.broadcast %4 : vector<16x1xf32> to vector<16x578xf32>
    %23 = arith.addf %21, %22 : vector<16x578xf32>
    %cst_12 = arith.constant 0.000000e+00 : f32
    %24 = vector.broadcast %cst_12 : f32 to vector<16x578xf32>
    %25 = arith.maximumf %23, %24 : vector<16x578xf32>
    %26 = arith.truncf %25 : vector<16x578xf32> to vector<16x578xbf16>
    %c0_13 = arith.constant 0 : index
    %c0_14 = arith.constant 0 : index
    %27 = vector.load %arg4[%c0_13, %c0_14] : memref<289x1225xbf16, #tpu.memory_space<vmem>>, vector<289x1225xbf16>
    %28 = vector.extract_strided_slice %26 {offsets = [0, 0], sizes = [16, 289], strides = [1, 1]} : vector<16x578xbf16> to vector<16x289xbf16>
    %cst_15 = arith.constant dense<0.000000e+00> : vector<16x1225xf32>
    %29 = tpu.matmul %28, %27, %cst_15 {dimension_numbers = #tpu.dot_dimension_numbers<[1], [0], [0], [1], [0, 0, 1, 1], [], []>} : vector<16x289xbf16>, vector<289x1225xbf16>, vector<16x1225xf32> -> vector<16x1225xf32>
    %30 = arith.truncf %29 : vector<16x1225xf32> to vector<16x1225xbf16>
    %31 = vector.extract_strided_slice %30 {offsets = [0, 0], sizes = [16, 49], strides = [1, 1]} : vector<16x1225xbf16> to vector<16x49xbf16>
    %32 = vector.extract_strided_slice %30 {offsets = [0, 49], sizes = [16, 49], strides = [1, 1]} : vector<16x1225xbf16> to vector<16x49xbf16>
    %33 = vector.extract_strided_slice %30 {offsets = [0, 98], sizes = [16, 49], strides = [1, 1]} : vector<16x1225xbf16> to vector<16x49xbf16>
    %34 = vector.extract_strided_slice %30 {offsets = [0, 147], sizes = [16, 49], strides = [1, 1]} : vector<16x1225xbf16> to vector<16x49xbf16>
    %35 = vector.extract_strided_slice %30 {offsets = [0, 196], sizes = [16, 49], strides = [1, 1]} : vector<16x1225xbf16> to vector<16x49xbf16>
    %36 = vector.extract_strided_slice %30 {offsets = [0, 245], sizes = [16, 49], strides = [1, 1]} : vector<16x1225xbf16> to vector<16x49xbf16>
    %37 = vector.extract_strided_slice %30 {offsets = [0, 294], sizes = [16, 49], strides = [1, 1]} : vector<16x1225xbf16> to vector<16x49xbf16>
    %38 = vector.extract_strided_slice %30 {offsets = [0, 343], sizes = [16, 49], strides = [1, 1]} : vector<16x1225xbf16> to vector<16x49xbf16>
    %39 = vector.extract_strided_slice %30 {offsets = [0, 392], sizes = [16, 49], strides = [1, 1]} : vector<16x1225xbf16> to vector<16x49xbf16>
    %40 = vector.extract_strided_slice %30 {offsets = [0, 441], sizes = [16, 49], strides = [1, 1]} : vector<16x1225xbf16> to vector<16x49xbf16>
    %41 = vector.extract_strided_slice %30 {offsets = [0, 490], sizes = [16, 49], strides = [1, 1]} : vector<16x1225xbf16> to vector<16x49xbf16>
    %42 = vector.extract_strided_slice %30 {offsets = [0, 539], sizes = [16, 49], strides = [1, 1]} : vector<16x1225xbf16> to vector<16x49xbf16>
    %43 = vector.extract_strided_slice %30 {offsets = [0, 588], sizes = [16, 49], strides = [1, 1]} : vector<16x1225xbf16> to vector<16x49xbf16>
    %44 = vector.extract_strided_slice %30 {offsets = [0, 637], sizes = [16, 49], strides = [1, 1]} : vector<16x1225xbf16> to vector<16x49xbf16>
    %45 = vector.extract_strided_slice %30 {offsets = [0, 686], sizes = [16, 49], strides = [1, 1]} : vector<16x1225xbf16> to vector<16x49xbf16>
    %46 = vector.extract_strided_slice %30 {offsets = [0, 735], sizes = [16, 49], strides = [1, 1]} : vector<16x1225xbf16> to vector<16x49xbf16>
    %47 = vector.extract_strided_slice %30 {offsets = [0, 784], sizes = [16, 49], strides = [1, 1]} : vector<16x1225xbf16> to vector<16x49xbf16>
    %48 = vector.extract_strided_slice %30 {offsets = [0, 833], sizes = [16, 49], strides = [1, 1]} : vector<16x1225xbf16> to vector<16x49xbf16>
    %49 = vector.extract_strided_slice %30 {offsets = [0, 882], sizes = [16, 49], strides = [1, 1]} : vector<16x1225xbf16> to vector<16x49xbf16>
    %50 = vector.extract_strided_slice %30 {offsets = [0, 931], sizes = [16, 49], strides = [1, 1]} : vector<16x1225xbf16> to vector<16x49xbf16>
    %51 = vector.extract_strided_slice %30 {offsets = [0, 980], sizes = [16, 49], strides = [1, 1]} : vector<16x1225xbf16> to vector<16x49xbf16>
    %52 = vector.extract_strided_slice %30 {offsets = [0, 1029], sizes = [16, 49], strides = [1, 1]} : vector<16x1225xbf16> to vector<16x49xbf16>
    %53 = vector.extract_strided_slice %30 {offsets = [0, 1078], sizes = [16, 49], strides = [1, 1]} : vector<16x1225xbf16> to vector<16x49xbf16>
    %54 = vector.extract_strided_slice %30 {offsets = [0, 1127], sizes = [16, 49], strides = [1, 1]} : vector<16x1225xbf16> to vector<16x49xbf16>
    %55 = vector.extract_strided_slice %30 {offsets = [0, 1176], sizes = [16, 49], strides = [1, 1]} : vector<16x1225xbf16> to vector<16x49xbf16>
    %56 = tpu.concatenate %31, %32, %33, %34, %35, %36, %37, %38, %39, %40, %41, %42, %43, %44, %45, %46 in 0 : vector<16x49xbf16>, vector<16x49xbf16>, vector<16x49xbf16>, vector<16x49xbf16>, vector<16x49xbf16>, vector<16x49xbf16>, vector<16x49xbf16>, vector<16x49xbf16>, vector<16x49xbf16>, vector<16x49xbf16>, vector<16x49xbf16>, vector<16x49xbf16>, vector<16x49xbf16>, vector<16x49xbf16>, vector<16x49xbf16>, vector<16x49xbf16> -> vector<256x49xbf16>
    %57 = tpu.concatenate %47, %48, %49, %50, %51, %52, %53, %54, %55 in 0 : vector<16x49xbf16>, vector<16x49xbf16>, vector<16x49xbf16>, vector<16x49xbf16>, vector<16x49xbf16>, vector<16x49xbf16>, vector<16x49xbf16>, vector<16x49xbf16>, vector<16x49xbf16> -> vector<144x49xbf16>
    %58 = tpu.concatenate %56, %57 in 0 : vector<256x49xbf16>, vector<144x49xbf16> -> vector<400x49xbf16>
    %59 = vector.extract_strided_slice %26 {offsets = [0, 289], sizes = [16, 289], strides = [1, 1]} : vector<16x578xbf16> to vector<16x289xbf16>
    %cst_16 = arith.constant dense<0.000000e+00> : vector<16x1225xf32>
    %60 = tpu.matmul %59, %27, %cst_16 {dimension_numbers = #tpu.dot_dimension_numbers<[1], [0], [0], [1], [0, 0, 1, 1], [], []>} : vector<16x289xbf16>, vector<289x1225xbf16>, vector<16x1225xf32> -> vector<16x1225xf32>
    %61 = arith.truncf %60 : vector<16x1225xf32> to vector<16x1225xbf16>
    %62 = vector.extract_strided_slice %61 {offsets = [0, 0], sizes = [16, 49], strides = [1, 1]} : vector<16x1225xbf16> to vector<16x49xbf16>
    %63 = vector.extract_strided_slice %61 {offsets = [0, 49], sizes = [16, 49], strides = [1, 1]} : vector<16x1225xbf16> to vector<16x49xbf16>
    %64 = vector.extract_strided_slice %61 {offsets = [0, 98], sizes = [16, 49], strides = [1, 1]} : vector<16x1225xbf16> to vector<16x49xbf16>
    %65 = vector.extract_strided_slice %61 {offsets = [0, 147], sizes = [16, 49], strides = [1, 1]} : vector<16x1225xbf16> to vector<16x49xbf16>
    %66 = vector.extract_strided_slice %61 {offsets = [0, 196], sizes = [16, 49], strides = [1, 1]} : vector<16x1225xbf16> to vector<16x49xbf16>
    %67 = vector.extract_strided_slice %61 {offsets = [0, 245], sizes = [16, 49], strides = [1, 1]} : vector<16x1225xbf16> to vector<16x49xbf16>
    %68 = vector.extract_strided_slice %61 {offsets = [0, 294], sizes = [16, 49], strides = [1, 1]} : vector<16x1225xbf16> to vector<16x49xbf16>
    %69 = vector.extract_strided_slice %61 {offsets = [0, 343], sizes = [16, 49], strides = [1, 1]} : vector<16x1225xbf16> to vector<16x49xbf16>
    %70 = vector.extract_strided_slice %61 {offsets = [0, 392], sizes = [16, 49], strides = [1, 1]} : vector<16x1225xbf16> to vector<16x49xbf16>
    %71 = vector.extract_strided_slice %61 {offsets = [0, 441], sizes = [16, 49], strides = [1, 1]} : vector<16x1225xbf16> to vector<16x49xbf16>
    %72 = vector.extract_strided_slice %61 {offsets = [0, 490], sizes = [16, 49], strides = [1, 1]} : vector<16x1225xbf16> to vector<16x49xbf16>
    %73 = vector.extract_strided_slice %61 {offsets = [0, 539], sizes = [16, 49], strides = [1, 1]} : vector<16x1225xbf16> to vector<16x49xbf16>
    %74 = vector.extract_strided_slice %61 {offsets = [0, 588], sizes = [16, 49], strides = [1, 1]} : vector<16x1225xbf16> to vector<16x49xbf16>
    %75 = vector.extract_strided_slice %61 {offsets = [0, 637], sizes = [16, 49], strides = [1, 1]} : vector<16x1225xbf16> to vector<16x49xbf16>
    %76 = vector.extract_strided_slice %61 {offsets = [0, 686], sizes = [16, 49], strides = [1, 1]} : vector<16x1225xbf16> to vector<16x49xbf16>
    %77 = vector.extract_strided_slice %61 {offsets = [0, 735], sizes = [16, 49], strides = [1, 1]} : vector<16x1225xbf16> to vector<16x49xbf16>
    %78 = vector.extract_strided_slice %61 {offsets = [0, 784], sizes = [16, 49], strides = [1, 1]} : vector<16x1225xbf16> to vector<16x49xbf16>
    %79 = vector.extract_strided_slice %61 {offsets = [0, 833], sizes = [16, 49], strides = [1, 1]} : vector<16x1225xbf16> to vector<16x49xbf16>
    %80 = vector.extract_strided_slice %61 {offsets = [0, 882], sizes = [16, 49], strides = [1, 1]} : vector<16x1225xbf16> to vector<16x49xbf16>
    %81 = vector.extract_strided_slice %61 {offsets = [0, 931], sizes = [16, 49], strides = [1, 1]} : vector<16x1225xbf16> to vector<16x49xbf16>
    %82 = vector.extract_strided_slice %61 {offsets = [0, 980], sizes = [16, 49], strides = [1, 1]} : vector<16x1225xbf16> to vector<16x49xbf16>
    %83 = vector.extract_strided_slice %61 {offsets = [0, 1029], sizes = [16, 49], strides = [1, 1]} : vector<16x1225xbf16> to vector<16x49xbf16>
    %84 = vector.extract_strided_slice %61 {offsets = [0, 1078], sizes = [16, 49], strides = [1, 1]} : vector<16x1225xbf16> to vector<16x49xbf16>
    %85 = vector.extract_strided_slice %61 {offsets = [0, 1127], sizes = [16, 49], strides = [1, 1]} : vector<16x1225xbf16> to vector<16x49xbf16>
    %86 = vector.extract_strided_slice %61 {offsets = [0, 1176], sizes = [16, 49], strides = [1, 1]} : vector<16x1225xbf16> to vector<16x49xbf16>
    %87 = tpu.concatenate %62, %63, %64, %65, %66, %67, %68, %69, %70, %71, %72, %73, %74, %75, %76, %77 in 0 : vector<16x49xbf16>, vector<16x49xbf16>, vector<16x49xbf16>, vector<16x49xbf16>, vector<16x49xbf16>, vector<16x49xbf16>, vector<16x49xbf16>, vector<16x49xbf16>, vector<16x49xbf16>, vector<16x49xbf16>, vector<16x49xbf16>, vector<16x49xbf16>, vector<16x49xbf16>, vector<16x49xbf16>, vector<16x49xbf16>, vector<16x49xbf16> -> vector<256x49xbf16>
    %88 = tpu.concatenate %78, %79, %80, %81, %82, %83, %84, %85, %86 in 0 : vector<16x49xbf16>, vector<16x49xbf16>, vector<16x49xbf16>, vector<16x49xbf16>, vector<16x49xbf16>, vector<16x49xbf16>, vector<16x49xbf16>, vector<16x49xbf16>, vector<16x49xbf16> -> vector<144x49xbf16>
    %89 = tpu.concatenate %87, %88 in 0 : vector<256x49xbf16>, vector<144x49xbf16> -> vector<400x49xbf16>
    %90 = tpu.concatenate %58, %89 in 1 : vector<400x49xbf16>, vector<400x49xbf16> -> vector<400x98xbf16>
    %c0_17 = arith.constant 0 : index
    %c0_18 = arith.constant 0 : index
    %91 = vector.load %arg5[%c0_17, %c0_18] : memref<32x400xbf16, #tpu.memory_space<vmem>>, vector<32x400xbf16>
    %cst_19 = arith.constant dense<0.000000e+00> : vector<32x98xf32>
    %92 = tpu.matmul %91, %90, %cst_19 {dimension_numbers = #tpu.dot_dimension_numbers<[1], [0], [0], [1], [0, 0, 1, 1], [], []>} : vector<32x400xbf16>, vector<400x98xbf16>, vector<32x98xf32> -> vector<32x98xf32>
    %c0_20 = arith.constant 0 : index
    %c0_21 = arith.constant 0 : index
    %93 = vector.load %arg6[%c0_20, %c0_21] : memref<32x1xf32, #tpu.memory_space<vmem>>, vector<32x1xf32>
    %c0_22 = arith.constant 0 : index
    %c0_23 = arith.constant 0 : index
    %94 = vector.load %arg7[%c0_22, %c0_23] : memref<32x1xf32, #tpu.memory_space<vmem>>, vector<32x1xf32>
    %cst_24 = arith.constant dense<0.000000e+00> : vector<32xf32>
    %95 = vector.multi_reduction <add>, %92, %cst_24 [1] : vector<32x98xf32> to vector<32xf32>
    %96 = vector.shape_cast %95 : vector<32xf32> to vector<32x1xf32>
    %cst_25 = arith.constant 0.0102040814 : f32
    %97 = vector.broadcast %cst_25 : f32 to vector<32x1xf32>
    %98 = arith.mulf %96, %97 : vector<32x1xf32>
    %99 = vector.broadcast %98 : vector<32x1xf32> to vector<32x98xf32>
    %100 = arith.subf %92, %99 : vector<32x98xf32>
    %101 = arith.mulf %100, %100 : vector<32x98xf32>
    %cst_26 = arith.constant dense<0.000000e+00> : vector<32xf32>
    %102 = vector.multi_reduction <add>, %101, %cst_26 [1] : vector<32x98xf32> to vector<32xf32>
    %103 = vector.shape_cast %102 : vector<32xf32> to vector<32x1xf32>
    %cst_27 = arith.constant 0.0102040814 : f32
    %104 = vector.broadcast %cst_27 : f32 to vector<32x1xf32>
    %105 = arith.mulf %103, %104 : vector<32x1xf32>
    %cst_28 = arith.constant 9.99999974E-6 : f32
    %106 = vector.broadcast %cst_28 : f32 to vector<32x1xf32>
    %107 = arith.addf %105, %106 : vector<32x1xf32>
    %108 = math.rsqrt %107 : vector<32x1xf32>
    %109 = arith.mulf %93, %108 : vector<32x1xf32>
    %110 = vector.broadcast %109 : vector<32x1xf32> to vector<32x98xf32>
    %111 = arith.mulf %100, %110 : vector<32x98xf32>
    %112 = vector.broadcast %94 : vector<32x1xf32> to vector<32x98xf32>
    %113 = arith.addf %111, %112 : vector<32x98xf32>
    %cst_29 = arith.constant 0.000000e+00 : f32
    %114 = vector.broadcast %cst_29 : f32 to vector<32x98xf32>
    %115 = arith.maximumf %113, %114 : vector<32x98xf32>
    %116 = arith.truncf %115 : vector<32x98xf32> to vector<32x98xbf16>
    %c0_30 = arith.constant 0 : index
    %c0_31 = arith.constant 0 : index
    %117 = vector.load %arg8[%c0_30, %c0_31] : memref<49x100xbf16, #tpu.memory_space<vmem>>, vector<49x100xbf16>
    %118 = vector.extract_strided_slice %116 {offsets = [0, 0], sizes = [32, 49], strides = [1, 1]} : vector<32x98xbf16> to vector<32x49xbf16>
    %cst_32 = arith.constant dense<0.000000e+00> : vector<32x100xf32>
    %119 = tpu.matmul %118, %117, %cst_32 {dimension_numbers = #tpu.dot_dimension_numbers<[1], [0], [0], [1], [0, 0, 1, 1], [], []>} : vector<32x49xbf16>, vector<49x100xbf16>, vector<32x100xf32> -> vector<32x100xf32>
    %120 = arith.truncf %119 : vector<32x100xf32> to vector<32x100xbf16>
    %121 = vector.extract_strided_slice %120 {offsets = [0, 0], sizes = [32, 4], strides = [1, 1]} : vector<32x100xbf16> to vector<32x4xbf16>
    %122 = vector.extract_strided_slice %120 {offsets = [0, 4], sizes = [32, 4], strides = [1, 1]} : vector<32x100xbf16> to vector<32x4xbf16>
    %123 = vector.extract_strided_slice %120 {offsets = [0, 8], sizes = [32, 4], strides = [1, 1]} : vector<32x100xbf16> to vector<32x4xbf16>
    %124 = vector.extract_strided_slice %120 {offsets = [0, 12], sizes = [32, 4], strides = [1, 1]} : vector<32x100xbf16> to vector<32x4xbf16>
    %125 = vector.extract_strided_slice %120 {offsets = [0, 16], sizes = [32, 4], strides = [1, 1]} : vector<32x100xbf16> to vector<32x4xbf16>
    %126 = vector.extract_strided_slice %120 {offsets = [0, 20], sizes = [32, 4], strides = [1, 1]} : vector<32x100xbf16> to vector<32x4xbf16>
    %127 = vector.extract_strided_slice %120 {offsets = [0, 24], sizes = [32, 4], strides = [1, 1]} : vector<32x100xbf16> to vector<32x4xbf16>
    %128 = vector.extract_strided_slice %120 {offsets = [0, 28], sizes = [32, 4], strides = [1, 1]} : vector<32x100xbf16> to vector<32x4xbf16>
    %129 = vector.extract_strided_slice %120 {offsets = [0, 32], sizes = [32, 4], strides = [1, 1]} : vector<32x100xbf16> to vector<32x4xbf16>
    %130 = vector.extract_strided_slice %120 {offsets = [0, 36], sizes = [32, 4], strides = [1, 1]} : vector<32x100xbf16> to vector<32x4xbf16>
    %131 = vector.extract_strided_slice %120 {offsets = [0, 40], sizes = [32, 4], strides = [1, 1]} : vector<32x100xbf16> to vector<32x4xbf16>
    %132 = vector.extract_strided_slice %120 {offsets = [0, 44], sizes = [32, 4], strides = [1, 1]} : vector<32x100xbf16> to vector<32x4xbf16>
    %133 = vector.extract_strided_slice %120 {offsets = [0, 48], sizes = [32, 4], strides = [1, 1]} : vector<32x100xbf16> to vector<32x4xbf16>
    %134 = vector.extract_strided_slice %120 {offsets = [0, 52], sizes = [32, 4], strides = [1, 1]} : vector<32x100xbf16> to vector<32x4xbf16>
    %135 = vector.extract_strided_slice %120 {offsets = [0, 56], sizes = [32, 4], strides = [1, 1]} : vector<32x100xbf16> to vector<32x4xbf16>
    %136 = vector.extract_strided_slice %120 {offsets = [0, 60], sizes = [32, 4], strides = [1, 1]} : vector<32x100xbf16> to vector<32x4xbf16>
    %137 = vector.extract_strided_slice %120 {offsets = [0, 64], sizes = [32, 4], strides = [1, 1]} : vector<32x100xbf16> to vector<32x4xbf16>
    %138 = vector.extract_strided_slice %120 {offsets = [0, 68], sizes = [32, 4], strides = [1, 1]} : vector<32x100xbf16> to vector<32x4xbf16>
    %139 = vector.extract_strided_slice %120 {offsets = [0, 72], sizes = [32, 4], strides = [1, 1]} : vector<32x100xbf16> to vector<32x4xbf16>
    %140 = vector.extract_strided_slice %120 {offsets = [0, 76], sizes = [32, 4], strides = [1, 1]} : vector<32x100xbf16> to vector<32x4xbf16>
    %141 = vector.extract_strided_slice %120 {offsets = [0, 80], sizes = [32, 4], strides = [1, 1]} : vector<32x100xbf16> to vector<32x4xbf16>
    %142 = vector.extract_strided_slice %120 {offsets = [0, 84], sizes = [32, 4], strides = [1, 1]} : vector<32x100xbf16> to vector<32x4xbf16>
    %143 = vector.extract_strided_slice %120 {offsets = [0, 88], sizes = [32, 4], strides = [1, 1]} : vector<32x100xbf16> to vector<32x4xbf16>
    %144 = vector.extract_strided_slice %120 {offsets = [0, 92], sizes = [32, 4], strides = [1, 1]} : vector<32x100xbf16> to vector<32x4xbf16>
    %145 = vector.extract_strided_slice %120 {offsets = [0, 96], sizes = [32, 4], strides = [1, 1]} : vector<32x100xbf16> to vector<32x4xbf16>
    %146 = tpu.concatenate %121, %122, %123, %124, %125, %126, %127, %128, %129, %130, %131, %132, %133, %134, %135, %136 in 0 : vector<32x4xbf16>, vector<32x4xbf16>, vector<32x4xbf16>, vector<32x4xbf16>, vector<32x4xbf16>, vector<32x4xbf16>, vector<32x4xbf16>, vector<32x4xbf16>, vector<32x4xbf16>, vector<32x4xbf16>, vector<32x4xbf16>, vector<32x4xbf16>, vector<32x4xbf16>, vector<32x4xbf16>, vector<32x4xbf16>, vector<32x4xbf16> -> vector<512x4xbf16>
    %147 = tpu.concatenate %137, %138, %139, %140, %141, %142, %143, %144, %145 in 0 : vector<32x4xbf16>, vector<32x4xbf16>, vector<32x4xbf16>, vector<32x4xbf16>, vector<32x4xbf16>, vector<32x4xbf16>, vector<32x4xbf16>, vector<32x4xbf16>, vector<32x4xbf16> -> vector<288x4xbf16>
    %148 = tpu.concatenate %146, %147 in 0 : vector<512x4xbf16>, vector<288x4xbf16> -> vector<800x4xbf16>
    %149 = vector.extract_strided_slice %116 {offsets = [0, 49], sizes = [32, 49], strides = [1, 1]} : vector<32x98xbf16> to vector<32x49xbf16>
    %cst_33 = arith.constant dense<0.000000e+00> : vector<32x100xf32>
    %150 = tpu.matmul %149, %117, %cst_33 {dimension_numbers = #tpu.dot_dimension_numbers<[1], [0], [0], [1], [0, 0, 1, 1], [], []>} : vector<32x49xbf16>, vector<49x100xbf16>, vector<32x100xf32> -> vector<32x100xf32>
    %151 = arith.truncf %150 : vector<32x100xf32> to vector<32x100xbf16>
    %152 = vector.extract_strided_slice %151 {offsets = [0, 0], sizes = [32, 4], strides = [1, 1]} : vector<32x100xbf16> to vector<32x4xbf16>
    %153 = vector.extract_strided_slice %151 {offsets = [0, 4], sizes = [32, 4], strides = [1, 1]} : vector<32x100xbf16> to vector<32x4xbf16>
    %154 = vector.extract_strided_slice %151 {offsets = [0, 8], sizes = [32, 4], strides = [1, 1]} : vector<32x100xbf16> to vector<32x4xbf16>
    %155 = vector.extract_strided_slice %151 {offsets = [0, 12], sizes = [32, 4], strides = [1, 1]} : vector<32x100xbf16> to vector<32x4xbf16>
    %156 = vector.extract_strided_slice %151 {offsets = [0, 16], sizes = [32, 4], strides = [1, 1]} : vector<32x100xbf16> to vector<32x4xbf16>
    %157 = vector.extract_strided_slice %151 {offsets = [0, 20], sizes = [32, 4], strides = [1, 1]} : vector<32x100xbf16> to vector<32x4xbf16>
    %158 = vector.extract_strided_slice %151 {offsets = [0, 24], sizes = [32, 4], strides = [1, 1]} : vector<32x100xbf16> to vector<32x4xbf16>
    %159 = vector.extract_strided_slice %151 {offsets = [0, 28], sizes = [32, 4], strides = [1, 1]} : vector<32x100xbf16> to vector<32x4xbf16>
    %160 = vector.extract_strided_slice %151 {offsets = [0, 32], sizes = [32, 4], strides = [1, 1]} : vector<32x100xbf16> to vector<32x4xbf16>
    %161 = vector.extract_strided_slice %151 {offsets = [0, 36], sizes = [32, 4], strides = [1, 1]} : vector<32x100xbf16> to vector<32x4xbf16>
    %162 = vector.extract_strided_slice %151 {offsets = [0, 40], sizes = [32, 4], strides = [1, 1]} : vector<32x100xbf16> to vector<32x4xbf16>
    %163 = vector.extract_strided_slice %151 {offsets = [0, 44], sizes = [32, 4], strides = [1, 1]} : vector<32x100xbf16> to vector<32x4xbf16>
    %164 = vector.extract_strided_slice %151 {offsets = [0, 48], sizes = [32, 4], strides = [1, 1]} : vector<32x100xbf16> to vector<32x4xbf16>
    %165 = vector.extract_strided_slice %151 {offsets = [0, 52], sizes = [32, 4], strides = [1, 1]} : vector<32x100xbf16> to vector<32x4xbf16>
    %166 = vector.extract_strided_slice %151 {offsets = [0, 56], sizes = [32, 4], strides = [1, 1]} : vector<32x100xbf16> to vector<32x4xbf16>
    %167 = vector.extract_strided_slice %151 {offsets = [0, 60], sizes = [32, 4], strides = [1, 1]} : vector<32x100xbf16> to vector<32x4xbf16>
    %168 = vector.extract_strided_slice %151 {offsets = [0, 64], sizes = [32, 4], strides = [1, 1]} : vector<32x100xbf16> to vector<32x4xbf16>
    %169 = vector.extract_strided_slice %151 {offsets = [0, 68], sizes = [32, 4], strides = [1, 1]} : vector<32x100xbf16> to vector<32x4xbf16>
    %170 = vector.extract_strided_slice %151 {offsets = [0, 72], sizes = [32, 4], strides = [1, 1]} : vector<32x100xbf16> to vector<32x4xbf16>
    %171 = vector.extract_strided_slice %151 {offsets = [0, 76], sizes = [32, 4], strides = [1, 1]} : vector<32x100xbf16> to vector<32x4xbf16>
    %172 = vector.extract_strided_slice %151 {offsets = [0, 80], sizes = [32, 4], strides = [1, 1]} : vector<32x100xbf16> to vector<32x4xbf16>
    %173 = vector.extract_strided_slice %151 {offsets = [0, 84], sizes = [32, 4], strides = [1, 1]} : vector<32x100xbf16> to vector<32x4xbf16>
    %174 = vector.extract_strided_slice %151 {offsets = [0, 88], sizes = [32, 4], strides = [1, 1]} : vector<32x100xbf16> to vector<32x4xbf16>
    %175 = vector.extract_strided_slice %151 {offsets = [0, 92], sizes = [32, 4], strides = [1, 1]} : vector<32x100xbf16> to vector<32x4xbf16>
    %176 = vector.extract_strided_slice %151 {offsets = [0, 96], sizes = [32, 4], strides = [1, 1]} : vector<32x100xbf16> to vector<32x4xbf16>
    %177 = tpu.concatenate %152, %153, %154, %155, %156, %157, %158, %159, %160, %161, %162, %163, %164, %165, %166, %167 in 0 : vector<32x4xbf16>, vector<32x4xbf16>, vector<32x4xbf16>, vector<32x4xbf16>, vector<32x4xbf16>, vector<32x4xbf16>, vector<32x4xbf16>, vector<32x4xbf16>, vector<32x4xbf16>, vector<32x4xbf16>, vector<32x4xbf16>, vector<32x4xbf16>, vector<32x4xbf16>, vector<32x4xbf16>, vector<32x4xbf16>, vector<32x4xbf16> -> vector<512x4xbf16>
    %178 = tpu.concatenate %168, %169, %170, %171, %172, %173, %174, %175, %176 in 0 : vector<32x4xbf16>, vector<32x4xbf16>, vector<32x4xbf16>, vector<32x4xbf16>, vector<32x4xbf16>, vector<32x4xbf16>, vector<32x4xbf16>, vector<32x4xbf16>, vector<32x4xbf16> -> vector<288x4xbf16>
    %179 = tpu.concatenate %177, %178 in 0 : vector<512x4xbf16>, vector<288x4xbf16> -> vector<800x4xbf16>
    %180 = tpu.concatenate %148, %179 in 1 : vector<800x4xbf16>, vector<800x4xbf16> -> vector<800x8xbf16>
    %c0_34 = arith.constant 0 : index
    %c0_35 = arith.constant 0 : index
    %181 = vector.load %arg9[%c0_34, %c0_35] : memref<32x800xbf16, #tpu.memory_space<vmem>>, vector<32x800xbf16>
    %cst_36 = arith.constant dense<0.000000e+00> : vector<32x8xf32>
    %182 = tpu.matmul %181, %180, %cst_36 {dimension_numbers = #tpu.dot_dimension_numbers<[1], [0], [0], [1], [0, 0, 1, 1], [], []>} : vector<32x800xbf16>, vector<800x8xbf16>, vector<32x8xf32> -> vector<32x8xf32>
    %c0_37 = arith.constant 0 : index
    %c0_38 = arith.constant 0 : index
    %183 = vector.load %arg10[%c0_37, %c0_38] : memref<32x1xf32, #tpu.memory_space<vmem>>, vector<32x1xf32>
    %c0_39 = arith.constant 0 : index
    %c0_40 = arith.constant 0 : index
    %184 = vector.load %arg11[%c0_39, %c0_40] : memref<32x1xf32, #tpu.memory_space<vmem>>, vector<32x1xf32>
    %cst_41 = arith.constant dense<0.000000e+00> : vector<32xf32>
    %185 = vector.multi_reduction <add>, %182, %cst_41 [1] : vector<32x8xf32> to vector<32xf32>
    %186 = vector.shape_cast %185 : vector<32xf32> to vector<32x1xf32>
    %cst_42 = arith.constant 1.250000e-01 : f32
    %187 = vector.broadcast %cst_42 : f32 to vector<32x1xf32>
    %188 = arith.mulf %186, %187 : vector<32x1xf32>
    %189 = vector.broadcast %188 : vector<32x1xf32> to vector<32x8xf32>
    %190 = arith.subf %182, %189 : vector<32x8xf32>
    %191 = arith.mulf %190, %190 : vector<32x8xf32>
    %cst_43 = arith.constant dense<0.000000e+00> : vector<32xf32>
    %192 = vector.multi_reduction <add>, %191, %cst_43 [1] : vector<32x8xf32> to vector<32xf32>
    %193 = vector.shape_cast %192 : vector<32xf32> to vector<32x1xf32>
    %cst_44 = arith.constant 1.250000e-01 : f32
    %194 = vector.broadcast %cst_44 : f32 to vector<32x1xf32>
    %195 = arith.mulf %193, %194 : vector<32x1xf32>
    %cst_45 = arith.constant 9.99999974E-6 : f32
    %196 = vector.broadcast %cst_45 : f32 to vector<32x1xf32>
    %197 = arith.addf %195, %196 : vector<32x1xf32>
    %198 = math.rsqrt %197 : vector<32x1xf32>
    %199 = arith.mulf %183, %198 : vector<32x1xf32>
    %200 = vector.broadcast %199 : vector<32x1xf32> to vector<32x8xf32>
    %201 = arith.mulf %190, %200 : vector<32x8xf32>
    %202 = vector.broadcast %184 : vector<32x1xf32> to vector<32x8xf32>
    %203 = arith.addf %201, %202 : vector<32x8xf32>
    %cst_46 = arith.constant 0.000000e+00 : f32
    %204 = vector.broadcast %cst_46 : f32 to vector<32x8xf32>
    %205 = arith.maximumf %203, %204 : vector<32x8xf32>
    %206 = vector.extract_strided_slice %205 {offsets = [0, 0], sizes = [32, 1], strides = [1, 1]} : vector<32x8xf32> to vector<32x1xf32>
    %207 = vector.extract_strided_slice %205 {offsets = [0, 4], sizes = [32, 1], strides = [1, 1]} : vector<32x8xf32> to vector<32x1xf32>
    %208 = tpu.concatenate %206, %207 in 1 : vector<32x1xf32>, vector<32x1xf32> -> vector<32x2xf32>
    %209 = vector.extract_strided_slice %205 {offsets = [0, 1], sizes = [32, 1], strides = [1, 1]} : vector<32x8xf32> to vector<32x1xf32>
    %210 = vector.extract_strided_slice %205 {offsets = [0, 5], sizes = [32, 1], strides = [1, 1]} : vector<32x8xf32> to vector<32x1xf32>
    %211 = tpu.concatenate %209, %210 in 1 : vector<32x1xf32>, vector<32x1xf32> -> vector<32x2xf32>
    %212 = vector.extract_strided_slice %205 {offsets = [0, 2], sizes = [32, 1], strides = [1, 1]} : vector<32x8xf32> to vector<32x1xf32>
    %213 = vector.extract_strided_slice %205 {offsets = [0, 6], sizes = [32, 1], strides = [1, 1]} : vector<32x8xf32> to vector<32x1xf32>
    %214 = tpu.concatenate %212, %213 in 1 : vector<32x1xf32>, vector<32x1xf32> -> vector<32x2xf32>
    %215 = vector.extract_strided_slice %205 {offsets = [0, 3], sizes = [32, 1], strides = [1, 1]} : vector<32x8xf32> to vector<32x1xf32>
    %216 = vector.extract_strided_slice %205 {offsets = [0, 7], sizes = [32, 1], strides = [1, 1]} : vector<32x8xf32> to vector<32x1xf32>
    %217 = tpu.concatenate %215, %216 in 1 : vector<32x1xf32>, vector<32x1xf32> -> vector<32x2xf32>
    %218 = tpu.concatenate %208, %211, %214, %217 in 0 : vector<32x2xf32>, vector<32x2xf32>, vector<32x2xf32>, vector<32x2xf32> -> vector<128x2xf32>
    %219 = arith.truncf %218 : vector<128x2xf32> to vector<128x2xbf16>
    %c0_47 = arith.constant 0 : index
    %c0_48 = arith.constant 0 : index
    %220 = vector.load %arg12[%c0_47, %c0_48] : memref<4x128xbf16, #tpu.memory_space<vmem>>, vector<4x128xbf16>
    %cst_49 = arith.constant dense<0.000000e+00> : vector<4x2xf32>
    %221 = tpu.matmul %220, %219, %cst_49 {dimension_numbers = #tpu.dot_dimension_numbers<[1], [0], [0], [1], [0, 0, 1, 1], [], []>} : vector<4x128xbf16>, vector<128x2xbf16>, vector<4x2xf32> -> vector<4x2xf32>
    %c0_50 = arith.constant 0 : index
    %c0_51 = arith.constant 0 : index
    %222 = vector.load %arg13[%c0_50, %c0_51] : memref<4x1xf32, #tpu.memory_space<vmem>>, vector<4x1xf32>
    %223 = vector.broadcast %222 : vector<4x1xf32> to vector<4x2xf32>
    %224 = arith.addf %221, %223 : vector<4x2xf32>
    %c0_52 = arith.constant 0 : index
    %c0_53 = arith.constant 0 : index
    %225 = vector.load %arg14[%c0_52, %c0_53] : memref<4x2xf32, #tpu.memory_space<vmem>>, vector<4x2xf32>
    tpu.vector_store %arg14[%c0_52, %c0_53], %224 {strides = array<i32>} : memref<4x2xf32, #tpu.memory_space<vmem>>, vector<4x2xf32>,
    return
  }
}

</mosaic_0001>

<bundles_post_ra>
// kernel: dqn_forward.1
= control target key start
LH: loop header
LB: loop body
LE: loop exit
PB: predicated region body
PF: predicated region fallthrough
CT: control target
= control target key end

     0   :  { %vm214_vm0 = vcmask 1044480   ;;  %vm215_vm1 = vcmask 1045504   ;;  %v5615_v2 = vmov 65535   ;;  %vm210_vm2 = vcmask 613376   ;;  %s5617_s20 = smov 95   ;;  %s5620_s24 = smov 11   ;;  %s9036_s0 = inlined_call_operand.vmem [shape: bf16[75,578], index: 0, kind: input, shape index: {}]   ;;  %s9037_s1 = inlined_call_operand.vmem [shape: bf16[16,75], index: 1, kind: input, shape index: {}]   ;;  %s9038_s3 = inlined_call_operand.vmem [shape: f32[16,1], index: 3, kind: input, shape index: {}]   ;;  %s9039_s4 = inlined_call_operand.vmem [shape: bf16[289,1225], index: 4, kind: input, shape index: {}]   ;;  %s9040_s2 = inlined_call_operand.vmem [shape: f32[16,1], index: 2, kind: input, shape index: {}]   ;;  %s9041_s7 = inlined_call_operand.vmem [shape: f32[32,1], index: 7, kind: input, shape index: {}]   ;;  %s9042_s5 = inlined_call_operand.vmem [shape: bf16[32,400], index: 5, kind: input, shape index: {}]   ;;  %s9043_s6 = inlined_call_operand.vmem [shape: f32[32,1], index: 6, kind: input, shape index: {}]   ;;  %s9044_s8 = inlined_call_operand.vmem [shape: bf16[49,100], index: 8, kind: input, shape index: {}]   ;;  %s9045_s9 = inlined_call_operand.vmem [shape: bf16[32,800], index: 9, kind: input, shape index: {}]   ;;  %s9046_s11 = inlined_call_operand.vmem [shape: f32[32,1], index: 11, kind: input, shape index: {}]   ;;  %s9047_s10 = inlined_call_operand.vmem [shape: f32[32,1], index: 10, kind: input, shape index: {}]   ;;  %s9048_s13 = inlined_call_operand.vmem [shape: f32[4,1], index: 13, kind: input, shape index: {}]   ;;  %s9049_s12 = inlined_call_operand.vmem [shape: bf16[4,128], index: 12, kind: input, shape index: {}]   ;;  %s9050_s14 = inlined_call_operand.vmem [shape: f32[4,2], index: 14, kind: output, shape index: {}]  }
   0x1   :  { %v4390_v0 = vld [vmem:[%s9036_s0 + $0xa0] sm:$0xf]  ;;  %v5284_v1 = vld [vmem:[%s9036_s0 + $0xb0] sm:$0x30]  ;;  %v216_v3 = vsel %vm214_vm0, 4294967295, %v5615_v2  ;;  %vm310_vm3 = vcmask 539648  }
   0x2   :  { %v4391_v4 = vor.u32 %v5284_v1, %v4390_v0  ;;  %v5736_v5 = vsel %vm215_vm1, %v216_v3, 0  ;;  %v5282_v6 = vld [vmem:[%s9036_s0 + $0xa4] sm:$0xf]  ;;  %v4392_v7 = vld [vmem:[%s9036_s0 + $0xb4] sm:$0x30]  ;;  %vm1569_vm6 = vcmask 1040384  }
   0x3   :  { %v4395_v8 = vor.u32 %v5282_v6, %v4392_v7  ;;  %v4398_v9 = vld [vmem:[%s9036_s0 + $0xa8] sm:$0xf]  ;;  %v5285_v10 = vld [vmem:[%s9036_s0 + $0xb8] sm:$0x30]  ;;  %v5283_v11 = vld [vmem:[%s9036_s0 + $0xac] sm:$0xf] }
   0x4   :  { %v219_v12 = vand.u32 %v4391_v4, %v5736_v5  ;;  %v4399_v13 = vor.u32 %v5285_v10, %v4398_v9  ;;  %v4400_v14 = vld [vmem:[%s9036_s0 + $0xbc] sm:$0x30]  ;;  %v4370_v15 = vld [vmem:[%s9036_s0 + $0x78] sm:$0xf]  ;;  %v5279_v16 = vld [vmem:[%s9036_s0 + $0x88] sm:$0xf0] }
   0x5   :  { %v222_v17 = vand.u32 %v4395_v8, %v5736_v5  ;;  %v4403_v18 = vor.u32 %v5283_v11, %v4400_v14  ;;  %v5277_v19 = vld [vmem:[%s9036_s0 + $0x7c] sm:$0xf]  ;;  %v4372_v20 = vld [vmem:[%s9036_s0 + $0x8c] sm:$0xf0]  ;;  %v4378_v21 = vld [vmem:[%s9036_s0 + $0x80] sm:$0xf]  ;;  %v4371_v23 = vor.u32 %v5279_v16, %v4370_v15 }
   0x6   :  { %236 = vmatpush.bf16.msra.mxu0 %v219_v12  ;;  %v225_v22 = vand.u32 %v4399_v13, %v5736_v5  ;;  %v5280_v24 = vld [vmem:[%s9036_s0 + $0x90] sm:$0xf0]  ;;  %v5278_v25 = vld [vmem:[%s9036_s0 + $0x84] sm:$0xf]  ;;  %v4380_v26 = vld [vmem:[%s9036_s0 + $0x94] sm:$0xf0]  ;;  %v4375_v28 = vor.u32 %v5277_v19, %v4372_v20 }
   0x7   :  { %250 = vmatpush.bf16.msra.mxu1 %v222_v17  ;;  %v228_v27 = vand.u32 %v4403_v18, %v5736_v5  ;;  %v4350_v29 = vld [vmem:[%s9036_s0 + $0x50] sm:$0xf]  ;;  %v5274_v30 = vld [vmem:[%s9036_s0 + $0x60] sm:$0xf0]  ;;  %v4379_v31 = vor.u32 %v5280_v24, %v4378_v21  ;;  %v5272_v32 = vld [vmem:[%s9036_s0 + $0x54] sm:$0xf]  ;;  %v4383_v34 = vor.u32 %v5278_v25, %v4380_v26 }
   0x8   :  { %264 = vmatpush.bf16.msra.mxu2 %v225_v22  ;;  %v4352_v33 = vld [vmem:[%s9036_s0 + $0x64] sm:$0xf0]  ;;  %v4358_v35 = vld [vmem:[%s9036_s0 + $0x58] sm:$0xf]  ;;  %v5275_v36 = vld [vmem:[%s9036_s0 + $0x68] sm:$0xf0]  ;;  %v4351_v37 = vor.u32 %v5274_v30, %v4350_v29 }
   0x9   :  { %278 = vmatpush.bf16.msra.mxu3 %v228_v27  ;;  %v5273_v38 = vld [vmem:[%s9036_s0 + $0x5c] sm:$0xf]  ;;  %v4360_v39 = vld [vmem:[%s9036_s0 + $0x6c] sm:$0xf0]  ;;  %v4355_v40 = vor.u32 %v5272_v32, %v4352_v33  ;;  %v4330_v41 = vld [vmem:[%s9036_s0 + $0x28] sm:$0xf]  ;;  %v4359_v43 = vor.u32 %v5275_v36, %v4358_v35 }
   0xa   :  { %237 = vmatpush.bf16.msra.mxu0 %v4371_v23  ;;  %v5269_v42 = vld [vmem:[%s9036_s0 + $0x38] sm:$0xf0]  ;;  %v5267_v44 = vld [vmem:[%s9036_s0 + $0x2c] sm:$0xf]  ;;  %v4332_v45 = vld [vmem:[%s9036_s0 + $0x3c] sm:$0xf0]  ;;  %v4363_v46 = vor.u32 %v5273_v38, %v4360_v39 }
   0xb   :  { %251 = vmatpush.bf16.msra.mxu1 %v4375_v28  ;;  %v4338_v47 = vld [vmem:[%s9036_s0 + $0x30] sm:$0xf]  ;;  %v5270_v48 = vld [vmem:[%s9036_s0 + $0x40] sm:$0xf0]  ;;  %v5268_v49 = vld [vmem:[%s9036_s0 + $0x34] sm:$0xf]  ;;  %v4331_v50 = vor.u32 %v5269_v42, %v4330_v41  ;;  %v4335_v54 = vor.u32 %v5267_v44, %v4332_v45 }
   0xc   :  { %265 = vmatpush.bf16.msra.mxu2 %v4379_v31  ;;  %v4340_v51 = vld [vmem:[%s9036_s0 + $0x44] sm:$0xf0]  ;;  %v4406_v52 = vld [vmem:[%s9036_s0 + $0xb0] sm:$0xf]  ;;  %v5286_v53 = vld [vmem:[%s9036_s0 + $0xc0] sm:$0x30]  ;;  %v4339_v58 = vor.u32 %v5270_v48, %v4338_v47 }
   0xd   :  { %279 = vmatpush.bf16.msra.mxu3 %v4383_v34  ;;  %v4310_v55 = vld [vmem:[%s9036_s0] sm:$0xf]  ;;  %v5264_v56 = vld [vmem:[%s9036_s0 + $0x10] sm:$0xf0]  ;;  %v4407_v57 = vor.u32 %v5286_v53, %v4406_v52  ;;  %v5262_v59 = vld [vmem:[%s9036_s0 + $0x4] sm:$0xf]  ;;  %v4343_v61 = vor.u32 %v5268_v49, %v4340_v51 }
   0xe   :  { %238 = vmatpush.bf16.msra.mxu0 %v4351_v37  ;;  %v4312_v60 = vld [vmem:[%s9036_s0 + $0x14] sm:$0xf0]  ;;  %v4318_v62 = vld [vmem:[%s9036_s0 + $0x8] sm:$0xf]  ;;  %v5265_v63 = vld [vmem:[%s9036_s0 + $0x18] sm:$0xf0]  ;;  %v4311_v0 = vor.u32 %v5264_v56, %v4310_v55 }
   0xf   :  { %252 = vmatpush.bf16.msra.mxu1 %v4355_v40  ;;  %v5263_v1 = vld [vmem:[%s9036_s0 + $0xc] sm:$0xf]  ;;  %v4320_v2 = vld [vmem:[%s9036_s0 + $0x1c] sm:$0xf0]  ;;  %v4315_v3 = vor.u32 %v5262_v59, %v4312_v60  ;;  %v231_v4 = vand.u32 %v4407_v57, %v5736_v5  ;;  %v4319_v6 = vor.u32 %v5265_v63, %v4318_v62  ;;  %v4386_v7 = vld [vmem:[%s9036_s0 + $0x88] sm:$0xf] }
  0x10   :  { %266 = vmatpush.bf16.msra.mxu2 %v4359_v43  ;;  %v5281_v8 = vld [vmem:[%s9036_s0 + $0x98] sm:$0xf0]  ;;  %v4323_v9 = vor.u32 %v5263_v1, %v4320_v2  ;;  %v5261_v10 = vld [vmem:[%s9037_s1] sm:$0xff]  ;;  %v5276_v12 = vld [vmem:[%s9036_s0 + $0x70] sm:$0xf0]  ;;  %vm1565_vm11 = vcmask 269312  }
  0x11   :  { %280 = vmatpush.bf16.msra.mxu3 %v4363_v46  ;;  %v4387_v5 = vor.u32 %v5281_v8, %v4386_v7  ;;  %v4366_v11 = vld [vmem:[%s9036_s0 + $0x60] sm:$0xf]  ;;  %v4346_v14 = vld [vmem:[%s9036_s0 + $0x38] sm:$0xf]  ;;  %v5271_v15 = vld [vmem:[%s9036_s0 + $0x48] sm:$0xf0] }
  0x12   :  { %239 = vmatpush.bf16.msra.mxu0 %v4331_v50  ;;  %v4367_v13 = vor.u32 %v5276_v12, %v4366_v11  ;;  %v4347_v16 = vor.u32 %v5271_v15, %v4346_v14  ;;  %v4326_v17 = vld [vmem:[%s9036_s0 + $0x10] sm:$0xf]  ;;  %v5266_v18 = vld [vmem:[%s9036_s0 + $0x20] sm:$0xf0]  ;;  %v306_v12 = vld [vmem:[%s9038_s3 + $0x8] sm:$0xff]  ;;  %vm2184_vm12 = vcmask 777216  }
  0x13   :  { %253 = vmatpush.bf16.msra.mxu1 %v4335_v54  ;;  %v4327_v19 = vor.u32 %v5266_v18, %v4326_v17  ;;  %v305_v11 = vld [vmem:[%s9038_s3] sm:$0xff]  ;;  %v4695_v15 = vld [vmem:[%s9039_s4 + $0x230] sm:$0xf]  ;;  %s5621_s25 = smov 41   ;;  %s5622_s26 = smov 90   ;;  %vm2072_vm13 = vcmask 334848  }
  0x14   :  { %267 = vmatpush.bf16.msra.mxu2 %v4339_v58  ;;  %v5015_v18 = vld [vmem:[%s9039_s4 + $0x4b0] sm:$0xf]  ;;  %s5623_s1 = smov 22   ;;  %s5624_s27 = smov 33   ;;  %vm2136_vm14 = vcmask 490496   ;;  %vm2061_vm15 = vcmask 89088  }
  0x15   :  { %281 = vmatpush.bf16.msra.mxu3 %v4343_v61  ;;  %s5625_s3 = smov 3   ;;  %s5626_s28 = smov 101   ;;  %vm2100_vm0 = vcmask 23552   ;;  %vm2087_vm1 = vcmask 179200  }
  0x16   :  { %240 = vmatpush.bf16.msra.mxu0 %v4311_v0  ;;  %s5627_s29 = smov 82   ;;  %s5628_s30 = smov 52  }
  0x17   :  { %254 = vmatpush.bf16.msra.mxu1 %v4315_v3  ;;  %s5629_s15 = smov 30   ;;  %s5630_s16 = smov 79  }
  0x18   :  { %268 = vmatpush.bf16.msra.mxu2 %v4319_v6  ;;  %s5631_s17 = smov 120   ;;  %s5633_s0 = smov 112  }
  0x19   :  { %282 = vmatpush.bf16.msra.mxu3 %v4323_v9  ;;  %4408 = vmatmul.msk.bf16.vlgmr.msra.gmra.mxu0 %vm210_vm2, %v5261_v10  ;;  %s5634_s18 = smov 49   ;;  %s5639_s19 = smov 104  }
  0x1a   :  { %292 = vmatpush.bf16.msrb.mxu0 %v231_v4  ;;  %4409 = vmatmul.msk.bf16.vlgmr.msra.gmra.mxu1 %vm210_vm2, %v5261_v10  ;;  %s5640_s21 = smov 88   ;;  %s5641_s22 = smov 84  }
  0x1b   :  { %4410 = vmatmul.msk.bf16.vlgmr.msra.gmra.mxu2 %vm210_vm2, %v5261_v10  ;;  %s5643_s23 = smov 96  }
  0x1c   :  { %4411 = vmatmul.msk.bf16.vlgmr.msra.gmra.mxu3 %vm210_vm2, %v5261_v10 }
  0x1e   :  { %293 = vmatpush.bf16.msrb.mxu0 %v4387_v5  ;;  %v5616_v5 = vmov 0  }
  0x1f   :  { %5533 = vset.pattern.permute.xlu0 %v5616_v5  ;;  %5534 = vset.pattern.permute.xlu1 %v5616_v5 }
  0x20   :  { %5532 = vset.pattern.permute.xlu2 %v5616_v5 }
  0x22   :  { %294 = vmatpush.bf16.msrb.mxu0 %v4367_v13 }
  0x26   :  { %295 = vmatpush.bf16.msrb.mxu0 %v4347_v16  ;;  %v5362_v16 = vld [vmem:[%s9039_s4 + $0x254] sm:$0xf0] }
  0x27   :  { %v5954_v17 = vor.u32 %v5362_v16, %v4695_v15  ;;  %v5312_v15 = vld [vmem:[%s9039_s4 + $0xc4] sm:$0xf0] }
  0x29   :  { %1602 = vmatpush.bf16.msrb.mxu1 %v5954_v17 }
  0x2a   :  { %296 = vmatpush.bf16.msrb.mxu0 %v4327_v19  ;;  %v5442_v19 = vld [vmem:[%s9039_s4 + $0x4d4] sm:$0xf0] }
  0x2d   :  { %4412 = vmatmul.msk.bf16.vlgmr.msrb.gmra.mxu0 %vm210_vm2, %v5261_v10  ;;  %vm2046_vm2 = vcmask 244736  }
  0x96   :  { %v242_v20 = vpop.f32.mrf.mxu0 }
  0x97   :  { %v256_v21 = vpop.f32.mrf.mxu1 }
  0x98   :  { %v307_v24 = vadd.f32 %v256_v21, %v242_v20 }
  0x9e   :  { %v270_v22 = vpop.f32.mrf.mxu2  ;;  %v244_v23 = vpop.f32.mrf.mxu0 }
  0x9f   :  { %v284_v25 = vpop.f32.mrf.mxu3  ;;  %v308_v26 = vadd.f32 %v307_v24, %v270_v22  ;;  %v258_v27 = vpop.f32.mrf.mxu1  ;;  %v4975_v24 = vld [vmem:[%s9039_s4 + $0x460] sm:$0xf] }
  0xa0   :  { %v315_v32 = vadd.f32 %v258_v27, %v244_v23 }
  0xa1   :  { %v309_v28 = vadd.f32 %v308_v26, %v284_v25  ;;  %v5432_v26 = vld [vmem:[%s9039_s4 + $0x484] sm:$0xf0] }
  0xa6   :  { %v272_v30 = vpop.f32.mrf.mxu2 }
  0xa7   :  { %v316_v34 = vadd.f32 %v315_v32, %v272_v30  ;;  %v286_v35 = vpop.f32.mrf.mxu3  ;;  %v5342_v32 = vld [vmem:[%s9039_s4 + $0x1b4] sm:$0xf0] }
  0xa9   :  { %v317_v37 = vadd.f32 %v316_v34, %v286_v35  ;;  %v5422_v34 = vld [vmem:[%s9039_s4 + $0x434] sm:$0xf0] }
  0xaa   :  { %v298_v29 = vpop.f32.mrf.mxu0 }
  0xab   :  { %v311_v31 = vsel %vm310_vm3, %v298_v29, 0.0 }
  0xac   :  { %v312_v33 = vadd.f32 %v311_v31, %v309_v28  ;;  %v5017_v28 = vld [vmem:[%s9039_s4 + $0x4d8] sm:$0xf0]  ;;  %v4615_v31 = vld [vmem:[%s9039_s4 + $0x190] sm:$0xf] }
  0xae   :  { %313 = vadd.xlane.f32.xlu0 %v312_v33  ;;  %v4935_v33 = vld [vmem:[%s9039_s4 + $0x410] sm:$0xf] }
  0xb2   :  { %v300_v36 = vpop.f32.mrf.mxu0 }
  0xb3   :  { %v318_v38 = vsel %vm310_vm3, %v300_v36, 0.0 }
  0xb4   :  { %v319_v39 = vadd.f32 %v318_v38, %v317_v37 }
  0xb6   :  { %320 = vadd.xlane.f32.xlu0 %v319_v39  ;;  %v6015_v39 = vor.u32 %v5342_v32, %v4615_v31  ;;  %v4817_v32 = vld [vmem:[%s9039_s4 + $0x348] sm:$0xf0] }
  0xca   :  { %406 = vperm.xlu0 %5533, %v305_v11   ;;  %v5397_v11 = vld [vmem:[%s9039_s4 + $0x374] sm:$0xf] }
 0x121   :  { %v314_v40 = vpop.xlane.xlu0 %313 }
 0x122   :  { %v322_v41 = vmul.f32 0.0017301039, %v314_v40  ;;  %v5417_v40 = vld [vmem:[%s9039_s4 + $0x414] sm:$0xf] }
 0x124   :  { %v5897_v42 = vsub.f32 %v242_v20, %v322_v41  ;;  %v5899_v43 = vsub.f32 %v256_v21, %v322_v41  ;;  %v5901_v44 = vsub.f32 %v270_v22, %v322_v41  ;;  %v5903_v45 = vsub.f32 %v298_v29, %v322_v41  ;;  %v4655_v20 = vld [vmem:[%s9039_s4 + $0x1e0] sm:$0xf] }
 0x125   :  { %v5905_v46 = vsub.f32 %v284_v25, %v322_v41  ;;  %v5967_v22 = vor.u32 %v5442_v19, %v5015_v18  ;;  %v5989_v29 = vor.u32 %v5432_v26, %v4975_v24  ;;  %v4937_v41 = vld [vmem:[%s9039_s4 + $0x438] sm:$0xf0]  ;;  %v4815_v18 = vld [vmem:[%s9039_s4 + $0x320] sm:$0xf]  ;;  %v5392_v19 = vld [vmem:[%s9039_s4 + $0x344] sm:$0xf0] }
 0x126   :  { %v334_v47 = vmul.f32 %v5897_v42, %v5897_v42  ;;  %v335_v48 = vmul.f32 %v5899_v43, %v5899_v43  ;;  %v336_v49 = vmul.f32 %v5901_v44, %v5901_v44  ;;  %v338_v52 = vmul.f32 %v5903_v45, %v5903_v45 }
 0x127   :  { %v337_v54 = vmul.f32 %v5905_v46, %v5905_v46  ;;  %1616 = vmatpush.bf16.msrb.mxu2 %v5967_v22 }
 0x128   :  { %v344_v50 = vadd.f32 %v335_v48, %v334_v47  ;;  %v347_v60 = vsel %vm310_vm3, %v338_v52, 0.0  ;;  %v6024_v48 = vor.u32 %v5422_v34, %v4935_v33  ;;  %v5412_v52 = vld [vmem:[%s9039_s4 + $0x3e4] sm:$0xf0]  ;;  %v6122_v33 = vor.u32 %v5392_v19, %v4815_v18  ;;  %v4455_v34 = vld [vmem:[%s9039_s4 + $0x50] sm:$0xf] }
 0x129   :  { %v321_v51 = vpop.xlane.xlu0 %320  ;;  %v304_v19 = vld [vmem:[%s9040_s2 + $0x8] sm:$0xff] }
 0x12a   :  { %v323_v53 = vmul.f32 0.0017301039, %v321_v51  ;;  %v345_v55 = vadd.f32 %v344_v50, %v336_v49  ;;  %v4575_v49 = vld [vmem:[%s9039_s4 + $0x140] sm:$0xf]  ;;  %v5332_v50 = vld [vmem:[%s9039_s4 + $0x164] sm:$0xf0] }
 0x12b   :  { %1617 = vmatpush.bf16.msrb.mxu2 %v5989_v29  ;;  %v4895_v51 = vld [vmem:[%s9039_s4 + $0x3c0] sm:$0xf] }
 0x12c   :  { %v346_v56 = vadd.f32 %v345_v55, %v337_v54  ;;  %v5917_v57 = vsub.f32 %v244_v23, %v323_v53  ;;  %v5919_v58 = vsub.f32 %v258_v27, %v323_v53  ;;  %v5921_v59 = vsub.f32 %v272_v30, %v323_v53  ;;  %v5352_v23 = vld [vmem:[%s9039_s4 + $0x204] sm:$0xf0]  ;;  %v5437_v27 = vld [vmem:[%s9039_s4 + $0x4b4] sm:$0xf] }
 0x12d   :  { %v5924_v61 = vsub.f32 %v300_v36, %v323_v53  ;;  %v5926_v63 = vsub.f32 %v286_v35, %v323_v53  ;;  %v5976_v25 = vor.u32 %v5352_v23, %v4655_v20  ;;  %v5991_v30 = vor.u32 %v5437_v27, %v5017_v28  ;;  %v5427_v35 = vld [vmem:[%s9039_s4 + $0x464] sm:$0xf]  ;;  %v4977_v36 = vld [vmem:[%s9039_s4 + $0x488] sm:$0xf0] }
 0x12e   :  { %v348_v62 = vadd.f32 %v347_v60, %v346_v56  ;;  %v339_v0 = vmul.f32 %v5917_v57, %v5917_v57  ;;  %v340_v1 = vmul.f32 %v5919_v58, %v5919_v58  ;;  %v341_v2 = vmul.f32 %v5921_v59, %v5921_v59  ;;  %v303_v23 = vld [vmem:[%s9040_s2] sm:$0xff]  ;;  %s5632_s2 = smov 71  }
 0x12f   :  { %v343_v4 = vmul.f32 %v5924_v61, %v5924_v61  ;;  %v342_v6 = vmul.f32 %v5926_v63, %v5926_v63  ;;  %1658 = vmatpush.bf16.msra.mxu0 %v5991_v30  ;;  %v6012_v37 = vor.u32 %v5427_v35, %v4977_v36  ;;  %1603 = vmatpush.bf16.msrb.mxu1 %v5976_v25  ;;  %v5302_v35 = vld [vmem:[%s9039_s4 + $0x74] sm:$0xf0]  ;;  %v6133_v36 = vld [vmem:[%s9039_s4 + $0x5a0] sm:$0x11] }
 0x130   :  { %349 = vadd.xlane.f32.xlu1 %v348_v62  ;;  %v351_v3 = vadd.f32 %v340_v1, %v339_v0  ;;  %v6041_v55 = vor.u32 %v5417_v40, %v4937_v41  ;;  %v6045_v60 = vor.u32 %v5332_v50, %v4575_v49  ;;  %v5407_v62 = vld [vmem:[%s9039_s4 + $0x3c4] sm:$0xf]  ;;  %v4897_v0 = vld [vmem:[%s9039_s4 + $0x3e8] sm:$0xf0]  ;;  %1618 = vmatpush.bf16.msrb.mxu2 %v6024_v48  ;;  %v4775_v41 = vld [vmem:[%s9039_s4 + $0x2d0] sm:$0xf]  ;;  %v1185_v49 = vunpack.c.l.b16 %v6133_v36 }
 0x131   :  { %v354_v9 = vsel %vm310_vm3, %v343_v4, 0.0  ;;  %v6055_v1 = vor.u32 %v5412_v52, %v4895_v51  ;;  %v6147_v50 = vsel %vm1569_vm6, 65535, %v5616_v5  ;;  %vm2803_vm3 = vcmask 400384  }
 0x132   :  { %v352_v7 = vadd.f32 %v351_v3, %v341_v2  ;;  %9178 = vst [vmem:[#allocation2_spill] sm:$0xff] %v6045_v60  ;;  %v4535_v2 = vld [vmem:[%s9039_s4 + $0xf0] sm:$0xf]  ;;  %v5322_v3 = vld [vmem:[%s9039_s4 + $0x114] sm:$0xf0]  ;;  %v1375_v5 = vpack.c.b16 %v1185_v49, %v1185_v49 }
 0x133   :  { %1659 = vmatpush.bf16.msra.mxu0 %v6012_v37  ;;  %1604 = vmatpush.bf16.msrb.mxu1 %v6015_v39  ;;  %9183 = vst [vmem:[#allocation5_spill] sm:$0xff] %v6147_v50  ;;  %v4983_v49 = vld [vmem:[%s9039_s4 + $0x468] sm:$0xf] }
 0x134   :  { %v353_v8 = vadd.f32 %v352_v7, %v342_v6  ;;  %v4855_v6 = vld [vmem:[%s9039_s4 + $0x370] sm:$0xf]  ;;  %v5402_v7 = vld [vmem:[%s9039_s4 + $0x394] sm:$0xf0]  ;;  %1619 = vmatpush.bf16.msrb.mxu2 %v6055_v1 }
 0x136   :  { %v355_v10 = vadd.f32 %v354_v9, %v353_v8  ;;  %v6070_v8 = vor.u32 %v5407_v62, %v4897_v0  ;;  %v5377_v62 = vld [vmem:[%s9039_s4 + $0x2d4] sm:$0xf]  ;;  %v4777_v0 = vld [vmem:[%s9039_s4 + $0x2f8] sm:$0xf0] }
 0x137   :  { %1660 = vmatpush.bf16.msra.mxu0 %v6041_v55  ;;  %1605 = vmatpush.bf16.msrb.mxu1 %v6045_v60  ;;  %v6193_v18 = vor.u32 %v5377_v62, %v4777_v0 }
 0x138   :  { %356 = vadd.xlane.f32.xlu1 %v355_v10  ;;  %v6073_v10 = vor.u32 %v5322_v3, %v4535_v2  ;;  %v4415_v3 = vld [vmem:[%s9039_s4] sm:$0xf] }
 0x139   :  { %9186 = vst [vmem:[#allocation8_spill] sm:$0xff] %v6193_v18 }
 0x13a   :  { %9179 = vst [vmem:[#allocation3_spill] sm:$0xff] %v6073_v10 }
 0x13b   :  { %1661 = vmatpush.bf16.msra.mxu0 %v6070_v8  ;;  %1606 = vmatpush.bf16.msrb.mxu1 %v6073_v10 }
 0x151   :  { %411 = vperm.xlu1 %5534, %v306_v12   ;;  %v4857_v12 = vld [vmem:[%s9039_s4 + $0x398] sm:$0xf0] }
 0x152   :  { %v6103_v24 = vor.u32 %v5397_v11, %v4857_v12  ;;  %v4703_v11 = vld [vmem:[%s9039_s4 + $0x238] sm:$0xf]  ;;  %v6181_v12 = vand.u32 %v6147_v50, %v1375_v5 }
 0x153   :  { %v4623_v5 = vld [vmem:[%s9039_s4 + $0x198] sm:$0xf] }
 0x154   :  { %1662 = vmatpush.bf16.msra.mxu0 %v6103_v24  ;;  %1635 = vmatpush.bf16.msrb.mxu3 %v6181_v12 }
 0x1a3   :  { %v350_v13 = vpop.xlane.xlu1 %349 }
 0x1a4   :  { %v358_v14 = vmul.f32 0.0017301039, %v350_v13  ;;  %v6082_v13 = vor.u32 %v5402_v7, %v4855_v6  ;;  %v4735_v6 = vld [vmem:[%s9039_s4 + $0x280] sm:$0xf] }
 0x1a6   :  { %v5965_v21 = vadd.f32 1e-05, %v358_v14  ;;  %v4495_v14 = vld [vmem:[%s9039_s4 + $0xa0] sm:$0xf]  ;;  %1620 = vmatpush.bf16.msrb.mxu2 %v6082_v13 }
 0x1a7   :  { %v6113_v31 = vor.u32 %v5312_v15, %v4495_v14  ;;  %v5363_v14 = vld [vmem:[%s9039_s4 + $0x25c] sm:$0xf0]  ;;  %v5023_v15 = vld [vmem:[%s9039_s4 + $0x4b8] sm:$0xf] }
 0x1a8   :  { %5595 = vrsqrt.f32 %v5965_v21  ;;  %vm368_vm5 = vweird.f32 %v5965_v21 }
 0x1a9   :  { %9182 = vst [vmem:[#allocation4_spill] sm:$0xff] %v6113_v31  ;;  %1607 = vmatpush.bf16.msrb.mxu1 %v6113_v31 }
 0x1aa   :  { %1621 = vmatpush.bf16.msrb.mxu2 %v6122_v33 }
 0x1ab   :  { %v357_v38 = vpop.xlane.xlu1 %356 }
 0x1ac   :  { %v359_v47 = vmul.f32 0.0017301039, %v357_v38 }
 0x1ae   :  { %v5596_v53 = vpop.eup %5595  ;;  %v6038_v54 = vadd.f32 1e-05, %v359_v47  ;;  %v5382_v47 = vld [vmem:[%s9039_s4 + $0x2f4] sm:$0xf0] }
 0x1af   :  { %v363_v56 = vmul.f32 %v5596_v53, %v5965_v21  ;;  %vm369_vm4 = vweird.f32 %v5596_v53  ;;  %v5387_v21 = vld [vmem:[%s9039_s4 + $0x324] sm:$0xf]  ;;  %v6162_v2 = vor.u32 %v5382_v47, %v4775_v41  ;;  %v5353_v47 = vld [vmem:[%s9039_s4 + $0x20c] sm:$0xf0] }
 0x1b0   :  { %5597 = vrsqrt.f32 %v6038_v54  ;;  %vm6108_vm7 = vmor %vm368_vm5, %vm369_vm4  ;;  %v6150_v52 = vor.u32 %v5387_v21, %v4817_v32  ;;  %vm378_vm9 = vweird.f32 %v6038_v54  ;;  %v5358_v21 = vld [vmem:[%s9039_s4 + $0x23c] sm:$0xf]  ;;  %v4705_v32 = vld [vmem:[%s9039_s4 + $0x260] sm:$0xf0]  ;;  %vm2950_vm4 = vcmask 130048  }
 0x1b1   :  { %v364_v4 = vmul.f32 %v5596_v53, %v363_v56  ;;  %v6153_v56 = vor.u32 %v5302_v35, %v4455_v34  ;;  %1622 = vmatpush.bf16.msrb.mxu2 %v6162_v2  ;;  %v6222_v35 = vor.u32 %v5363_v14, %v4703_v11  ;;  %v5095_v11 = vld [vmem:[%s9039_s4 + $0x550] sm:$0xf]  ;;  %v5462_v14 = vld [vmem:[%s9039_s4 + $0x574] sm:$0xf0]  ;;  %vm3041_vm5 = vcmask 801792  }
 0x1b2   :  { %9184 = vst [vmem:[#allocation6_spill] sm:$0xff] %v6150_v52  ;;  %1663 = vmatpush.bf16.msra.mxu0 %v6150_v52 }
 0x1b3   :  { %v365_v9 = vmul.f32 0.5, %v364_v4  ;;  %9185 = vst [vmem:[#allocation7_spill] sm:$0xff] %v6153_v56  ;;  %v5292_v4 = vld [vmem:[%s9039_s4 + $0x24] sm:$0xf0]  ;;  %1608 = vmatpush.bf16.msrb.mxu1 %v6153_v56  ;;  %v5287_v56 = vld [vmem:[%s9039_s4 + $0x4] sm:$0xf] }
 0x1b5   :  { %v366_v16 = vsub.f32 1.5, %v365_v9  ;;  %v5372_v9 = vld [vmem:[%s9039_s4 + $0x2a4] sm:$0xf0] }
 0x1b6   :  { %v6096_v20 = vpop.eup %5597  ;;  %v6213_v28 = vor.u32 %v5372_v9, %v4735_v6  ;;  %1664 = vmatpush.bf16.msra.mxu0 %v6193_v18  ;;  %v5423_v6 = vld [vmem:[%s9039_s4 + $0x43c] sm:$0xf0] }
 0x1b7   :  { %v373_v26 = vmul.f32 %v6096_v20, %v6038_v54  ;;  %v367_v27 = vmul.f32 %v5596_v53, %v366_v16  ;;  %vm379_vm8 = vweird.f32 %v6096_v20  ;;  %v5443_v16 = vld [vmem:[%s9039_s4 + $0x4dc] sm:$0xf0]  ;;  %v4737_v54 = vld [vmem:[%s9039_s4 + $0x2a8] sm:$0xf0] }
 0x1b8   :  { %vm380_vm10 = vmor %vm378_vm9, %vm379_vm8  ;;  %1623 = vmatpush.bf16.msrb.mxu2 %v6213_v28 }
 0x1b9   :  { %v374_v38 = vmul.f32 %v6096_v20, %v373_v26  ;;  %v371_v40 = vsel %vm6108_vm7, %v5596_v53, %v367_v27  ;;  %v6201_v26 = vor.u32 %v5292_v4, %v4415_v3  ;;  %v5367_v27 = vld [vmem:[%s9039_s4 + $0x284] sm:$0xf]  ;;  %v5343_v3 = vld [vmem:[%s9039_s4 + $0x1bc] sm:$0xf0]  ;;  %v4943_v4 = vld [vmem:[%s9039_s4 + $0x418] sm:$0xf] }
 0x1ba   :  { %v382_v51 = vmul.f32 %v371_v40, %v303_v23  ;;  %v4663_v40 = vld [vmem:[%s9039_s4 + $0x1e8] sm:$0xf]  ;;  %v6269_v9 = vor.u32 %v5423_v6, %v4943_v4  ;;  %v5338_v4 = vld [vmem:[%s9039_s4 + $0x19c] sm:$0xf]  ;;  %v4625_v6 = vld [vmem:[%s9039_s4 + $0x1c0] sm:$0xf0] }
 0x1bb   :  { %v375_v53 = vmul.f32 0.5, %v374_v38  ;;  %9187 = vst [vmem:[#allocation9_spill] sm:$0xff] %v6201_v26  ;;  %v6224_v38 = vor.u32 %v5443_v16, %v5023_v15  ;;  %1609 = vmatpush.bf16.msrb.mxu1 %v6201_v26  ;;  %v6247_v62 = vor.u32 %v5353_v47, %v4663_v40  ;;  %v6279_v15 = vor.u32 %v5462_v14, %v5095_v11  ;;  %v5348_v16 = vld [vmem:[%s9039_s4 + $0x1ec] sm:$0xf]  ;;  %v5055_v40 = vld [vmem:[%s9039_s4 + $0x500] sm:$0xf] }
 0x1bc   :  { %386 = vperm.xlu2 %5532, %v382_v51   ;;  %v6239_v51 = vor.u32 %v5367_v27, %v4737_v54  ;;  %1686 = vmatpush.bf16.msra.mxu2 %v6222_v35  ;;  %9192 = vst [vmem:[#allocation14_spill] sm:$0xff] %v6269_v9  ;;  %v4583_v27 = vld [vmem:[%s9039_s4 + $0x148] sm:$0xf]  ;;  %v5333_v54 = vld [vmem:[%s9039_s4 + $0x16c] sm:$0xf0]  ;;  %v6332_v11 = vor.u32 %v5338_v4, %v4625_v6 }
 0x1bd   :  { %v376_v7 = vsub.f32 1.5, %v375_v53  ;;  %9188 = vst [vmem:[#allocation10_spill] sm:$0xff] %v6224_v38  ;;  %v6242_v53 = vor.u32 %v5358_v21, %v4705_v32  ;;  %1636 = vmatpush.bf16.msrb.mxu3 %v6279_v15  ;;  %v4903_v21 = vld [vmem:[%s9039_s4 + $0x3c8] sm:$0xf]  ;;  %v6299_v32 = vor.u32 %v5333_v54, %v4583_v27  ;;  %v4543_v14 = vld [vmem:[%s9039_s4 + $0xf8] sm:$0xf] }
 0x1be   :  { %9189 = vst [vmem:[#allocation11_spill] sm:$0xff] %v6239_v51  ;;  %1665 = vmatpush.bf16.msra.mxu0 %v6239_v51  ;;  %v5403_v54 = vld [vmem:[%s9039_s4 + $0x39c] sm:$0xf0]  ;;  %v4503_v6 = vld [vmem:[%s9039_s4 + $0xa8] sm:$0xf] }
 0x1bf   :  { %v377_v23 = vmul.f32 %v6096_v20, %v376_v7  ;;  %9190 = vst [vmem:[#allocation12_spill] sm:$0xff] %v6242_v53  ;;  %1700 = vmatpush.bf16.msra.mxu1 %v6224_v38  ;;  %v6267_v7 = vor.u32 %v5343_v3, %v4623_v5  ;;  %v4697_v5 = vld [vmem:[%s9039_s4 + $0x258] sm:$0xf0]  ;;  %v5288_v38 = vld [vmem:[%s9039_s4 + $0xc] sm:$0xf] }
 0x1c0   :  { %1687 = vmatpush.bf16.msra.mxu2 %v6247_v62  ;;  %9195 = vst [vmem:[#allocation17_spill] sm:$0xff] %v6332_v11 }
 0x1c1   :  { %v381_v34 = vsel %vm380_vm10, %v6096_v20, %v377_v23  ;;  %v5433_v20 = vld [vmem:[%s9039_s4 + $0x48c] sm:$0xf0] }
 0x1c2   :  { %v383_v41 = vmul.f32 %v381_v34, %v304_v19  ;;  %v6249_v0 = vor.u32 %v5433_v20, %v4983_v49  ;;  %1728 = vmatpush.bf16.msrb.mxu0 %v6242_v53  ;;  %v4665_v19 = vld [vmem:[%s9039_s4 + $0x210] sm:$0xf0]  ;;  %v5413_v34 = vld [vmem:[%s9039_s4 + $0x3ec] sm:$0xf0] }
 0x1c3   :  { %v6288_v23 = vor.u32 %v5348_v16, %v4665_v19  ;;  %v6311_v47 = vor.u32 %v5413_v34, %v4903_v21  ;;  %v5357_v20 = vld [vmem:[%s9039_s4 + $0x234] sm:$0xf]  ;;  %v5323_v16 = vld [vmem:[%s9039_s4 + $0x11c] sm:$0xf0]  ;;  %v4863_v19 = vld [vmem:[%s9039_s4 + $0x378] sm:$0xf]  ;;  %v412_v53 = vpop.permute.xlu1 %411 }
 0x1c4   :  { %391 = vperm.xlu2 %5532, %v383_v41   ;;  %9191 = vst [vmem:[#allocation13_spill] sm:$0xff] %v6249_v0  ;;  %1701 = vmatpush.bf16.msra.mxu1 %v6249_v0  ;;  %v5452_v41 = vld [vmem:[%s9039_s4 + $0x524] sm:$0xf0]  ;;  %v6322_v3 = vor.u32 %v5357_v20, %v4697_v5  ;;  %v6344_v27 = vor.u32 %v5323_v16, %v4543_v14  ;;  %v5347_v34 = vld [vmem:[%s9039_s4 + $0x1e4] sm:$0xf] }
 0x1c5   :  { %1688 = vmatpush.bf16.msra.mxu2 %v6267_v7  ;;  %9193 = vst [vmem:[#allocation15_spill] sm:$0xff] %v6288_v23  ;;  %v6313_v49 = vor.u32 %v5452_v41, %v5055_v40  ;;  %v6350_v21 = vor.u32 %v5403_v54, %v4863_v19  ;;  %v4657_v40 = vld [vmem:[%s9039_s4 + $0x208] sm:$0xf0]  ;;  %v4585_v5 = vld [vmem:[%s9039_s4 + $0x170] sm:$0xf0] }
 0x1c6   :  { %1729 = vmatpush.bf16.msrb.mxu0 %v6288_v23  ;;  %9194 = vst [vmem:[#allocation16_spill] sm:$0xff] %v6311_v47  ;;  %v6359_v41 = vor.u32 %v5347_v34, %v4657_v40  ;;  %v5328_v20 = vld [vmem:[%s9039_s4 + $0x14c] sm:$0xf]  ;;  %v5313_v14 = vld [vmem:[%s9039_s4 + $0xcc] sm:$0xf0] }
 0x1c7   :  { %1637 = vmatpush.bf16.msrb.mxu3 %v6313_v49  ;;  %9196 = vst [vmem:[#allocation18_spill] sm:$0xff] %v6350_v21  ;;  %v6368_v4 = vor.u32 %v5328_v20, %v4585_v5  ;;  %v4823_v16 = vld [vmem:[%s9039_s4 + $0x328] sm:$0xf]  ;;  %v6380_v19 = vor.u32 %v5313_v14, %v4503_v6  ;;  %v5393_v54 = vld [vmem:[%s9039_s4 + $0x34c] sm:$0xf0] }
 0x1c8   :  { %1702 = vmatpush.bf16.msra.mxu1 %v6269_v9  ;;  %v6386_v34 = vor.u32 %v5393_v54, %v4823_v16  ;;  %v5337_v40 = vld [vmem:[%s9039_s4 + $0x194] sm:$0xf]  ;;  %v4617_v20 = vld [vmem:[%s9039_s4 + $0x1b8] sm:$0xf0]  ;;  %v4545_v14 = vld [vmem:[%s9039_s4 + $0x120] sm:$0xf0] }
 0x1c9   :  { %1689 = vmatpush.bf16.msra.mxu2 %v6299_v32  ;;  %9197 = vst [vmem:[#allocation19_spill] sm:$0xff] %v6368_v4  ;;  %v6395_v5 = vor.u32 %v5337_v40, %v4617_v20  ;;  %v5318_v6 = vld [vmem:[%s9039_s4 + $0xfc] sm:$0xf]  ;;  %v4463_v54 = vld [vmem:[%s9039_s4 + $0x58] sm:$0xf] }
 0x1ca   :  { %1730 = vmatpush.bf16.msrb.mxu0 %v6332_v11  ;;  %9198 = vst [vmem:[#allocation20_spill] sm:$0xff] %v6380_v19  ;;  %v6404_v16 = vor.u32 %v5318_v6, %v4545_v14  ;;  %v5303_v40 = vld [vmem:[%s9039_s4 + $0x7c] sm:$0xf0]  ;;  %v4783_v20 = vld [vmem:[%s9039_s4 + $0x2d8] sm:$0xf] }
 0x1cb   :  { %1644 = vmatpush.bf16.msra.mxu3 %v6322_v3  ;;  %9199 = vst [vmem:[#allocation21_spill] sm:$0xff] %v6386_v34  ;;  %v5383_v6 = vld [vmem:[%s9039_s4 + $0x2fc] sm:$0xf0]  ;;  %v4423_v9 = vld [vmem:[%s9039_s4 + $0x8] sm:$0xf] }
 0x1cc   :  { %1703 = vmatpush.bf16.msra.mxu1 %v6311_v47  ;;  %9200 = vst [vmem:[#allocation22_spill] sm:$0xff] %v6404_v16  ;;  %v6422_v14 = vor.u32 %v5383_v6, %v4783_v20  ;;  %v4577_v47 = vld [vmem:[%s9039_s4 + $0x168] sm:$0xf0]  ;;  %v4505_v20 = vld [vmem:[%s9039_s4 + $0xd0] sm:$0xf0] }
 0x1cd   :  { %1690 = vmatpush.bf16.msra.mxu2 %v6344_v27 }
 0x1ce   :  { %1731 = vmatpush.bf16.msrb.mxu0 %v6368_v4  ;;  %9202 = vst [vmem:[#allocation24_spill] sm:$0xff] %v6422_v14 }
 0x1cf   :  { %1645 = vmatpush.bf16.msra.mxu3 %v6359_v41 }
 0x1d0   :  { %1704 = vmatpush.bf16.msra.mxu1 %v6350_v21  ;;  %v6416_v21 = vor.u32 %v5303_v40, %v4463_v54  ;;  %v5308_v40 = vld [vmem:[%s9039_s4 + $0xac] sm:$0xf] }
 0x1d1   :  { %1691 = vmatpush.bf16.msra.mxu2 %v6380_v19  ;;  %v6440_v6 = vor.u32 %v5308_v40, %v4505_v20  ;;  %v5373_v40 = vld [vmem:[%s9039_s4 + $0x2ac] sm:$0xf0] }
 0x1d2   :  { %9201 = vst [vmem:[#allocation23_spill] sm:$0xff] %v6416_v21  ;;  %1732 = vmatpush.bf16.msrb.mxu0 %v6404_v16 }
 0x1d3   :  { %1646 = vmatpush.bf16.msra.mxu3 %v6395_v5  ;;  %9203 = vst [vmem:[#allocation25_spill] sm:$0xff] %v6440_v6 }
 0x1d4   :  { %1705 = vmatpush.bf16.msra.mxu1 %v6386_v34  ;;  %v5327_v34 = vld [vmem:[%s9039_s4 + $0x144] sm:$0xf] }
 0x1d5   :  { %1692 = vmatpush.bf16.msra.mxu2 %v6416_v21  ;;  %v6431_v54 = vor.u32 %v5327_v34, %v4577_v47  ;;  %v5293_v47 = vld [vmem:[%s9039_s4 + $0x2c] sm:$0xf0]  ;;  %v4743_v34 = vld [vmem:[%s9039_s4 + $0x288] sm:$0xf] }
 0x1d6   :  { %v6452_v0 = vor.u32 %v5293_v47, %v4423_v9  ;;  %1733 = vmatpush.bf16.msrb.mxu0 %v6440_v6  ;;  %v6458_v20 = vor.u32 %v5373_v40, %v4743_v34  ;;  %v4537_v9 = vld [vmem:[%s9039_s4 + $0x118] sm:$0xf0]  ;;  %v4465_v34 = vld [vmem:[%s9039_s4 + $0x80] sm:$0xf0] }
 0x1d7   :  { %1647 = vmatpush.bf16.msra.mxu3 %v6431_v54  ;;  %v5298_v6 = vld [vmem:[%s9039_s4 + $0x5c] sm:$0xf] }
 0x1d8   :  { %1706 = vmatpush.bf16.msra.mxu1 %v6422_v14  ;;  %9204 = vst [vmem:[#allocation26_spill] sm:$0xff] %v6452_v0  ;;  %v5317_v14 = vld [vmem:[%s9039_s4 + $0xf4] sm:$0xf]  ;;  %v6476_v40 = vor.u32 %v5298_v6, %v4465_v34 }
 0x1d9   :  { %9205 = vst [vmem:[#allocation27_spill] sm:$0xff] %v6458_v20  ;;  %1693 = vmatpush.bf16.msra.mxu2 %v6452_v0  ;;  %v6468_v47 = vor.u32 %v5317_v14, %v4537_v9  ;;  %v4497_v14 = vld [vmem:[%s9039_s4 + $0xc8] sm:$0xf0]  ;;  %v4425_v6 = vld [vmem:[%s9039_s4 + $0x30] sm:$0xf0] }
 0x1da   :  { %9206 = vst [vmem:[#allocation28_spill] sm:$0xff] %v6476_v40  ;;  %1734 = vmatpush.bf16.msrb.mxu0 %v6476_v40  ;;  %v6494_v34 = vor.u32 %v5288_v38, %v4425_v6  ;;  %v5297_v40 = vld [vmem:[%s9039_s4 + $0x54] sm:$0xf] }
 0x1db   :  { %1648 = vmatpush.bf16.msra.mxu3 %v6468_v47  ;;  %v6524_v0 = vld [vmem:[%s9039_s4 + $0x5b0] sm:$0x11] }
 0x1dc   :  { %1707 = vmatpush.bf16.msra.mxu1 %v6458_v20  ;;  %v5307_v20 = vld [vmem:[%s9039_s4 + $0xa4] sm:$0xf]  ;;  %9207 = vst [vmem:[#allocation29_spill] sm:$0xff] %v6494_v34 }
 0x1dd   :  { %v6486_v9 = vor.u32 %v5307_v20, %v4497_v14  ;;  %v4457_v20 = vld [vmem:[%s9039_s4 + $0x78] sm:$0xf0] }
 0x1de   :  { %1735 = vmatpush.bf16.msrb.mxu0 %v6494_v34  ;;  %v6504_v16 = vor.u32 %v5297_v40, %v4457_v20  ;;  %v407_v34 = vpop.permute.xlu0 %406  ;;  %v4417_v40 = vld [vmem:[%s9039_s4 + $0x28] sm:$0xf0] }
 0x1df   :  { %1649 = vmatpush.bf16.msra.mxu3 %v6486_v9 }
 0x1e3   :  { %1650 = vmatpush.bf16.msra.mxu3 %v6504_v16 }
 0x216   :  { %v387_v14 = vpop.permute.xlu2 %386 }
 0x217   :  { %v394_v4 = vmul.f32 %v387_v14, %v5897_v42  ;;  %v395_v38 = vmul.f32 %v387_v14, %v5899_v43  ;;  %v396_v6 = vmul.f32 %v387_v14, %v5901_v44  ;;  %v397_v26 = vmul.f32 %v387_v14, %v5905_v46 }
 0x218   :  { %v398_v11 = vmul.f32 %v387_v14, %v5903_v45  ;;  %v6518_v43 = vor.u32 %v5287_v56, %v4417_v40 }
 0x219   :  { %v414_v42 = vadd.f32 %v407_v34, %v394_v4  ;;  %v415_v20 = vadd.f32 %v407_v34, %v395_v38  ;;  %v416_v44 = vadd.f32 %v407_v34, %v396_v6  ;;  %v417_v23 = vadd.f32 %v407_v34, %v397_v26 }
 0x21a   :  { %v418_v46 = vadd.f32 %v407_v34, %v398_v11  ;;  %1651 = vmatpush.bf16.msra.mxu3 %v6518_v43  ;;  %v1186_v6 = vunpack.c.h.b16 %v6133_v36 }
 0x21b   :  { %v424_v45 = vmax.f32 %v414_v42, 0.0  ;;  %v425_v14 = vmax.f32 %v415_v20, 0.0  ;;  %v426_v51 = vmax.f32 %v416_v44, 0.0  ;;  %v427_v10 = vmax.f32 %v417_v23, 0.0 }
 0x21c   :  { %v428_v56 = vmax.f32 %v418_v46, 0.0  ;;  %v1189_v42 = vunpack.c.l.b16 %v6524_v0  ;;  %v1376_v52 = vpack.c.b16 %v1186_v6, %v1186_v6 }
 0x21d   :  { %v434_v18 = vpack.c.bf16 %v425_v14, %v424_v45 }
 0x21e   :  { %v392_v31 = vpop.permute.xlu2 %391 }
 0x21f   :  { %v399_v4 = vmul.f32 %v392_v31, %v5917_v57  ;;  %v400_v38 = vmul.f32 %v392_v31, %v5919_v58  ;;  %v401_v26 = vmul.f32 %v392_v31, %v5921_v59  ;;  %v402_v11 = vmul.f32 %v392_v31, %v5926_v63 }
 0x220   :  { %v403_v34 = vmul.f32 %v392_v31, %v5924_v61  ;;  %v6533_v57 = vpack.c.bf16 %v427_v10, %v426_v51  ;;  %v436_v58 = vpack.c.bf16 %v428_v56, %v428_v56  ;;  %v5025_v10 = vld [vmem:[%s9039_s4 + $0x4e0] sm:$0xf0]  ;;  %v1379_v51 = vpack.c.b16 %v1189_v42, %v1189_v42 }
 0x221   :  { %v419_v40 = vadd.f32 %v412_v53, %v399_v4  ;;  %v420_v20 = vadd.f32 %v412_v53, %v400_v38  ;;  %v421_v21 = vadd.f32 %v412_v53, %v401_v26  ;;  %v422_v44 = vadd.f32 %v412_v53, %v402_v11  ;;  %v5438_v4 = vld [vmem:[%s9039_s4 + $0x4bc] sm:$0xf]  ;;  %v4711_v26 = vld [vmem:[%s9039_s4 + $0x240] sm:$0xf]  ;;  %v5364_v11 = vld [vmem:[%s9039_s4 + $0x264] sm:$0xf0] }
 0x222   :  { %v423_v23 = vadd.f32 %v412_v53, %v403_v34  ;;  %v629_v53 = vunpack.c.l.b16 %v434_v18  ;;  %v630_v45 = vunpack.c.h.b16 %v434_v18  ;;  %v2173_v14 = vunpack.c.l.b16 %v436_v58 }
 0x223   :  { %v429_v46 = vmax.f32 %v419_v40, 0.0  ;;  %v430_v60 = vmax.f32 %v420_v20, 0.0  ;;  %v431_v59 = vmax.f32 %v421_v21, 0.0  ;;  %v432_v19 = vmax.f32 %v422_v44, 0.0  ;;  %v5428_v44 = vld [vmem:[%s9039_s4 + $0x46c] sm:$0xf] }
 0x224   :  { %v433_v63 = vmax.f32 %v423_v23, 0.0  ;;  %v631_v21 = vunpack.c.l.b16 %v6533_v57  ;;  %v6551_v34 = vor.u32 %v5438_v4, %v5025_v10  ;;  %v6559_v20 = vor.u32 %v5364_v11, %v4711_v26  ;;  %v4985_v23 = vld [vmem:[%s9039_s4 + $0x490] sm:$0xf0]  ;;  %v5097_v10 = vld [vmem:[%s9039_s4 + $0x578] sm:$0xf0] }
 0x225   :  { %v437_v61 = vpack.c.bf16 %v430_v60, %v429_v46  ;;  %v6535_v31 = vpack.c.bf16 %v432_v19, %v431_v59  ;;  %v4671_v46 = vld [vmem:[%s9039_s4 + $0x1f0] sm:$0xf]  ;;  %v6571_v58 = vand.u32 %v6147_v50, %v1379_v51  ;;  %v5354_v59 = vld [vmem:[%s9039_s4 + $0x214] sm:$0xf0]  ;;  %v5457_v4 = vld [vmem:[%s9039_s4 + $0x554] sm:$0xf]  ;;  %v6598_v51 = vor.u32 %v5428_v44, %v4985_v23 }
 0x226   :  { %v439_v36 = vpack.c.bf16 %v433_v63, %v433_v63  ;;  %9208 = vst [vmem:[#allocation30_spill] sm:$0xff] %v6559_v20  ;;  %v5111_v63 = vld [vmem:[%s9039_s4 + $0x560] sm:$0xf]  ;;  %v5447_v26 = vld [vmem:[%s9039_s4 + $0x504] sm:$0xf] }
 0x227   :  { %v632_v56 = vunpack.c.l.b16 %v437_v61  ;;  %v633_v38 = vunpack.c.h.b16 %v437_v61  ;;  %v634_v60 = vunpack.c.l.b16 %v6535_v31  ;;  %9209 = vst [vmem:[#allocation31_spill] sm:$0xff] %v6571_v58  ;;  %v5464_v61 = vld [vmem:[%s9039_s4 + $0x584] sm:$0xf0]  ;;  %v5057_v11 = vld [vmem:[%s9039_s4 + $0x528] sm:$0xf0] }
 0x228   :  { %v2175_v19 = vunpack.c.l.b16 %v439_v36  ;;  %v6585_v36 = vand.u32 %v6147_v50, %v1376_v52  ;;  %v6601_v52 = vor.u32 %v5354_v59, %v4671_v46  ;;  %v5408_v46 = vld [vmem:[%s9039_s4 + $0x3cc] sm:$0xf]  ;;  %v4905_v59 = vld [vmem:[%s9039_s4 + $0x3f0] sm:$0xf0] }
 0x229   :  { %v6553_v18 = vpack.c.b16 %v632_v56, %v629_v53  ;;  %v6555_v6 = vpack.c.b16 %v633_v38, %v630_v45  ;;  %v6557_v40 = vpack.c.b16 %v634_v60, %v631_v21  ;;  %v5418_v53 = vld [vmem:[%s9039_s4 + $0x41c] sm:$0xf]  ;;  %v4945_v45 = vld [vmem:[%s9039_s4 + $0x440] sm:$0xf0]  ;;  %v4631_v21 = vld [vmem:[%s9039_s4 + $0x1a0] sm:$0xf] }
 0x22a   :  { %v2177_v42 = vpack.c.b16 %v2175_v19, %v2173_v14  ;;  %9210 = vst [vmem:[#allocation32_spill] sm:$0xff] %v6585_v36  ;;  %v6613_v14 = vor.u32 %v5464_v61, %v5111_v63  ;;  %v5344_v56 = vld [vmem:[%s9039_s4 + $0x1c4] sm:$0xf0]  ;;  %v5071_v38 = vld [vmem:[%s9039_s4 + $0x510] sm:$0xf]  ;;  %v6625_v19 = vor.u32 %v5457_v4, %v5097_v10  ;;  %v6639_v44 = vor.u32 %v5418_v53, %v4945_v45 }
 0x22b   :  { %1610 = vmatmul.bf16.vlgmr.msrb.gmra.mxu1 %v6553_v18  ;;  %1624 = vmatmul.bf16.vlgmr.msrb.gmra.mxu2 %v6555_v6  ;;  %9211 = vst [vmem:[#allocation33_spill] sm:$0xff] %v6601_v52  ;;  %v5454_v60 = vld [vmem:[%s9039_s4 + $0x534] sm:$0xf0]  ;;  %v6642_v23 = vor.u32 %v5344_v56, %v4631_v21  ;;  %v4591_v61 = vld [vmem:[%s9039_s4 + $0x150] sm:$0xf]  ;;  %v6662_v10 = vor.u32 %v5447_v26, %v5057_v11  ;;  %v2174_v21 = vunpack.c.h.b16 %v6535_v31  ;;  %v2172_v31 = vunpack.c.h.b16 %v6533_v57 }
 0x22c   :  { %2182 = vrot.lane.b32.xlu2 %v2177_v42, %s5617_s20  ;;  %5133 = vmatmul.msk.bf16.vlgmr.msrb.gmra.mxu3 %vm1565_vm11, %v6557_v40  ;;  %9212 = vst [vmem:[#allocation34_spill] sm:$0xff] %v6613_v14  ;;  %v6636_v42 = vld [vmem:[%s9039_s4 + $0x5a8] sm:$0x11]  ;;  %v6651_v63 = vor.u32 %v5454_v60, %v5071_v38  ;;  %v5334_v4 = vld [vmem:[%s9039_s4 + $0x174] sm:$0xf0]  ;;  %v6666_v45 = vor.u32 %v5408_v46, %v4905_v59 }
 0x22d   :  { %1666 = vmatmul.bf16.vlgmr.msra.gmra.mxu0 %v6555_v6  ;;  %1742 = vmatpush.bf16.msrb.mxu2 %v6551_v34  ;;  %9213 = vst [vmem:[#allocation35_spill] sm:$0xff] %v6625_v19  ;;  %v1187_v53 = vunpack.c.l.b16 %v6636_v42  ;;  %v6670_v56 = vor.u32 %v5334_v4, %v4591_v61  ;;  %v5398_v38 = vld [vmem:[%s9039_s4 + $0x37c] sm:$0xf]  ;;  %v4865_v60 = vld [vmem:[%s9039_s4 + $0x3a0] sm:$0xf0]  ;;  %v2176_v4 = vpack.c.b16 %v2174_v21, %v2172_v31 }
 0x22e   :  { %1770 = vmatpush.bf16.msrb.mxu1 %v6559_v20  ;;  %1803 = vmatpush.bf16.msra.mxu0 %v6571_v58  ;;  %9214 = vst [vmem:[#allocation36_spill] sm:$0xff] %v6642_v23  ;;  %v4551_v26 = vld [vmem:[%s9039_s4 + $0x100] sm:$0xf]  ;;  %v5324_v11 = vld [vmem:[%s9039_s4 + $0x124] sm:$0xf0] }
 0x22f   :  { %1677 = vmatpush.bf16.msrb.mxu3 %v6585_v36  ;;  %9215 = vst [vmem:[#allocation37_spill] sm:$0xff] %v6651_v63  ;;  %v5439_v46 = vld [vmem:[%s9039_s4 + $0x4c4] sm:$0xf]  ;;  %v5033_v59 = vld [vmem:[%s9039_s4 + $0x4e8] sm:$0xf0]  ;;  %v1377_v61 = vpack.c.b16 %v1187_v53, %v1187_v53  ;;  %v6697_v57 = vor.u32 %v5324_v11, %v4551_v26 }
 0x230   :  { %9216 = vst [vmem:[#allocation38_spill] sm:$0xff] %v6662_v10  ;;  %v5388_v20 = vld [vmem:[%s9039_s4 + $0x32c] sm:$0xf]  ;;  %v4511_v53 = vld [vmem:[%s9039_s4 + $0xb0] sm:$0xf] }
 0x231   :  { %1743 = vmatpush.bf16.msrb.mxu2 %v6598_v51  ;;  %9217 = vst [vmem:[#allocation39_spill] sm:$0xff] %v6670_v56  ;;  %v5314_v21 = vld [vmem:[%s9039_s4 + $0xd4] sm:$0xf0]  ;;  %v6722_v26 = vand.u32 %v6147_v50, %v1377_v61  ;;  %v5463_v11 = vld [vmem:[%s9039_s4 + $0x57c] sm:$0xf0] }
 0x232   :  { %1771 = vmatpush.bf16.msrb.mxu1 %v6601_v52  ;;  %1804 = vmatpush.bf16.msra.mxu0 %v6613_v14  ;;  %9219 = vst [vmem:[#allocation41_spill] sm:$0xff] %v6697_v57  ;;  %v6699_v52 = vor.u32 %v5439_v46, %v5033_v59  ;;  %v5103_v31 = vld [vmem:[%s9039_s4 + $0x558] sm:$0xf]  ;;  %v6738_v59 = vor.u32 %v5314_v21, %v4511_v53  ;;  %v5419_v53 = vld [vmem:[%s9039_s4 + $0x424] sm:$0xf] }
 0x233   :  { %1678 = vmatpush.bf16.msrb.mxu3 %v6625_v19  ;;  %v4953_v21 = vld [vmem:[%s9039_s4 + $0x448] sm:$0xf0]  ;;  %v4745_v58 = vld [vmem:[%s9039_s4 + $0x2b0] sm:$0xf0] }
 0x234   :  { %2178 = vrot.lane.b32.xlu2 %v6557_v40, %s5617_s20  ;;  %9220 = vst [vmem:[#allocation42_spill] sm:$0xff] %v6699_v52 }
 0x235   :  { %1744 = vmatpush.bf16.msrb.mxu2 %v6639_v44  ;;  %9222 = vst [vmem:[#allocation44_spill] sm:$0xff] %v6738_v59 }
 0x236   :  { %1772 = vmatpush.bf16.msrb.mxu1 %v6642_v23  ;;  %1805 = vmatpush.bf16.msra.mxu0 %v6651_v63  ;;  %v6694_v23 = vor.u32 %v5398_v38, %v4865_v60  ;;  %v4825_v63 = vld [vmem:[%s9039_s4 + $0x350] sm:$0xf0]  ;;  %v4993_v60 = vld [vmem:[%s9039_s4 + $0x498] sm:$0xf0] }
 0x237   :  { %1679 = vmatpush.bf16.msrb.mxu3 %v6662_v10  ;;  %v5429_v38 = vld [vmem:[%s9039_s4 + $0x474] sm:$0xf]  ;;  %v6734_v46 = vor.u32 %v5388_v20, %v4825_v63  ;;  %v4471_v20 = vld [vmem:[%s9039_s4 + $0x60] sm:$0xf]  ;;  %v5304_v63 = vld [vmem:[%s9039_s4 + $0x84] sm:$0xf0] }
 0x238   :  { %9218 = vst [vmem:[#allocation40_spill] sm:$0xff] %v6694_v23  ;;  %v6740_v61 = vor.u32 %v5429_v38, %v4993_v60  ;;  %v1190_v38 = vunpack.c.h.b16 %v6524_v0  ;;  %v6762_v60 = vor.u32 %v5463_v11, %v5103_v31  ;;  %v6775_v0 = vor.u32 %v5304_v63, %v4471_v20  ;;  %v5368_v11 = vld [vmem:[%s9039_s4 + $0x28c] sm:$0xf]  ;;  %v5294_v20 = vld [vmem:[%s9039_s4 + $0x34] sm:$0xf0] }
 0x239   :  { %1745 = vmatpush.bf16.msrb.mxu2 %v6666_v45  ;;  %9221 = vst [vmem:[#allocation43_spill] sm:$0xff] %v6734_v46  ;;  %v6777_v31 = vor.u32 %v5419_v53, %v4953_v21  ;;  %v5409_v63 = vld [vmem:[%s9039_s4 + $0x3d4] sm:$0xf]  ;;  %v4913_v53 = vld [vmem:[%s9039_s4 + $0x3f8] sm:$0xf0]  ;;  %v6808_v10 = vor.u32 %v5368_v11, %v4745_v58 }
 0x23a   :  { %1773 = vmatpush.bf16.msrb.mxu1 %v6670_v56  ;;  %9223 = vst [vmem:[#allocation45_spill] sm:$0xff] %v6740_v61  ;;  %v4785_v56 = vld [vmem:[%s9039_s4 + $0x300] sm:$0xf0]  ;;  %v1380_v21 = vpack.c.b16 %v1190_v38, %v1190_v38  ;;  %v4873_v58 = vld [vmem:[%s9039_s4 + $0x3a8] sm:$0xf0] }
 0x23b   :  { %1708 = vmatmul.bf16.vlgmr.msra.gmra.mxu1 %v6555_v6  ;;  %1694 = vmatmul.bf16.vlgmr.msra.gmra.mxu2 %v6553_v18  ;;  %9225 = vst [vmem:[#allocation47_spill] sm:$0xff] %v6775_v0  ;;  %v5349_v11 = vld [vmem:[%s9039_s4 + $0x1f4] sm:$0xf] }
 0x23c   :  { %2180 = vrot.lane.b32.xlu2 %v2176_v4, %s5617_s20  ;;  %1652 = vmatmul.bf16.vlgmr.msra.gmra.mxu3 %v6553_v18  ;;  %v5378_v4 = vld [vmem:[%s9039_s4 + $0x2dc] sm:$0xf]  ;;  %9226 = vst [vmem:[#allocation48_spill] sm:$0xff] %v6777_v31  ;;  %v6819_v36 = vand.u32 %v6147_v50, %v1380_v21  ;;  %s5619_s20 = smov 60  }
 0x23d   :  { %1736 = vmatmul.bf16.vlgmr.msrb.gmra.mxu0 %v6553_v18  ;;  %1746 = vmatpush.bf16.msrb.mxu2 %v6694_v23  ;;  %v6771_v14 = vor.u32 %v5378_v4, %v4785_v56  ;;  %v4431_v56 = vld [vmem:[%s9039_s4 + $0x10] sm:$0xf]  ;;  %v1188_v4 = vunpack.c.h.b16 %v6636_v42  ;;  %v5359_v42 = vld [vmem:[%s9039_s4 + $0x244] sm:$0xf]  ;;  %9227 = vst [vmem:[#allocation49_spill] sm:$0xff] %v6808_v10 }
 0x23e   :  { %1774 = vmatpush.bf16.msrb.mxu1 %v6697_v57  ;;  %1826 = vmatpush.bf16.msrb.mxu0 %v6699_v52  ;;  %v5063_v57 = vld [vmem:[%s9039_s4 + $0x508] sm:$0xf]  ;;  %v5453_v52 = vld [vmem:[%s9039_s4 + $0x52c] sm:$0xf0]  ;;  %v6812_v38 = vor.u32 %v5294_v20, %v4431_v56  ;;  %9231 = vst [vmem:[#allocation53_spill] sm:$0xff] %v6819_v36 }
 0x23f   :  { %1719 = vmatpush.bf16.msra.mxu3 %v6722_v26  ;;  %9224 = vst [vmem:[#allocation46_spill] sm:$0xff] %v6771_v14  ;;  %v5459_v56 = vld [vmem:[%s9039_s4 + $0x564] sm:$0xf] }
 0x240   :  { %9228 = vst [vmem:[#allocation50_spill] sm:$0xff] %v6812_v38 }
 0x241   :  { %1747 = vmatpush.bf16.msrb.mxu2 %v6734_v46 }
 0x242   :  { %1775 = vmatpush.bf16.msrb.mxu1 %v6738_v59  ;;  %1827 = vmatpush.bf16.msrb.mxu0 %v6740_v61  ;;  %v6799_v59 = vor.u32 %v5453_v52, %v5063_v57  ;;  %v4713_v61 = vld [vmem:[%s9039_s4 + $0x268] sm:$0xf0]  ;;  %v6814_v52 = vor.u32 %v5409_v63, %v4913_v53  ;;  %v1378_v57 = vpack.c.b16 %v1188_v4, %v1188_v4  ;;  %v5389_v63 = vld [vmem:[%s9039_s4 + $0x334] sm:$0xf]  ;;  %v4833_v53 = vld [vmem:[%s9039_s4 + $0x358] sm:$0xf0] }
 0x243   :  { %1720 = vmatpush.bf16.msra.mxu3 %v6762_v60  ;;  %v6816_v19 = vor.u32 %v5359_v42, %v4713_v61  ;;  %v4673_v61 = vld [vmem:[%s9039_s4 + $0x218] sm:$0xf0]  ;;  %v5113_v4 = vld [vmem:[%s9039_s4 + $0x588] sm:$0xf0] }
 0x244   :  { %9229 = vst [vmem:[#allocation51_spill] sm:$0xff] %v6814_v52  ;;  %v6852_v21 = vand.u32 %v6147_v50, %v1378_v57  ;;  %v6856_v42 = vor.u32 %v5349_v11, %v4673_v61  ;;  %v5105_v57 = vld [vmem:[%s9039_s4 + $0x580] sm:$0xf0]  ;;  %v4633_v11 = vld [vmem:[%s9039_s4 + $0x1c8] sm:$0xf0] }
 0x245   :  { %1748 = vmatpush.bf16.msrb.mxu2 %v6771_v14  ;;  %9230 = vst [vmem:[#allocation52_spill] sm:$0xff] %v6816_v19  ;;  %v5399_v14 = vld [vmem:[%s9039_s4 + $0x384] sm:$0xf]  ;;  %v5449_v61 = vld [vmem:[%s9039_s4 + $0x514] sm:$0xf] }
 0x246   :  { %1776 = vmatpush.bf16.msrb.mxu1 %v6775_v0  ;;  %1828 = vmatpush.bf16.msrb.mxu0 %v6777_v31  ;;  %v6843_v20 = vor.u32 %v5399_v14, %v4873_v58  ;;  %9233 = vst [vmem:[#allocation55_spill] sm:$0xff] %v6852_v21  ;;  %v5339_v14 = vld [vmem:[%s9039_s4 + $0x1a4] sm:$0xf]  ;;  %v5458_v58 = vld [vmem:[%s9039_s4 + $0x55c] sm:$0xf]  ;;  %v6891_v0 = vor.u32 %v5389_v63, %v4833_v53 }
 0x247   :  { %1721 = vmatpush.bf16.msra.mxu3 %v6799_v59  ;;  %9234 = vst [vmem:[#allocation56_spill] sm:$0xff] %v6856_v42  ;;  %v6897_v31 = vor.u32 %v5458_v58, %v5105_v57  ;;  %v4793_v63 = vld [vmem:[%s9039_s4 + $0x308] sm:$0xf0]  ;;  %v5065_v58 = vld [vmem:[%s9039_s4 + $0x530] sm:$0xf0] }
 0x248   :  { %9232 = vst [vmem:[#allocation54_spill] sm:$0xff] %v6843_v20  ;;  %v5448_v53 = vld [vmem:[%s9039_s4 + $0x50c] sm:$0xf] }
 0x249   :  { %1749 = vmatpush.bf16.msrb.mxu2 %v6808_v10  ;;  %9236 = vst [vmem:[#allocation58_spill] sm:$0xff] %v6891_v0 }
 0x24a   :  { %1777 = vmatpush.bf16.msrb.mxu1 %v6812_v38  ;;  %1829 = vmatpush.bf16.msrb.mxu0 %v6814_v52  ;;  %v6858_v38 = vor.u32 %v5459_v56, %v5113_v4  ;;  %v5073_v56 = vld [vmem:[%s9039_s4 + $0x538] sm:$0xf0]  ;;  %v5039_v4 = vld [vmem:[%s9039_s4 + $0x4c8] sm:$0xf]  ;;  %v5379_v52 = vld [vmem:[%s9039_s4 + $0x2e4] sm:$0xf] }
 0x24b   :  { %9237 = vst [vmem:[#allocation59_spill] sm:$0xff] %v6897_v31  ;;  %v6903_v10 = vor.u32 %v5449_v61, %v5073_v56  ;;  %v4999_v61 = vld [vmem:[%s9039_s4 + $0x478] sm:$0xf]  ;;  %v5435_v56 = vld [vmem:[%s9039_s4 + $0x49c] sm:$0xf0] }
 0x24c   :  { %9235 = vst [vmem:[#allocation57_spill] sm:$0xff] %v6858_v38  ;;  %5134 = vmatmul.msk.bf16.vlgmr.msrb.gmra.mxu3 %vm1565_vm11, %v6557_v40  ;;  %1750 = vmatmul.bf16.vlgmr.msrb.gmra.mxu2 %v6555_v6 }
 0x24d   :  { %1812 = vmatpush.bf16.msra.mxu2 %v6816_v19  ;;  %1778 = vmatmul.bf16.vlgmr.msrb.gmra.mxu1 %v6553_v18  ;;  %v6901_v19 = vor.u32 %v5339_v14, %v4633_v11  ;;  %9239 = vst [vmem:[#allocation61_spill] sm:$0xff] %v6903_v10  ;;  %v5329_v14 = vld [vmem:[%s9039_s4 + $0x154] sm:$0xf]  ;;  %v4593_v11 = vld [vmem:[%s9039_s4 + $0x178] sm:$0xf0] }
 0x24e   :  { %1845 = vmatpush.bf16.msra.mxu1 %v6819_v36  ;;  %5137 = vmatmul.msk.bf16.vlgmr.msra.gmra.mxu0 %vm1565_vm11, %v6557_v40  ;;  %v5445_v36 = vld [vmem:[%s9039_s4 + $0x4ec] sm:$0xf0] }
 0x24f   :  { %1830 = vmatpush.bf16.msrb.mxu0 %v6843_v20  ;;  %1761 = vmatpush.bf16.msrb.mxu3 %v6852_v21  ;;  %9238 = vst [vmem:[#allocation60_spill] sm:$0xff] %v6901_v19  ;;  %v6914_v57 = vor.u32 %v5445_v36, %v5039_v4  ;;  %v6929_v36 = vor.u32 %v5379_v52, %v4793_v63  ;;  %v5369_v20 = vld [vmem:[%s9039_s4 + $0x294] sm:$0xf]  ;;  %v5319_v52 = vld [vmem:[%s9039_s4 + $0x104] sm:$0xf] }
 0x250   :  { %v6932_v4 = vor.u32 %v5448_v53, %v5065_v58  ;;  %v6948_v63 = vor.u32 %v5435_v56, %v4999_v61  ;;  %v4553_v53 = vld [vmem:[%s9039_s4 + $0x128] sm:$0xf0]  ;;  %v5425_v61 = vld [vmem:[%s9039_s4 + $0x44c] sm:$0xf0] }
 0x251   :  { %1813 = vmatpush.bf16.msra.mxu2 %v6856_v42  ;;  %9240 = vst [vmem:[#allocation62_spill] sm:$0xff] %v6914_v57  ;;  %v5360_v58 = vld [vmem:[%s9039_s4 + $0x24c] sm:$0xf] }
 0x252   :  { %1846 = vmatpush.bf16.msra.mxu1 %v6858_v38  ;;  %9241 = vst [vmem:[#allocation63_spill] sm:$0xff] %v6929_v36  ;;  %v6936_v38 = vor.u32 %v5329_v14, %v4593_v11  ;;  %v4721_v14 = vld [vmem:[%s9039_s4 + $0x270] sm:$0xf0]  ;;  %v4959_v11 = vld [vmem:[%s9039_s4 + $0x428] sm:$0xf] }
 0x253   :  { %1831 = vmatpush.bf16.msrb.mxu0 %v6891_v0  ;;  %1762 = vmatpush.bf16.msrb.mxu3 %v6897_v31  ;;  %9242 = vst [vmem:[#allocation64_spill] sm:$0xff] %v6932_v4  ;;  %v4753_v0 = vld [vmem:[%s9039_s4 + $0x2b8] sm:$0xf0]  ;;  %v6978_v42 = vor.u32 %v5360_v58, %v4721_v14  ;;  %v4919_v58 = vld [vmem:[%s9039_s4 + $0x3d8] sm:$0xf] }
 0x254   :  { %9243 = vst [vmem:[#allocation65_spill] sm:$0xff] %v6936_v38  ;;  %v6966_v56 = vor.u32 %v5369_v20, %v4753_v0  ;;  %v5309_v0 = vld [vmem:[%s9039_s4 + $0xb4] sm:$0xf]  ;;  %v6984_v20 = vor.u32 %v5425_v61, %v4959_v11  ;;  %v5415_v14 = vld [vmem:[%s9039_s4 + $0x3fc] sm:$0xf0] }
 0x255   :  { %1814 = vmatpush.bf16.msra.mxu2 %v6901_v19  ;;  %9244 = vst [vmem:[#allocation66_spill] sm:$0xff] %v6948_v63  ;;  %v6976_v19 = vor.u32 %v5319_v52, %v4553_v53  ;;  %v4681_v52 = vld [vmem:[%s9039_s4 + $0x220] sm:$0xf0]  ;;  %v7006_v11 = vld [vmem:[%s9039_s4 + $0x5b8] sm:$0x11] }
 0x256   :  { %1847 = vmatpush.bf16.msra.mxu1 %v6903_v10  ;;  %9245 = vst [vmem:[#allocation67_spill] sm:$0xff] %v6966_v56  ;;  %v5444_v10 = vld [vmem:[%s9039_s4 + $0x4e4] sm:$0xf0]  ;;  %v4433_v31 = vld [vmem:[%s9039_s4 + $0x38] sm:$0xf0] }
 0x257   :  { %1832 = vmatpush.bf16.msrb.mxu0 %v6929_v36  ;;  %1763 = vmatpush.bf16.msrb.mxu3 %v6932_v4  ;;  %9246 = vst [vmem:[#allocation68_spill] sm:$0xff] %v6976_v19  ;;  %v4513_v36 = vld [vmem:[%s9039_s4 + $0xd8] sm:$0xf0]  ;;  %v7027_v4 = vor.u32 %v5415_v14, %v4919_v58  ;;  %v4879_v58 = vld [vmem:[%s9039_s4 + $0x388] sm:$0xf] }
 0x258   :  { %9247 = vst [vmem:[#allocation69_spill] sm:$0xff] %v6978_v42  ;;  %v7017_v61 = vor.u32 %v5309_v0, %v4513_v36  ;;  %v4641_v36 = vld [vmem:[%s9039_s4 + $0x1d0] sm:$0xf0]  ;;  %v1191_v0 = vunpack.c.l.b16 %v7006_v11  ;;  %v5405_v14 = vld [vmem:[%s9039_s4 + $0x3ac] sm:$0xf0] }
 0x259   :  { %1815 = vmatpush.bf16.msra.mxu2 %v6936_v38  ;;  %9248 = vst [vmem:[#allocation70_spill] sm:$0xff] %v6984_v20  ;;  %v5350_v38 = vld [vmem:[%s9039_s4 + $0x1fc] sm:$0xf]  ;;  %v7067_v46 = vor.u32 %v5405_v14, %v4879_v58  ;;  %v5395_v58 = vld [vmem:[%s9039_s4 + $0x35c] sm:$0xf0] }
 0x25a   :  { %1868 = vmatpush.bf16.msrb.mxu1 %v6914_v57  ;;  %v5031_v57 = vld [vmem:[%s9039_s4 + $0x4c0] sm:$0xf]  ;;  %9250 = vst [vmem:[#allocation72_spill] sm:$0xff] %v7017_v61  ;;  %v4911_v14 = vld [vmem:[%s9039_s4 + $0x3d0] sm:$0xf] }
 0x25b   :  { %v6995_v53 = vor.u32 %v5444_v10, %v5031_v57  ;;  %1833 = vmatpush.bf16.msrb.mxu0 %v6966_v56  ;;  %v4991_v10 = vld [vmem:[%s9039_s4 + $0x470] sm:$0xf]  ;;  %v5434_v57 = vld [vmem:[%s9039_s4 + $0x494] sm:$0xf0]  ;;  %v5299_v56 = vld [vmem:[%s9039_s4 + $0x64] sm:$0xf] }
 0x25c   :  { %5135 = vmatmul.msk.bf16.vlgmr.msra.gmra.mxu3 %vm1565_vm11, %v6557_v40  ;;  %9252 = vst [vmem:[#allocation74_spill] sm:$0xff] %v7027_v4 }
 0x25d   :  { %9249 = vst [vmem:[#allocation71_spill] sm:$0xff] %v6995_v53  ;;  %1816 = vmatpush.bf16.msra.mxu2 %v6976_v19  ;;  %v4473_v19 = vld [vmem:[%s9039_s4 + $0x88] sm:$0xf0]  ;;  %1784 = vmatpush.bf16.msra.mxu3 %v6995_v53  ;;  %v5289_v53 = vld [vmem:[%s9039_s4 + $0x14] sm:$0xf] }
 0x25e   :  { %1869 = vmatpush.bf16.msrb.mxu1 %v6948_v63  ;;  %v7019_v63 = vor.u32 %v5350_v38, %v4681_v52  ;;  %v5340_v38 = vld [vmem:[%s9039_s4 + $0x1ac] sm:$0xf]  ;;  %1834 = vmatmul.bf16.vlgmr.msrb.gmra.mxu0 %v6555_v6  ;;  %v7041_v52 = vor.u32 %v5434_v57, %v4991_v10  ;;  %v5424_v10 = vld [vmem:[%s9039_s4 + $0x444] sm:$0xf0]  ;;  %v7059_v57 = vor.u32 %v5299_v56, %v4473_v19  ;;  %v4601_v19 = vld [vmem:[%s9039_s4 + $0x180] sm:$0xf0] }
 0x25f   :  { %1896 = vmatpush.bf16.msra.mxu0 %v6978_v42  ;;  %5138 = vmatmul.msk.bf16.vlgmr.msra.gmra.mxu1 %vm1565_vm11, %v6557_v40  ;;  %v7061_v42 = vor.u32 %v5340_v38, %v4641_v36  ;;  %9256 = vst [vmem:[#allocation78_spill] sm:$0xff] %v7067_v46  ;;  %v1381_v56 = vpack.c.b16 %v1191_v0, %v1191_v0  ;;  %v4839_v36 = vld [vmem:[%s9039_s4 + $0x338] sm:$0xf] }
 0x260   :  { %9251 = vst [vmem:[#allocation73_spill] sm:$0xff] %v7019_v63  ;;  %v5414_v0 = vld [vmem:[%s9039_s4 + $0x3f4] sm:$0xf0] }
 0x261   :  { %9253 = vst [vmem:[#allocation75_spill] sm:$0xff] %v7041_v52  ;;  %1817 = vmatpush.bf16.msra.mxu2 %v7017_v61  ;;  %1785 = vmatpush.bf16.msra.mxu3 %v7041_v52  ;;  %v7103_v61 = vand.u32 %v6147_v50, %v1381_v56  ;;  %v5320_v52 = vld [vmem:[%s9039_s4 + $0x10c] sm:$0xf]  ;;  %v5465_v56 = vld [vmem:[%s9039_s4 + $0x58c] sm:$0xf0] }
 0x262   :  { %1870 = vmatpush.bf16.msrb.mxu1 %v6984_v20  ;;  %v4951_v20 = vld [vmem:[%s9039_s4 + $0x420] sm:$0xf]  ;;  %9254 = vst [vmem:[#allocation76_spill] sm:$0xff] %v7059_v57 }
 0x263   :  { %1897 = vmatpush.bf16.msra.mxu0 %v7019_v63  ;;  %9255 = vst [vmem:[#allocation77_spill] sm:$0xff] %v7061_v42  ;;  %v5330_v63 = vld [vmem:[%s9039_s4 + $0x15c] sm:$0xf]  ;;  %v7079_v38 = vor.u32 %v5424_v10, %v4951_v20  ;;  %v7095_v20 = vor.u32 %v5289_v53, %v4433_v31  ;;  %v4799_v31 = vld [vmem:[%s9039_s4 + $0x2e8] sm:$0xf] }
 0x264   :  { %v7097_v10 = vor.u32 %v5330_v63, %v4601_v19  ;;  %9261 = vst [vmem:[#allocation83_spill] sm:$0xff] %v7103_v61  ;;  %v7115_v63 = vor.u32 %v5414_v0, %v4911_v14  ;;  %v5385_v53 = vld [vmem:[%s9039_s4 + $0x30c] sm:$0xf0]  ;;  %v5119_v19 = vld [vmem:[%s9039_s4 + $0x568] sm:$0xf] }
 0x265   :  { %9257 = vst [vmem:[#allocation79_spill] sm:$0xff] %v7079_v38  ;;  %1818 = vmatpush.bf16.msra.mxu2 %v7059_v57  ;;  %v4561_v57 = vld [vmem:[%s9039_s4 + $0x130] sm:$0xf0]  ;;  %1786 = vmatpush.bf16.msra.mxu3 %v7079_v38  ;;  %v5404_v14 = vld [vmem:[%s9039_s4 + $0x3a4] sm:$0xf0] }
 0x266   :  { %1871 = vmatpush.bf16.msrb.mxu1 %v7027_v4  ;;  %9258 = vst [vmem:[#allocation80_spill] sm:$0xff] %v7095_v20  ;;  %v7100_v4 = vor.u32 %v5395_v58, %v4839_v36  ;;  %v4871_v36 = vld [vmem:[%s9039_s4 + $0x380] sm:$0xf]  ;;  %v7131_v58 = vor.u32 %v5320_v52, %v4561_v57  ;;  %v5310_v0 = vld [vmem:[%s9039_s4 + $0xbc] sm:$0xf]  ;;  %v7146_v52 = vor.u32 %v5465_v56, %v5119_v19 }
 0x267   :  { %1898 = vmatpush.bf16.msra.mxu0 %v7061_v42  ;;  %9259 = vst [vmem:[#allocation81_spill] sm:$0xff] %v7097_v10  ;;  %v7144_v42 = vor.u32 %v5385_v53, %v4799_v31  ;;  %v4759_v57 = vld [vmem:[%s9039_s4 + $0x298] sm:$0xf]  ;;  %v5455_v31 = vld [vmem:[%s9039_s4 + $0x53c] sm:$0xf0]  ;;  %v7170_v56 = vor.u32 %v5404_v14, %v4871_v36 }
 0x268   :  { %9260 = vst [vmem:[#allocation82_spill] sm:$0xff] %v7100_v4  ;;  %v5440_v53 = vld [vmem:[%s9039_s4 + $0x4cc] sm:$0xf]  ;;  %v7167_v19 = vld [vmem:[%s9039_s4 + $0x5c0] sm:$0x11] }
 0x269   :  { %9262 = vst [vmem:[#allocation84_spill] sm:$0xff] %v7115_v63  ;;  %1819 = vmatpush.bf16.msra.mxu2 %v7095_v20  ;;  %v5079_v20 = vld [vmem:[%s9039_s4 + $0x518] sm:$0xf]  ;;  %1787 = vmatpush.bf16.msra.mxu3 %v7115_v63  ;;  %v4831_v36 = vld [vmem:[%s9039_s4 + $0x330] sm:$0xf] }
 0x26a   :  { %1872 = vmatpush.bf16.msrb.mxu1 %v7067_v46  ;;  %9263 = vst [vmem:[#allocation85_spill] sm:$0xff] %v7131_v58  ;;  %v4521_v46 = vld [vmem:[%s9039_s4 + $0xe0] sm:$0xf0]  ;;  %v5366_v63 = vld [vmem:[%s9039_s4 + $0x274] sm:$0xf0]  ;;  %v7194_v21 = vor.u32 %v5455_v31, %v5079_v20 }
 0x26b   :  { %1899 = vmatpush.bf16.msra.mxu0 %v7097_v10  ;;  %9264 = vst [vmem:[#allocation86_spill] sm:$0xff] %v7144_v42  ;;  %v5375_v10 = vld [vmem:[%s9039_s4 + $0x2bc] sm:$0xf0]  ;;  %v7182_v38 = vor.u32 %v5310_v0, %v4521_v46  ;;  %v5394_v14 = vld [vmem:[%s9039_s4 + $0x354] sm:$0xf0] }
 0x26c   :  { %9265 = vst [vmem:[#allocation87_spill] sm:$0xff] %v7146_v52  ;;  %1820 = vmatmul.bf16.vlgmr.msra.gmra.mxu2 %v6553_v18  ;;  %v7192_v23 = vor.u32 %v5375_v10, %v4759_v57  ;;  %v5300_v46 = vld [vmem:[%s9039_s4 + $0x6c] sm:$0xf]  ;;  %v4481_v0 = vld [vmem:[%s9039_s4 + $0x90] sm:$0xf0]  ;;  %5136 = vmatmul.msk.bf16.vlgmr.msrb.gmra.mxu3 %vm1565_vm11, %v6557_v40  ;;  %v7213_v10 = vor.u32 %v5394_v14, %v4831_v36 }
 0x26d   :  { %1887 = vmatpush.bf16.msrb.mxu2 %v7103_v61  ;;  %9266 = vst [vmem:[#allocation88_spill] sm:$0xff] %v7170_v56  ;;  %v4727_v61 = vld [vmem:[%s9039_s4 + $0x250] sm:$0xf]  ;;  %v5430_v20 = vld [vmem:[%s9039_s4 + $0x47c] sm:$0xf]  ;;  %1788 = vmatpush.bf16.msra.mxu3 %v7170_v56 }
 0x26e   :  { %1873 = vmatpush.bf16.msrb.mxu1 %v7100_v4  ;;  %v5041_v4 = vld [vmem:[%s9039_s4 + $0x4f0] sm:$0xf0]  ;;  %9267 = vst [vmem:[#allocation89_spill] sm:$0xff] %v7182_v38  ;;  %v5001_v57 = vld [vmem:[%s9039_s4 + $0x4a0] sm:$0xf0] }
 0x26f   :  { %1900 = vmatpush.bf16.msra.mxu0 %v7131_v58  ;;  %9268 = vst [vmem:[#allocation90_spill] sm:$0xff] %v7192_v23  ;;  %v1193_v58 = vunpack.c.l.b16 %v7167_v19  ;;  %v4687_v31 = vld [vmem:[%s9039_s4 + $0x200] sm:$0xf]  ;;  %v5290_v36 = vld [vmem:[%s9039_s4 + $0x1c] sm:$0xf] }
 0x270   :  { %9269 = vst [vmem:[#allocation91_spill] sm:$0xff] %v7194_v21  ;;  %v4441_v14 = vld [vmem:[%s9039_s4 + $0x40] sm:$0xf0]  ;;  %v5401_v56 = vld [vmem:[%s9039_s4 + $0x394] sm:$0xf] }
 0x271   :  { %1888 = vmatpush.bf16.msrb.mxu2 %v7146_v52  ;;  %v7207_v52 = vor.u32 %v5366_v63, %v4727_v61  ;;  %9272 = vst [vmem:[#allocation94_spill] sm:$0xff] %v7213_v10  ;;  %v7225_v61 = vor.u32 %v5300_v46, %v4481_v0  ;;  %v4791_v63 = vld [vmem:[%s9039_s4 + $0x2e0] sm:$0xf]  ;;  %v1383_v46 = vpack.c.b16 %v1193_v58, %v1193_v58  ;;  %v4961_v58 = vld [vmem:[%s9039_s4 + $0x450] sm:$0xf0] }
 0x272   :  { %1874 = vmatpush.bf16.msrb.mxu1 %v7144_v42  ;;  %v7205_v42 = vor.u32 %v5440_v53, %v5041_v4  ;;  %v5356_v4 = vld [vmem:[%s9039_s4 + $0x224] sm:$0xf0]  ;;  %v7243_v0 = vor.u32 %v5430_v20, %v5001_v57  ;;  %1789 = vmatpush.bf16.msra.mxu3 %v7213_v10  ;;  %v5346_v20 = vld [vmem:[%s9039_s4 + $0x1d4] sm:$0xf0]  ;;  %v7264_v57 = vor.u32 %v5290_v36, %v4441_v14  ;;  %v5365_v36 = vld [vmem:[%s9039_s4 + $0x26c] sm:$0xf0] }
 0x273   :  { %9271 = vst [vmem:[#allocation93_spill] sm:$0xff] %v7207_v52  ;;  %1901 = vmatpush.bf16.msra.mxu0 %v7182_v38  ;;  %v5384_v53 = vld [vmem:[%s9039_s4 + $0x304] sm:$0xf0]  ;;  %v7245_v38 = vor.u32 %v5356_v4, %v4687_v31  ;;  %v4751_v31 = vld [vmem:[%s9039_s4 + $0x290] sm:$0xf] }
 0x274   :  { %9270 = vst [vmem:[#allocation92_spill] sm:$0xff] %v7205_v42  ;;  %v5374_v4 = vld [vmem:[%s9039_s4 + $0x2b4] sm:$0xf0]  ;;  %v5410_v10 = vld [vmem:[%s9039_s4 + $0x3dc] sm:$0xf] }
 0x275   :  { %9273 = vst [vmem:[#allocation95_spill] sm:$0xff] %v7225_v61  ;;  %1889 = vmatpush.bf16.msrb.mxu2 %v7194_v21  ;;  %v7251_v21 = vor.u32 %v5384_v53, %v4791_v63  ;;  %v7273_v63 = vand.u32 %v6147_v50, %v1383_v46  ;;  %v4719_v53 = vld [vmem:[%s9039_s4 + $0x248] sm:$0xf]  ;;  %v5127_v46 = vld [vmem:[%s9039_s4 + $0x570] sm:$0xf] }
 0x276   :  { %1875 = vmatpush.bf16.msrb.mxu1 %v7192_v23  ;;  %9274 = vst [vmem:[#allocation96_spill] sm:$0xff] %v7243_v0  ;;  %v5420_v23 = vld [vmem:[%s9039_s4 + $0x42c] sm:$0xf] }
 0x277   :  { %9275 = vst [vmem:[#allocation97_spill] sm:$0xff] %v7245_v38  ;;  %1902 = vmatpush.bf16.msra.mxu0 %v7225_v61  ;;  %v7283_v14 = vor.u32 %v5420_v23, %v4961_v58  ;;  %1790 = vmatpush.bf16.msra.mxu3 %v7251_v21  ;;  %v4921_v23 = vld [vmem:[%s9039_s4 + $0x400] sm:$0xf0]  ;;  %v5336_v58 = vld [vmem:[%s9039_s4 + $0x184] sm:$0xf0] }
 0x278   :  { %9276 = vst [vmem:[#allocation98_spill] sm:$0xff] %v7251_v21  ;;  %v7322_v21 = vor.u32 %v5410_v10, %v4921_v23  ;;  %v4881_v10 = vld [vmem:[%s9039_s4 + $0x3b0] sm:$0xf0]  ;;  %v4567_v23 = vld [vmem:[%s9039_s4 + $0x110] sm:$0xf] }
 0x279   :  { %1910 = vmatpush.bf16.msra.mxu2 %v7205_v42  ;;  %1876 = vmatmul.bf16.vlgmr.msrb.gmra.mxu1 %v6555_v6  ;;  %9277 = vst [vmem:[#allocation99_spill] sm:$0xff] %v7264_v57  ;;  %v5466_v42 = vld [vmem:[%s9039_s4 + $0x594] sm:$0xf0] }
 0x27a   :  { %1938 = vmatpush.bf16.msra.mxu1 %v7207_v52  ;;  %v4647_v52 = vld [vmem:[%s9039_s4 + $0x1b0] sm:$0xf]  ;;  %9278 = vst [vmem:[#allocation100_spill] sm:$0xff] %v7273_v63 }
 0x27b   :  { %9279 = vst [vmem:[#allocation101_spill] sm:$0xff] %v7283_v14  ;;  %v7285_v61 = vor.u32 %v5346_v20, %v4647_v52  ;;  %v4607_v52 = vld [vmem:[%s9039_s4 + $0x160] sm:$0xf]  ;;  %1903 = vmatpush.bf16.msra.mxu0 %v7264_v57  ;;  %v7309_v20 = vor.u32 %v5365_v36, %v4719_v53  ;;  %v5456_v36 = vld [vmem:[%s9039_s4 + $0x544] sm:$0xf0] }
 0x27c   :  { %9284 = vst [vmem:[#allocation106_spill] sm:$0xff] %v7322_v21  ;;  %v7324_v53 = vor.u32 %v5336_v58, %v4607_v52  ;;  %5139 = vmatmul.msk.bf16.vlgmr.msrb.gmra.mxu2 %vm1565_vm11, %v6557_v40  ;;  %v5326_v52 = vld [vmem:[%s9039_s4 + $0x134] sm:$0xf0] }
 0x27d   :  { %1911 = vmatpush.bf16.msra.mxu2 %v7243_v0  ;;  %9280 = vst [vmem:[#allocation102_spill] sm:$0xff] %v7285_v61  ;;  %v7297_v0 = vor.u32 %v5374_v4, %v4751_v31  ;;  %v7312_v31 = vor.u32 %v5466_v42, %v5127_v46  ;;  %v4679_v4 = vld [vmem:[%s9039_s4 + $0x1f8] sm:$0xf]  ;;  %v5087_v42 = vld [vmem:[%s9039_s4 + $0x520] sm:$0xf] }
 0x27e   :  { %1939 = vmatpush.bf16.msra.mxu1 %v7245_v38  ;;  %9282 = vst [vmem:[#allocation104_spill] sm:$0xff] %v7309_v20  ;;  %v5355_v38 = vld [vmem:[%s9039_s4 + $0x21c] sm:$0xf0]  ;;  %v5400_v46 = vld [vmem:[%s9039_s4 + $0x38c] sm:$0xf]  ;;  %1904 = vmatmul.bf16.vlgmr.msra.gmra.mxu0 %v6553_v18  ;;  %v7358_v57 = vor.u32 %v5456_v36, %v5087_v42 }
 0x27f   :  { %9281 = vst [vmem:[#allocation103_spill] sm:$0xff] %v7297_v0  ;;  %1971 = vmatpush.bf16.msrb.mxu0 %v7273_v63  ;;  %1791 = vmatpush.bf16.msra.mxu3 %v7297_v0  ;;  %v7349_v58 = vor.u32 %v5355_v38, %v4679_v4  ;;  %v5049_v63 = vld [vmem:[%s9039_s4 + $0x4f8] sm:$0xf0]  ;;  %v5345_v38 = vld [vmem:[%s9039_s4 + $0x1cc] sm:$0xf0]  ;;  %v7368_v4 = vor.u32 %v5400_v46, %v4881_v10 }
 0x280   :  { %9283 = vst [vmem:[#allocation105_spill] sm:$0xff] %v7312_v31  ;;  %v5390_v42 = vld [vmem:[%s9039_s4 + $0x33c] sm:$0xf]  ;;  %v5316_v46 = vld [vmem:[%s9039_s4 + $0xe4] sm:$0xf0] }
 0x281   :  { %1912 = vmatpush.bf16.msra.mxu2 %v7283_v14  ;;  %9285 = vst [vmem:[#allocation107_spill] sm:$0xff] %v7324_v53  ;;  %v4639_v14 = vld [vmem:[%s9039_s4 + $0x1a8] sm:$0xf] }
 0x282   :  { %1940 = vmatpush.bf16.msra.mxu1 %v7285_v61  ;;  %9286 = vst [vmem:[#allocation108_spill] sm:$0xff] %v7349_v58  ;;  %v5441_v61 = vld [vmem:[%s9039_s4 + $0x4d4] sm:$0xf]  ;;  %1792 = vmatmul.bf16.vlgmr.msra.gmra.mxu3 %v6555_v6  ;;  %v7388_v10 = vor.u32 %v5345_v38, %v4639_v14 }
 0x283   :  { %1854 = vmatpush.bf16.msrb.mxu3 %v7309_v20  ;;  %1972 = vmatpush.bf16.msrb.mxu0 %v7312_v31  ;;  %9287 = vst [vmem:[#allocation109_spill] sm:$0xff] %v7358_v57  ;;  %v7370_v20 = vor.u32 %v5326_v52, %v4567_v23  ;;  %v7376_v36 = vor.u32 %v5441_v61, %v5049_v63  ;;  %v4841_v31 = vld [vmem:[%s9039_s4 + $0x360] sm:$0xf0]  ;;  %v5009_v63 = vld [vmem:[%s9039_s4 + $0x4a8] sm:$0xf0] }
 0x284   :  { %9288 = vst [vmem:[#allocation110_spill] sm:$0xff] %v7368_v4  ;;  %v5431_v61 = vld [vmem:[%s9039_s4 + $0x484] sm:$0xf]  ;;  %v4599_v23 = vld [vmem:[%s9039_s4 + $0x158] sm:$0xf]  ;;  %v7405_v14 = vor.u32 %v5390_v42, %v4841_v31 }
 0x285   :  { %1913 = vmatpush.bf16.msra.mxu2 %v7322_v21  ;;  %9289 = vst [vmem:[#allocation111_spill] sm:$0xff] %v7370_v20  ;;  %v5335_v52 = vld [vmem:[%s9039_s4 + $0x17c] sm:$0xf0]  ;;  %v7413_v21 = vor.u32 %v5431_v61, %v5009_v63  ;;  %v5306_v31 = vld [vmem:[%s9039_s4 + $0x94] sm:$0xf0]  ;;  %v1194_v61 = vunpack.c.h.b16 %v7167_v19 }
 0x286   :  { %1941 = vmatpush.bf16.msra.mxu1 %v7324_v53  ;;  %9290 = vst [vmem:[#allocation112_spill] sm:$0xff] %v7376_v36  ;;  %v4527_v53 = vld [vmem:[%s9039_s4 + $0xc0] sm:$0xf]  ;;  %v5421_v42 = vld [vmem:[%s9039_s4 + $0x434] sm:$0xf] }
 0x287   :  { %1855 = vmatpush.bf16.msrb.mxu3 %v7349_v58  ;;  %9291 = vst [vmem:[#allocation113_spill] sm:$0xff] %v7388_v10  ;;  %1973 = vmatpush.bf16.msrb.mxu0 %v7358_v57  ;;  %v7407_v38 = vor.u32 %v5316_v46, %v4527_v53  ;;  %v5380_v57 = vld [vmem:[%s9039_s4 + $0x2ec] sm:$0xf]  ;;  %v4801_v58 = vld [vmem:[%s9039_s4 + $0x310] sm:$0xf0]  ;;  %v7425_v53 = vor.u32 %v5335_v52, %v4599_v23 }
 0x288   :  { %9292 = vst [vmem:[#allocation114_spill] sm:$0xff] %v7405_v14  ;;  %v4969_v46 = vld [vmem:[%s9039_s4 + $0x458] sm:$0xf0]  ;;  %v4559_v63 = vld [vmem:[%s9039_s4 + $0x108] sm:$0xf]  ;;  %v7442_v23 = vor.u32 %v5380_v57, %v4801_v58 }
 0x289   :  { %1914 = vmatpush.bf16.msra.mxu2 %v7368_v4  ;;  %9293 = vst [vmem:[#allocation115_spill] sm:$0xff] %v7407_v38  ;;  %v5370_v19 = vld [vmem:[%s9039_s4 + $0x29c] sm:$0xf]  ;;  %v4761_v4 = vld [vmem:[%s9039_s4 + $0x2c0] sm:$0xf0] }
 0x28a   :  { %1942 = vmatpush.bf16.msra.mxu1 %v7370_v20  ;;  %9294 = vst [vmem:[#allocation116_spill] sm:$0xff] %v7413_v21  ;;  %v4487_v20 = vld [vmem:[%s9039_s4 + $0x70] sm:$0xf]  ;;  %v5296_v57 = vld [vmem:[%s9039_s4 + $0x44] sm:$0xf0] }
 0x28b   :  { %1994 = vmatpush.bf16.msra.mxu0 %v7376_v36  ;;  %1856 = vmatpush.bf16.msrb.mxu3 %v7388_v10  ;;  %9295 = vst [vmem:[#allocation117_spill] sm:$0xff] %v7425_v53  ;;  %v5325_v36 = vld [vmem:[%s9039_s4 + $0x12c] sm:$0xf0]  ;;  %v7444_v52 = vor.u32 %v5306_v31, %v4487_v20  ;;  %v7453_v10 = vor.u32 %v5421_v42, %v4969_v46  ;;  %v5411_v20 = vld [vmem:[%s9039_s4 + $0x3e4] sm:$0xf] }
 0x28c   :  { %9296 = vst [vmem:[#allocation118_spill] sm:$0xff] %v7442_v23  ;;  %v7465_v58 = vor.u32 %v5325_v36, %v4559_v63  ;;  %v4929_v31 = vld [vmem:[%s9039_s4 + $0x408] sm:$0xf0]  ;;  %v5361_v42 = vld [vmem:[%s9039_s4 + $0x254] sm:$0xf]  ;;  %v7484_v63 = vor.u32 %v5370_v19, %v4761_v4 }
 0x28d   :  { %1915 = vmatpush.bf16.msra.mxu2 %v7405_v14  ;;  %9297 = vst [vmem:[#allocation119_spill] sm:$0xff] %v7444_v52  ;;  %v4729_v46 = vld [vmem:[%s9039_s4 + $0x278] sm:$0xf0]  ;;  %v4519_v14 = vld [vmem:[%s9039_s4 + $0xb8] sm:$0xf]  ;;  %v7489_v0 = vor.u32 %v5411_v20, %v4929_v31 }
 0x28e   :  { %1943 = vmatpush.bf16.msra.mxu1 %v7407_v38  ;;  %9298 = vst [vmem:[#allocation120_spill] sm:$0xff] %v7453_v10  ;;  %v4447_v38 = vld [vmem:[%s9039_s4 + $0x20] sm:$0xf]  ;;  %5141 = vmatmul.msk.bf16.vlgmr.msrb.gmra.mxu0 %vm1565_vm11, %v6557_v40  ;;  %v5351_v19 = vld [vmem:[%s9039_s4 + $0x204] sm:$0xf] }
 0x28f   :  { %1995 = vmatpush.bf16.msra.mxu0 %v7413_v21  ;;  %1857 = vmatpush.bf16.msrb.mxu3 %v7425_v53  ;;  %v1384_v21 = vpack.c.b16 %v1194_v61, %v1194_v61  ;;  %v5315_v36 = vld [vmem:[%s9039_s4 + $0xdc] sm:$0xf0]  ;;  %v7486_v53 = vor.u32 %v5296_v57, %v4447_v38  ;;  %9300 = vst [vmem:[#allocation122_spill] sm:$0xff] %v7489_v0  ;;  %v4689_v57 = vld [vmem:[%s9039_s4 + $0x228] sm:$0xf0] }
 0x290   :  { %v7491_v61 = vor.u32 %v5361_v42, %v4729_v46  ;;  %v7505_v38 = vor.u32 %v5315_v36, %v4519_v14  ;;  %v5461_v20 = vld [vmem:[%s9039_s4 + $0x574] sm:$0xf]  ;;  %v5129_v31 = vld [vmem:[%s9039_s4 + $0x598] sm:$0xf0]  ;;  %v5305_v14 = vld [vmem:[%s9039_s4 + $0x8c] sm:$0xf0]  ;;  %v1192_v42 = vunpack.c.h.b16 %v7006_v11  ;;  %v7532_v36 = vor.u32 %v5351_v19, %v4689_v57 }
 0x291   :  { %1916 = vmatpush.bf16.msra.mxu2 %v7442_v23  ;;  %9299 = vst [vmem:[#allocation121_spill] sm:$0xff] %v7486_v53  ;;  %v4889_v23 = vld [vmem:[%s9039_s4 + $0x3b8] sm:$0xf0]  ;;  %v7503_v4 = vand.u32 %v6147_v50, %v1384_v21  ;;  %v4479_v21 = vld [vmem:[%s9039_s4 + $0x68] sm:$0xf] }
 0x292   :  { %1944 = vmatpush.bf16.msra.mxu1 %v7444_v52  ;;  %9301 = vst [vmem:[#allocation123_spill] sm:$0xff] %v7491_v61  ;;  %v7530_v46 = vor.u32 %v5401_v56, %v4889_v23  ;;  %v5391_v52 = vld [vmem:[%s9039_s4 + $0x344] sm:$0xf]  ;;  %v4849_v11 = vld [vmem:[%s9039_s4 + $0x368] sm:$0xf0] }
 0x293   :  { %1996 = vmatpush.bf16.msra.mxu0 %v7453_v10  ;;  %1858 = vmatpush.bf16.msrb.mxu3 %v7465_v58  ;;  %9302 = vst [vmem:[#allocation124_spill] sm:$0xff] %v7503_v4  ;;  %v5341_v56 = vld [vmem:[%s9039_s4 + $0x1b4] sm:$0xf]  ;;  %v4649_v23 = vld [vmem:[%s9039_s4 + $0x1d8] sm:$0xf0] }
 0x294   :  { %9303 = vst [vmem:[#allocation125_spill] sm:$0xff] %v7530_v46  ;;  %v5451_v19 = vld [vmem:[%s9039_s4 + $0x524] sm:$0xf]  ;;  %v5089_v57 = vld [vmem:[%s9039_s4 + $0x548] sm:$0xf0] }
 0x295   :  { %1917 = vmatpush.bf16.msra.mxu2 %v7484_v63  ;;  %v7574_v10 = vor.u32 %v5451_v19, %v5089_v57  ;;  %v5121_v19 = vld [vmem:[%s9039_s4 + $0x590] sm:$0xf0] }
 0x296   :  { %1945 = vmatpush.bf16.msra.mxu1 %v7486_v53  ;;  %v7542_v53 = vor.u32 %v5461_v20, %v5129_v31  ;;  %v4439_v20 = vld [vmem:[%s9039_s4 + $0x18] sm:$0xf]  ;;  %v5295_v31 = vld [vmem:[%s9039_s4 + $0x3c] sm:$0xf0] }
 0x297   :  { %1997 = vmatpush.bf16.msra.mxu0 %v7489_v0  ;;  %1859 = vmatpush.bf16.msrb.mxu3 %v7505_v38  ;;  %v7544_v0 = vor.u32 %v5305_v14, %v4479_v21  ;;  %v1382_v21 = vpack.c.b16 %v1192_v42, %v1192_v42  ;;  %v7568_v14 = vor.u32 %v5391_v52, %v4849_v11  ;;  %v5381_v42 = vld [vmem:[%s9039_s4 + $0x2f4] sm:$0xf]  ;;  %v5331_v11 = vld [vmem:[%s9039_s4 + $0x164] sm:$0xf] }
 0x298   :  { %9304 = vst [vmem:[#allocation126_spill] sm:$0xff] %v7542_v53  ;;  %1918 = vmatmul.bf16.vlgmr.msra.gmra.mxu2 %v6555_v6 }
 0x299   :  { %1980 = vmatpush.bf16.msrb.mxu2 %v7491_v61  ;;  %1946 = vmatmul.bf16.vlgmr.msra.gmra.mxu1 %v6553_v18  ;;  %9305 = vst [vmem:[#allocation127_spill] sm:$0xff] %v7574_v10  ;;  %v7576_v61 = vor.u32 %v5295_v31, %v4439_v20  ;;  %v7585_v52 = vand.u32 %v6147_v50, %v1382_v21  ;;  %v5371_v31 = vld [vmem:[%s9039_s4 + $0x2a4] sm:$0xf]  ;;  %v4769_v21 = vld [vmem:[%s9039_s4 + $0x2c8] sm:$0xf0] }
 0x29a   :  { %2013 = vmatpush.bf16.msrb.mxu1 %v7503_v4  ;;  %v7570_v4 = vor.u32 %v5341_v56, %v4649_v23  ;;  %v4609_v56 = vld [vmem:[%s9039_s4 + $0x188] sm:$0xf0]  ;;  %v5047_v50 = vld [vmem:[%s9039_s4 + $0x4d0] sm:$0xf] }
 0x29b   :  { %1998 = vmatpush.bf16.msra.mxu0 %v7530_v46  ;;  %1860 = vmatpush.bf16.msrb.mxu3 %v7544_v0  ;;  %v4809_v46 = vld [vmem:[%s9039_s4 + $0x318] sm:$0xf0]  ;;  %v5460_v23 = vld [vmem:[%s9039_s4 + $0x56c] sm:$0xf]  ;;  %v7605_v20 = vor.u32 %v5331_v11, %v4609_v56 }
 0x29c   :  { %v7601_v57 = vor.u32 %v5381_v42, %v4809_v46  ;;  %v7615_v46 = vor.u32 %v5460_v23, %v5121_v19  ;;  %v5321_v42 = vld [vmem:[%s9039_s4 + $0x114] sm:$0xf]  ;;  %v4569_v11 = vld [vmem:[%s9039_s4 + $0x138] sm:$0xf0]  ;;  %v7631_v23 = vor.u32 %v5371_v31, %v4769_v21  ;;  %v5311_v31 = vld [vmem:[%s9039_s4 + $0xc4] sm:$0xf] }
 0x29d   :  { %1981 = vmatpush.bf16.msrb.mxu2 %v7532_v36  ;;  %v5450_v56 = vld [vmem:[%s9039_s4 + $0x51c] sm:$0xf]  ;;  %v7634_v19 = vor.u32 %v5321_v42, %v4569_v11  ;;  %v4529_v21 = vld [vmem:[%s9039_s4 + $0xe8] sm:$0xf0]  ;;  %v7655_v11 = vpop.permute.xlu2 %2182 }
 0x29e   :  { %2014 = vmatpush.bf16.msrb.mxu1 %v7542_v53  ;;  %9306 = vst [vmem:[#allocation128_spill] sm:$0xff] %v7631_v23 }
 0x29f   :  { %1999 = vmatpush.bf16.msra.mxu0 %v7568_v14  ;;  %1861 = vmatpush.bf16.msrb.mxu3 %v7576_v61 }
 0x2a1   :  { %1982 = vmatpush.bf16.msrb.mxu2 %v7570_v4 }
 0x2a2   :  { %2015 = vmatpush.bf16.msrb.mxu1 %v7574_v10  ;;  %1862 = vmatmul.bf16.vlgmr.msrb.gmra.mxu3 %v6553_v18  ;;  %v5446_v10 = vld [vmem:[%s9039_s4 + $0x4f4] sm:$0xf0] }
 0x2a3   :  { %1929 = vmatpush.bf16.msra.mxu3 %v7585_v52  ;;  %2000 = vmatpush.bf16.msra.mxu0 %v7601_v57  ;;  %v7653_v42 = vor.u32 %v5446_v10, %v5047_v50  ;;  %v5301_v50 = vld [vmem:[%s9039_s4 + $0x74] sm:$0xf] }
 0x2a5   :  { %1983 = vmatpush.bf16.msrb.mxu2 %v7605_v20 }
 0x2a6   :  { %2206 = vmatpush.bf16.msra.mxu1 %v5967_v22  ;;  %v5081_v22 = vld [vmem:[%s9039_s4 + $0x540] sm:$0xf0] }
 0x2a7   :  { %1930 = vmatpush.bf16.msra.mxu3 %v7615_v46  ;;  %v7644_v53 = vor.u32 %v5450_v56, %v5081_v22  ;;  %2001 = vmatpush.bf16.msra.mxu0 %v7631_v23  ;;  %v5007_v56 = vld [vmem:[%s9039_s4 + $0x480] sm:$0xf]  ;;  %v5436_v22 = vld [vmem:[%s9039_s4 + $0x4a4] sm:$0xf0]  ;;  %v2179_v23 = vpop.permute.xlu2 %2178 }
 0x2a8   :  { %v7679_v10 = vor.u32 %v5436_v22, %v5007_v56  ;;  %v5291_v56 = vld [vmem:[%s9039_s4 + $0x24] sm:$0xf] }
 0x2a9   :  { %1984 = vmatpush.bf16.msrb.mxu2 %v7634_v19  ;;  %5142 = vmatmul.msk.bf16.vlgmr.msrb.gmra.mxu1 %vm1565_vm11, %v6557_v40 }
 0x2aa   :  { %2207 = vmatpush.bf16.msra.mxu1 %v5989_v29  ;;  %v7659_v29 = vor.u32 %v5311_v31, %v4529_v21  ;;  %2002 = vmatmul.bf16.vlgmr.msra.gmra.mxu0 %v6555_v6  ;;  %v4967_v31 = vld [vmem:[%s9039_s4 + $0x430] sm:$0xf]  ;;  %v5426_v21 = vld [vmem:[%s9039_s4 + $0x454] sm:$0xf0] }
 0x2ab   :  { %2234 = vmatpush.bf16.msrb.mxu0 %v6322_v3  ;;  %1931 = vmatpush.bf16.msra.mxu3 %v7644_v53  ;;  %v4489_v3 = vld [vmem:[%s9039_s4 + $0x98] sm:$0xf0]  ;;  %v7699_v22 = vor.u32 %v5426_v21, %v4967_v31  ;;  %v5406_v21 = vld [vmem:[%s9039_s4 + $0x3b4] sm:$0xf0] }
 0x2ad   :  { %1985 = vmatpush.bf16.msrb.mxu2 %v7659_v29 }
 0x2ae   :  { %2208 = vmatpush.bf16.msra.mxu1 %v6024_v48  ;;  %v7683_v48 = vor.u32 %v5301_v50, %v4489_v3  ;;  %v5416_v3 = vld [vmem:[%s9039_s4 + $0x404] sm:$0xf0] }
 0x2af   :  { %1952 = vmatpush.bf16.msrb.mxu3 %v7653_v42  ;;  %2235 = vmatpush.bf16.msrb.mxu0 %v6359_v41  ;;  %v4449_v41 = vld [vmem:[%s9039_s4 + $0x48] sm:$0xf0] }
 0x2b0   :  { %v7703_v50 = vor.u32 %v5291_v56, %v4449_v41  ;;  %v4847_v56 = vld [vmem:[%s9039_s4 + $0x340] sm:$0xf]  ;;  %v5386_v41 = vld [vmem:[%s9039_s4 + $0x314] sm:$0xf0] }
 0x2b1   :  { %1986 = vmatpush.bf16.msrb.mxu2 %v7683_v48 }
 0x2b2   :  { %2209 = vmatpush.bf16.msra.mxu1 %v6055_v1  ;;  %v4927_v1 = vld [vmem:[%s9039_s4 + $0x3e0] sm:$0xf]  ;;  %5140 = vmatmul.msk.bf16.vlgmr.msra.gmra.mxu3 %vm1565_vm11, %v6557_v40  ;;  %v7731_v40 = vpop.f32.mrf.mxu3 }
 0x2b3   :  { %1953 = vmatpush.bf16.msrb.mxu3 %v7679_v10  ;;  %2236 = vmatpush.bf16.msrb.mxu0 %v6395_v5  ;;  %v7713_v31 = vor.u32 %v5416_v3, %v4927_v1  ;;  %v4887_v5 = vld [vmem:[%s9039_s4 + $0x390] sm:$0xf]  ;;  %v9316_v3 = vld [vmem:[#allocation55_spill] sm:$0xff] }
 0x2b5   :  { %1987 = vmatpush.bf16.msrb.mxu2 %v7703_v50 }
 0x2b6   :  { %2210 = vmatpush.bf16.msra.mxu1 %v6082_v13  ;;  %v7729_v13 = vor.u32 %v5406_v21, %v4887_v5  ;;  %v9317_v5 = vld [vmem:[#allocation4_spill] sm:$0xff] }
 0x2b7   :  { %1954 = vmatpush.bf16.msrb.mxu3 %v7699_v22  ;;  %2237 = vmatpush.bf16.msrb.mxu0 %v6431_v54  ;;  %v5396_v54 = vld [vmem:[%s9039_s4 + $0x364] sm:$0xf0] }
 0x2b8   :  { %1988 = vmatmul.bf16.vlgmr.msrb.gmra.mxu2 %v6553_v18  ;;  %v4807_v18 = vld [vmem:[%s9039_s4 + $0x2f0] sm:$0xf] }
 0x2b9   :  { %2225 = vmatpush.bf16.msra.mxu2 %v6181_v12  ;;  %v2181_v12 = vpop.permute.xlu2 %2180 }
 0x2ba   :  { %2211 = vmatpush.bf16.msra.mxu1 %v6122_v33  ;;  %v7743_v33 = vor.u32 %v5396_v54, %v4847_v56 }
 0x2bb   :  { %1955 = vmatpush.bf16.msrb.mxu3 %v7713_v31  ;;  %2238 = vmatpush.bf16.msrb.mxu0 %v6468_v47  ;;  %v7764_v47 = vpop.f32.mrf.mxu3 }
 0x2bd   :  { %2226 = vmatpush.bf16.msra.mxu2 %v6279_v15  ;;  %v7761_v15 = vor.u32 %v5386_v41, %v4807_v18 }
 0x2be   :  { %2212 = vmatpush.bf16.msra.mxu1 %v6162_v2  ;;  %v7757_v2 = vsel %vm2184_vm12, %v2181_v12, %v7655_v11 }
 0x2bf   :  { %1956 = vmatpush.bf16.msrb.mxu3 %v7729_v13  ;;  %2239 = vmatpush.bf16.msrb.mxu0 %v6486_v9  ;;  %v9307_v9 = vld [vmem:[#allocation6_spill] sm:$0xff] }
 0x2c1   :  { %2227 = vmatpush.bf16.msra.mxu2 %v6313_v49  ;;  %v7782_v49 = vsel %vm2184_vm12, %v2179_v23, %v2181_v12  ;;  %v9319_v12 = vld [vmem:[#allocation15_spill] sm:$0xff] }
 0x2c2   :  { %2213 = vmatpush.bf16.msra.mxu1 %v6213_v28  ;;  %v4767_v28 = vld [vmem:[%s9039_s4 + $0x2a0] sm:$0xf] }
 0x2c3   :  { %1957 = vmatpush.bf16.msrb.mxu3 %v7743_v33  ;;  %2240 = vmatpush.bf16.msrb.mxu0 %v6504_v16  ;;  %v1625_v16 = vpop.f32.mrf.mxu2 }
 0x2c5   :  { %2248 = vmatpush.bf16.msrb.mxu2 %v5991_v30  ;;  %2214 = vmatmul.bf16.vlgmr.msra.gmra.mxu1 %v7757_v2 }
 0x2c6   :  { %2276 = vmatpush.bf16.msrb.mxu1 %v6222_v35  ;;  %v5376_v35 = vld [vmem:[%s9039_s4 + $0x2c4] sm:$0xf0]  ;;  %s5618_s4 = smov 109  }
 0x2c7   :  { %1958 = vmatpush.bf16.msrb.mxu3 %v7761_v15  ;;  %v7776_v30 = vor.u32 %v5376_v35, %v4767_v28  ;;  %2241 = vmatpush.bf16.msrb.mxu0 %v6518_v43  ;;  %v9310_v43 = vld [vmem:[#allocation8_spill] sm:$0xff]  ;;  %v9320_v35 = vld [vmem:[#allocation59_spill] sm:$0xff] }
 0x2c8   :  { %5143 = vmatmul.msk.bf16.vlgmr.msra.gmra.mxu2 %vm1565_vm11, %v7655_v11 }
 0x2c9   :  { %2249 = vmatpush.bf16.msrb.mxu2 %v6012_v37  ;;  %v1653_v37 = vpop.f32.mrf.mxu3 }
 0x2ca   :  { %2277 = vmatpush.bf16.msrb.mxu1 %v6247_v62  ;;  %2242 = vmatmul.bf16.vlgmr.msrb.gmra.mxu0 %v7782_v49  ;;  %v1667_v62 = vpop.f32.mrf.mxu0 }
 0x2cb   :  { %2309 = vmatpush.bf16.msra.mxu0 %v6722_v26  ;;  %1959 = vmatpush.bf16.msrb.mxu3 %v7776_v30  ;;  %v1668_v26 = vadd.f32 %v1667_v62, %v1653_v37  ;;  %v9321_v37 = vld [vmem:[#allocation7_spill] sm:$0xff] }
 0x2cd   :  { %2250 = vmatpush.bf16.msrb.mxu2 %v6041_v55  ;;  %v1611_v55 = vpop.f32.mrf.mxu1 }
 0x2ce   :  { %2278 = vmatpush.bf16.msrb.mxu1 %v6267_v7  ;;  %1960 = vmatmul.bf16.vlgmr.msrb.gmra.mxu3 %v6555_v6  ;;  %v1626_v6 = vadd.f32 %v1625_v16, %v1611_v55 }
 0x2cf   :  { %2192 = vmatpush.bf16.msra.mxu3 %v5954_v17  ;;  %2310 = vmatpush.bf16.msra.mxu0 %v6762_v60  ;;  %v9315_v60 = vld [vmem:[#allocation12_spill] sm:$0xff] }
 0x2d0   :  { %v1640_v56 = vadd.f32 %v7731_v40, %v1626_v6  ;;  %v9323_v40 = vld [vmem:[#allocation17_spill] sm:$0xff] }
 0x2d1   :  { %2251 = vmatpush.bf16.msrb.mxu2 %v6070_v8  ;;  %v1655_v17 = vpop.f32.mrf.mxu3  ;;  %v9308_v8 = vld [vmem:[#allocation20_spill] sm:$0xff] }
 0x2d2   :  { %2279 = vmatpush.bf16.msrb.mxu1 %v6299_v32  ;;  %v1669_v7 = vpop.f32.mrf.mxu0  ;;  %v1627_v32 = vpop.f32.mrf.mxu2 }
 0x2d3   :  { %2193 = vmatpush.bf16.msra.mxu3 %v5976_v25  ;;  %2311 = vmatpush.bf16.msra.mxu0 %v6799_v59  ;;  %v9309_v25 = vld [vmem:[#allocation2_spill] sm:$0xff]  ;;  %v9313_v59 = vld [vmem:[#allocation11_spill] sm:$0xff]  ;;  %v1670_v54 = vadd.f32 %v1669_v7, %v1655_v17 }
 0x2d5   :  { %2252 = vmatpush.bf16.msrb.mxu2 %v6103_v24  ;;  %v9311_v24 = vld [vmem:[#allocation23_spill] sm:$0xff] }
 0x2d6   :  { %2280 = vmatpush.bf16.msrb.mxu1 %v6344_v27  ;;  %v1613_v27 = vpop.f32.mrf.mxu1 }
 0x2d7   :  { %2332 = vmatpush.bf16.msrb.mxu0 %v6551_v34  ;;  %2194 = vmatpush.bf16.msra.mxu3 %v6015_v39  ;;  %v9312_v39 = vld [vmem:[#allocation3_spill] sm:$0xff]  ;;  %v1628_v23 = vadd.f32 %v1627_v32, %v1613_v27 }
 0x2d9   :  { %2253 = vmatpush.bf16.msrb.mxu2 %v9307_v9  ;;  %v1681_v34 = vpop.f32.mrf.mxu3  ;;  %v1642_v41 = vadd.f32 %v7764_v47, %v1628_v23  ;;  %v9322_v9 = vld [vmem:[#allocation43_spill] sm:$0xff]  ;;  %v9325_v47 = vld [vmem:[#allocation9_spill] sm:$0xff] }
 0x2da   :  { %2281 = vmatpush.bf16.msrb.mxu1 %v9308_v8  ;;  %5145 = vmatmul.msk.bf16.vlgmr.msra.gmra.mxu0 %vm1565_vm11, %v7655_v11  ;;  %v7814_v1 = vpop.f32.mrf.mxu0  ;;  %v7818_v21 = vpop.f32.mrf.mxu2  ;;  %v9331_v23 = vld [vmem:[#allocation35_spill] sm:$0xff] }
 0x2db   :  { %2333 = vmatpush.bf16.msrb.mxu0 %v6598_v51  ;;  %2195 = vmatpush.bf16.msra.mxu3 %v9309_v25  ;;  %v9314_v51 = vld [vmem:[#allocation26_spill] sm:$0xff]  ;;  %v9324_v25 = vld [vmem:[#allocation64_spill] sm:$0xff] }
 0x2dd   :  { %2254 = vmatpush.bf16.msrb.mxu2 %v9310_v43  ;;  %v9326_v43 = vld [vmem:[#allocation71_spill] sm:$0xff] }
 0x2de   :  { %2282 = vmatpush.bf16.msrb.mxu1 %v9311_v24  ;;  %v7828_v16 = vpop.f32.mrf.mxu1  ;;  %v9327_v24 = vld [vmem:[#allocation32_spill] sm:$0xff] }
 0x2df   :  { %2334 = vmatpush.bf16.msrb.mxu0 %v6639_v44  ;;  %2196 = vmatpush.bf16.msra.mxu3 %v9312_v39  ;;  %v1682_v44 = vadd.f32 %v1681_v34, %v1668_v26  ;;  %v9328_v26 = vld [vmem:[#allocation46_spill] sm:$0xff] }
 0x2e1   :  { %2255 = vmatpush.bf16.msrb.mxu2 %v9313_v59  ;;  %v1683_v18 = vpop.f32.mrf.mxu3  ;;  %v2022_v28 = vpack.c.bf16 %v1682_v44, %v1640_v56  ;;  %v9334_v56 = vld [vmem:[#allocation52_spill] sm:$0xff] }
 0x2e2   :  { %2283 = vmatpush.bf16.msrb.mxu1 %v9314_v51  ;;  %v1684_v62 = vadd.f32 %v1683_v18, %v1670_v54  ;;  %v1739_v27 = vpop.f32.mrf.mxu0  ;;  %v1697_v6 = vpop.f32.mrf.mxu2  ;;  %v9329_v51 = vld [vmem:[#allocation19_spill] sm:$0xff] }
 0x2e3   :  { %2335 = vmatpush.bf16.msrb.mxu0 %v6666_v45  ;;  %2197 = vmatpush.bf16.msra.mxu3 %v9317_v5  ;;  %v9318_v45 = vld [vmem:[#allocation40_spill] sm:$0xff]  ;;  %v2034_v17 = vunpack.c.l.b16 %v2022_v28  ;;  %v2039_v7 = vunpack.c.h.b16 %v2022_v28  ;;  %v9333_v5 = vld [vmem:[#allocation22_spill] sm:$0xff]  ;;  %v9335_v54 = vld [vmem:[#allocation79_spill] sm:$0xff] }
 0x2e4   :  { %2256 = vmatmul.bf16.vlgmr.msrb.gmra.mxu2 %v7757_v2  ;;  %v2027_v55 = vpack.c.bf16 %v1684_v62, %v1642_v41  ;;  %v9338_v41 = vld [vmem:[#allocation25_spill] sm:$0xff]  ;;  %v9339_v28 = vld [vmem:[#allocation56_spill] sm:$0xff] }
 0x2e5   :  { %2318 = vmatpush.bf16.msra.mxu2 %v9315_v60  ;;  %2284 = vmatmul.bf16.vlgmr.msrb.gmra.mxu1 %v7782_v49  ;;  %v9330_v60 = vld [vmem:[#allocation75_spill] sm:$0xff]  ;;  %v9340_v62 = vld [vmem:[#allocation84_spill] sm:$0xff] }
 0x2e6   :  { %2351 = vmatpush.bf16.msra.mxu1 %v9316_v3  ;;  %v2035_v8 = vunpack.c.l.b16 %v2027_v55  ;;  %v2040_v32 = vunpack.c.h.b16 %v2027_v55  ;;  %v1711_v44 = vpop.f32.mrf.mxu1  ;;  %v9332_v3 = vld [vmem:[#allocation49_spill] sm:$0xff] }
 0x2e7   :  { %2336 = vmatpush.bf16.msrb.mxu0 %v9318_v45  ;;  %2198 = vmatpush.bf16.msra.mxu3 %v9321_v37  ;;  %v9336_v45 = vld [vmem:[#allocation38_spill] sm:$0xff]  ;;  %v9341_v55 = vld [vmem:[#allocation13_spill] sm:$0xff] }
 0x2e8   :  { %v7836_v34 = vpack.c.b16 %v2040_v32, %v2039_v7  ;;  %v7838_v39 = vpack.c.b16 %v2035_v8, %v2034_v17  ;;  %v9344_v7 = vld [vmem:[#allocation88_spill] sm:$0xff]  ;;  %v9345_v8 = vld [vmem:[#allocation14_spill] sm:$0xff]  ;;  %v9346_v32 = vld [vmem:[#allocation29_spill] sm:$0xff] }
 0x2e9   :  { %2319 = vmatpush.bf16.msra.mxu2 %v9319_v12  ;;  %v1723_v59 = vpop.f32.mrf.mxu3  ;;  %v9337_v12 = vld [vmem:[#allocation10_spill] sm:$0xff] }
 0x2ea   :  { %2352 = vmatpush.bf16.msra.mxu1 %v9320_v35  ;;  %2048 = vrot.lane.b32.xlu0 %v7836_v34, %s5618_s4  ;;  %v7862_v35 = vpop.f32.mrf.mxu0  ;;  %v1751_v37 = vpop.f32.mrf.mxu2 }
 0x2eb   :  { %2337 = vmatpush.bf16.msrb.mxu0 %v9322_v9  ;;  %2199 = vmatpush.bf16.msra.mxu3 %v9325_v47  ;;  %v9342_v9 = vld [vmem:[#allocation28_spill] sm:$0xff]  ;;  %v9347_v47 = vld [vmem:[#allocation65_spill] sm:$0xff] }
 0x2ec   :  { %2050 = vrot.lane.b32.xlu1 %v7836_v34, %s5619_s20  ;;  %2057 = vrot.lane.b32.xlu2 %v7836_v34, %s5620_s24 }
 0x2ed   :  { %2320 = vmatpush.bf16.msra.mxu2 %v9323_v40  ;;  %v9343_v40 = vld [vmem:[#allocation60_spill] sm:$0xff] }
 0x2ee   :  { %2353 = vmatpush.bf16.msra.mxu1 %v9324_v25  ;;  %2200 = vmatmul.bf16.vlgmr.msra.gmra.mxu3 %v7782_v49  ;;  %v1779_v17 = vpop.f32.mrf.mxu1 }
 0x2ef   :  { %2267 = vmatpush.bf16.msrb.mxu3 %v9327_v24  ;;  %2338 = vmatpush.bf16.msrb.mxu0 %v9328_v26  ;;  %v9349_v24 = vld [vmem:[#allocation31_spill] sm:$0xff] }
 0x2f1   :  { %2321 = vmatpush.bf16.msra.mxu2 %v9329_v51  ;;  %v1725_v18 = vpop.f32.mrf.mxu3 }
 0x2f2   :  { %2374 = vmatpush.bf16.msrb.mxu1 %v9326_v43  ;;  %v9348_v43 = vld [vmem:[#allocation94_spill] sm:$0xff]  ;;  %v7876_v26 = vpop.f32.mrf.mxu0  ;;  %v1753_v51 = vpop.f32.mrf.mxu2 }
 0x2f3   :  { %2268 = vmatpush.bf16.msrb.mxu3 %v9331_v23  ;;  %2339 = vmatpush.bf16.msrb.mxu0 %v9332_v3  ;;  %v1752_v23 = vadd.f32 %v1751_v37, %v7814_v1  ;;  %v9351_v3 = vld [vmem:[#allocation68_spill] sm:$0xff] }
 0x2f5   :  { %2322 = vmatpush.bf16.msra.mxu2 %v9333_v5  ;;  %5146 = vmatmul.msk.bf16.vlgmr.msra.gmra.mxu1 %vm1565_vm11, %v7655_v11  ;;  %v9352_v5 = vld [vmem:[#allocation98_spill] sm:$0xff] }
 0x2f6   :  { %2375 = vmatpush.bf16.msrb.mxu1 %v9330_v60  ;;  %2340 = vmatmul.bf16.vlgmr.msrb.gmra.mxu0 %v7757_v2  ;;  %v9350_v60 = vld [vmem:[#allocation16_spill] sm:$0xff] }
 0x2f7   :  { %2402 = vmatpush.bf16.msra.mxu0 %v9334_v56  ;;  %2269 = vmatpush.bf16.msrb.mxu3 %v9336_v45  ;;  %v9353_v56 = vld [vmem:[#allocation34_spill] sm:$0xff]  ;;  %v1781_v45 = vpop.f32.mrf.mxu1 }
 0x2f9   :  { %2323 = vmatpush.bf16.msra.mxu2 %v9338_v41  ;;  %v1765_v25 = vpop.f32.mrf.mxu3  ;;  %v9354_v41 = vld [vmem:[#allocation18_spill] sm:$0xff] }
 0x2fa   :  { %2376 = vmatpush.bf16.msrb.mxu1 %v9335_v54  ;;  %v1710_v54 = vadd.f32 %v7828_v16, %v7818_v21  ;;  %v9359_v16 = vld [vmem:[#allocation42_spill] sm:$0xff] }
 0x2fb   :  { %2290 = vmatpush.bf16.msra.mxu3 %v9337_v12  ;;  %2403 = vmatpush.bf16.msra.mxu0 %v9339_v28  ;;  %v1766_v12 = vadd.f32 %v1765_v25, %v1752_v23  ;;  %v1712_v28 = vadd.f32 %v1711_v44, %v1697_v6  ;;  %v9360_v25 = vld [vmem:[#allocation21_spill] sm:$0xff] }
 0x2fd   :  { %2324 = vmatpush.bf16.msra.mxu2 %v9342_v9  ;;  %v9355_v9 = vld [vmem:[#allocation72_spill] sm:$0xff]  ;;  %v1726_v37 = vadd.f32 %v1725_v18, %v1712_v28 }
 0x2fe   :  { %2377 = vmatpush.bf16.msrb.mxu1 %v9340_v62  ;;  %5144 = vmatmul.msk.bf16.vlgmr.msrb.gmra.mxu3 %vm1565_vm11, %v7655_v11  ;;  %v1754_v62 = vadd.f32 %v1753_v51, %v1739_v27  ;;  %v1835_v27 = vpop.f32.mrf.mxu0  ;;  %v9362_v18 = vld [vmem:[#allocation108_spill] sm:$0xff]  ;;  %v9363_v51 = vld [vmem:[#allocation45_spill] sm:$0xff] }
 0x2ff   :  { %2291 = vmatpush.bf16.msra.mxu3 %v9341_v55  ;;  %2404 = vmatpush.bf16.msra.mxu0 %v9343_v40  ;;  %v1724_v55 = vadd.f32 %v1723_v59, %v1710_v54  ;;  %v9356_v40 = vld [vmem:[#allocation103_spill] sm:$0xff]  ;;  %v9361_v59 = vld [vmem:[#allocation76_spill] sm:$0xff] }
 0x301   :  { %2325 = vmatpush.bf16.msra.mxu2 %v9346_v32  ;;  %v1767_v1 = vpop.f32.mrf.mxu3  ;;  %v2023_v21 = vpack.c.bf16 %v1766_v12, %v1724_v55  ;;  %v9366_v12 = vld [vmem:[#allocation83_spill] sm:$0xff] }
 0x302   :  { %2378 = vmatpush.bf16.msrb.mxu1 %v9344_v7  ;;  %v9357_v7 = vld [vmem:[#allocation37_spill] sm:$0xff]  ;;  %v1768_v32 = vadd.f32 %v1767_v1, %v1754_v62  ;;  %v9368_v62 = vld [vmem:[#allocation48_spill] sm:$0xff]  ;;  %v9369_v55 = vld [vmem:[#allocation27_spill] sm:$0xff] }
 0x303   :  { %2292 = vmatpush.bf16.msra.mxu3 %v9345_v8  ;;  %2405 = vmatpush.bf16.msra.mxu0 %v9347_v47  ;;  %v9358_v8 = vld [vmem:[#allocation104_spill] sm:$0xff]  ;;  %v1821_v47 = vpop.f32.mrf.mxu2  ;;  %v2054_v23 = vunpack.c.l.b16 %v2023_v21  ;;  %v9370_v1 = vld [vmem:[#allocation30_spill] sm:$0xff] }
 0x304   :  { %2326 = vmatmul.bf16.vlgmr.msra.gmra.mxu2 %v7782_v49  ;;  %v2028_v6 = vpack.c.bf16 %v1768_v32, %v1726_v37  ;;  %v1836_v37 = vadd.f32 %v1835_v27, %v1821_v47  ;;  %v9375_v27 = vld [vmem:[#allocation91_spill] sm:$0xff] }
 0x305   :  { %2393 = vmatpush.bf16.msrb.mxu2 %v9349_v24  ;;  %v2065_v24 = vunpack.c.h.b16 %v2023_v21  ;;  %v9372_v21 = vld [vmem:[#allocation51_spill] sm:$0xff] }
 0x306   :  { %2379 = vmatpush.bf16.msrb.mxu1 %v9348_v43  ;;  %v2055_v44 = vunpack.c.l.b16 %v2028_v6  ;;  %v2066_v43 = vunpack.c.h.b16 %v2028_v6 }
 0x307   :  { %2293 = vmatpush.bf16.msra.mxu3 %v9350_v60  ;;  %2406 = vmatpush.bf16.msra.mxu0 %v9351_v3  ;;  %v9364_v60 = vld [vmem:[#allocation24_spill] sm:$0xff]  ;;  %v1849_v3 = vpop.f32.mrf.mxu1 }
 0x308   :  { %v7899_v54 = vpack.c.b16 %v2066_v43, %v2065_v24  ;;  %v2056_v28 = vpack.c.b16 %v2055_v44, %v2054_v23  ;;  %v1850_v6 = vadd.f32 %v1849_v3, %v1836_v37  ;;  %v9376_v43 = vld [vmem:[#allocation92_spill] sm:$0xff] }
 0x309   :  { %2394 = vmatpush.bf16.msrb.mxu2 %v9353_v56  ;;  %v1793_v56 = vpop.f32.mrf.mxu3 }
 0x30a   :  { %2380 = vmatpush.bf16.msrb.mxu1 %v9352_v5  ;;  %v9365_v5 = vld [vmem:[#allocation80_spill] sm:$0xff]  ;;  %2070 = vrot.lane.b32.xlu0 %v7899_v54, %s5621_s25 }
 0x30b   :  { %2294 = vmatpush.bf16.msra.mxu3 %v9354_v41  ;;  %2407 = vmatpush.bf16.msra.mxu0 %v9355_v9  ;;  %v9367_v41 = vld [vmem:[#allocation113_spill] sm:$0xff]  ;;  %v1794_v9 = vadd.f32 %v1793_v56, %v1779_v17  ;;  %v9380_v56 = vld [vmem:[#allocation58_spill] sm:$0xff] }
 0x30c   :  { %2068 = vrot.lane.b32.xlu1 %v2056_v28, %s5621_s25  ;;  %2063 = vrot.lane.b32.xlu2 %v2056_v28, %s5622_s26 }
 0x30d   :  { %2395 = vmatpush.bf16.msrb.mxu2 %v9357_v7  ;;  %v9371_v7 = vld [vmem:[#allocation87_spill] sm:$0xff]  ;;  %v1808_v17 = vadd.f32 %v7862_v35, %v1794_v9  ;;  %v9384_v9 = vld [vmem:[#allocation41_spill] sm:$0xff] }
 0x30e   :  { %2381 = vmatpush.bf16.msrb.mxu1 %v9356_v40  ;;  %v1823_v40 = vpop.f32.mrf.mxu2 }
 0x30f   :  { %2295 = vmatpush.bf16.msra.mxu3 %v9360_v25  ;;  %2408 = vmatpush.bf16.msra.mxu0 %v9361_v59  ;;  %v9374_v25 = vld [vmem:[#allocation33_spill] sm:$0xff]  ;;  %v1851_v44 = vpop.f32.mrf.mxu1  ;;  %v2024_v24 = vpack.c.bf16 %v1850_v6, %v1808_v17 }
 0x311   :  { %2416 = vmatpush.bf16.msra.mxu2 %v9359_v16  ;;  %2382 = vmatmul.bf16.vlgmr.msrb.gmra.mxu1 %v7757_v2  ;;  %v9373_v16 = vld [vmem:[#allocation117_spill] sm:$0xff]  ;;  %v1795_v47 = vpop.f32.mrf.mxu3  ;;  %v2080_v3 = vunpack.c.l.b16 %v2024_v24 }
 0x312   :  { %2444 = vmatpush.bf16.msra.mxu1 %v9358_v8  ;;  %v1837_v8 = vpop.f32.mrf.mxu0  ;;  %v1796_v59 = vadd.f32 %v1795_v47, %v1781_v45  ;;  %v9379_v45 = vld [vmem:[#allocation96_spill] sm:$0xff]  ;;  %v9394_v47 = vld [vmem:[#allocation50_spill] sm:$0xff] }
 0x313   :  { %2296 = vmatpush.bf16.msra.mxu3 %v9364_v60  ;;  %2409 = vmatpush.bf16.msra.mxu0 %v9365_v5  ;;  %v1838_v32 = vadd.f32 %v1837_v8, %v1823_v40  ;;  %v9378_v60 = vld [vmem:[#allocation36_spill] sm:$0xff]  ;;  %v9389_v8 = vld [vmem:[#allocation110_spill] sm:$0xff] }
 0x314   :  { %5147 = vmatmul.msk.bf16.vlgmr.msrb.gmra.mxu2 %vm1565_vm11, %v7655_v11  ;;  %v1810_v35 = vadd.f32 %v7876_v26, %v1796_v59  ;;  %2059 = vrot.lane.b32.xlu1 %v2056_v28, %s5620_s24  ;;  %v9381_v26 = vld [vmem:[#allocation39_spill] sm:$0xff]  ;;  %v9397_v59 = vld [vmem:[#allocation81_spill] sm:$0xff] }
 0x315   :  { %2417 = vmatpush.bf16.msra.mxu2 %v9363_v51  ;;  %v9377_v51 = vld [vmem:[#allocation54_spill] sm:$0xff]  ;;  %2083 = vrot.lane.b32.xlu2 %v7899_v54, %s5623_s1  ;;  %v9383_v28 = vld [vmem:[#allocation63_spill] sm:$0xff] }
 0x316   :  { %2445 = vmatpush.bf16.msra.mxu1 %v9362_v18  ;;  %2410 = vmatmul.bf16.vlgmr.msra.gmra.mxu0 %v7782_v49  ;;  %v1852_v18 = vadd.f32 %v1851_v44, %v1838_v32  ;;  %v7938_v40 = vpop.f32.mrf.mxu2  ;;  %v9390_v32 = vld [vmem:[#allocation73_spill] sm:$0xff] }
 0x317   :  { %2477 = vmatpush.bf16.msrb.mxu0 %v9366_v12  ;;  %2297 = vmatpush.bf16.msra.mxu3 %v9369_v55  ;;  %v9382_v55 = vld [vmem:[#allocation101_spill] sm:$0xff] }
 0x318   :  { %v2029_v23 = vpack.c.bf16 %v1852_v18, %v1810_v35  ;;  %v9403_v35 = vld [vmem:[#allocation89_spill] sm:$0xff] }
 0x319   :  { %2418 = vmatpush.bf16.msra.mxu2 %v9368_v62 }
 0x31a   :  { %2446 = vmatpush.bf16.msra.mxu1 %v9367_v41  ;;  %2298 = vmatmul.bf16.vlgmr.msra.gmra.mxu3 %v7757_v2  ;;  %v2081_v5 = vunpack.c.l.b16 %v2029_v23  ;;  %v2094_v12 = vunpack.c.h.b16 %v2029_v23  ;;  %v1905_v37 = vpop.f32.mrf.mxu0  ;;  %v9404_v23 = vld [vmem:[#allocation66_spill] sm:$0xff] }
 0x31b   :  { %2360 = vmatpush.bf16.msrb.mxu3 %v9370_v1  ;;  %2478 = vmatpush.bf16.msrb.mxu0 %v9371_v7  ;;  %v9386_v1 = vld [vmem:[#allocation67_spill] sm:$0xff]  ;;  %v9388_v7 = vld [vmem:[#allocation44_spill] sm:$0xff] }
 0x31c   :  { %v2082_v62 = vpack.c.b16 %v2081_v5, %v2080_v3  ;;  %v9405_v5 = vld [vmem:[#allocation95_spill] sm:$0xff] }
 0x31d   :  { %2419 = vmatpush.bf16.msra.mxu2 %v9372_v21  ;;  %v1877_v21 = vpop.f32.mrf.mxu1 }
 0x31e   :  { %2447 = vmatpush.bf16.msra.mxu1 %v9373_v16  ;;  %2096 = vrot.lane.b32.xlu1 %v2082_v62, %s5625_s3  ;;  %v9392_v16 = vld [vmem:[#allocation114_spill] sm:$0xff] }
 0x31f   :  { %2361 = vmatpush.bf16.msrb.mxu3 %v9374_v25  ;;  %2479 = vmatpush.bf16.msrb.mxu0 %v9375_v27  ;;  %v9393_v25 = vld [vmem:[#allocation77_spill] sm:$0xff]  ;;  %v9396_v27 = vld [vmem:[#allocation118_spill] sm:$0xff] }
 0x320   :  { %2089 = vrot.lane.b32.xlu2 %v2082_v62, %s5626_s28 }
 0x321   :  { %2420 = vmatpush.bf16.msra.mxu2 %v9377_v51  ;;  %v9401_v51 = vld [vmem:[#allocation61_spill] sm:$0xff] }
 0x322   :  { %2448 = vmatpush.bf16.msra.mxu1 %v7465_v58  ;;  %v2093_v58 = vunpack.c.h.b16 %v2024_v24  ;;  %v1907_v6 = vpop.f32.mrf.mxu0  ;;  %v9400_v24 = vld [vmem:[#allocation123_spill] sm:$0xff] }
 0x323   :  { %2500 = vmatpush.bf16.msra.mxu0 %v9376_v43  ;;  %2362 = vmatpush.bf16.msrb.mxu3 %v9378_v60  ;;  %v9398_v43 = vld [vmem:[#allocation57_spill] sm:$0xff] }
 0x324   :  { %v2095_v41 = vpack.c.b16 %v2094_v12, %v2093_v58  ;;  %v9406_v12 = vld [vmem:[#allocation70_spill] sm:$0xff] }
 0x325   :  { %2421 = vmatpush.bf16.msra.mxu2 %v9380_v56  ;;  %v1863_v17 = vpop.f32.mrf.mxu3 }
 0x326   :  { %2449 = vmatpush.bf16.msra.mxu1 %v7505_v38  ;;  %5149 = vmatmul.msk.bf16.vlgmr.msrb.gmra.mxu0 %vm1565_vm11, %v7655_v11  ;;  %v9385_v38 = vld [vmem:[#allocation106_spill] sm:$0xff]  ;;  %v1878_v3 = vadd.f32 %v1877_v21, %v1863_v17 }
 0x327   :  { %2501 = vmatpush.bf16.msra.mxu0 %v9379_v45  ;;  %2363 = vmatpush.bf16.msrb.mxu3 %v9381_v26 }
 0x328   :  { %2109 = vrot.lane.b32.xlu0 %v2095_v41, %s5624_s27  ;;  %2085 = vrot.lane.b32.xlu1 %v2082_v62, %s5623_s1  ;;  %v1892_v26 = vadd.f32 %v7938_v40, %v1878_v3  ;;  %v9423_v3 = vld [vmem:[#allocation102_spill] sm:$0xff] }
 0x329   :  { %2422 = vmatpush.bf16.msra.mxu2 %v9383_v28 }
 0x32a   :  { %2450 = vmatpush.bf16.msra.mxu1 %v7544_v0  ;;  %v9387_v0 = vld [vmem:[#allocation69_spill] sm:$0xff] }
 0x32b   :  { %2502 = vmatpush.bf16.msra.mxu0 %v9382_v55  ;;  %2364 = vmatpush.bf16.msrb.mxu3 %v9384_v9 }
 0x32d   :  { %2423 = vmatpush.bf16.msra.mxu2 %v9386_v1  ;;  %v1865_v44 = vpop.f32.mrf.mxu3 }
 0x32e   :  { %2451 = vmatpush.bf16.msra.mxu1 %v7576_v61  ;;  %v9391_v61 = vld [vmem:[#allocation47_spill] sm:$0xff] }
 0x32f   :  { %2503 = vmatpush.bf16.msra.mxu0 %v9385_v38  ;;  %2365 = vmatpush.bf16.msrb.mxu3 %v9388_v7  ;;  %v9409_v38 = vld [vmem:[#allocation74_spill] sm:$0xff]  ;;  %v9410_v7 = vld [vmem:[#allocation105_spill] sm:$0xff] }
 0x330   :  { %2424 = vmatmul.bf16.vlgmr.msra.gmra.mxu2 %v7757_v2  ;;  %2102 = vrot.lane.b32.xlu0 %v2095_v41, %s5627_s29 }
 0x331   :  { %2486 = vmatpush.bf16.msrb.mxu2 %v9387_v0  ;;  %2452 = vmatmul.bf16.vlgmr.msra.gmra.mxu1 %v7782_v49 }
 0x332   :  { %2519 = vmatpush.bf16.msrb.mxu1 %v7585_v52  ;;  %v1893_v52 = vpop.f32.mrf.mxu2 }
 0x333   :  { %2504 = vmatpush.bf16.msra.mxu0 %v9389_v8  ;;  %2366 = vmatpush.bf16.msrb.mxu3 %v9391_v61  ;;  %v9411_v8 = vld [vmem:[#allocation78_spill] sm:$0xff]  ;;  %v9412_v61 = vld [vmem:[#allocation109_spill] sm:$0xff] }
 0x335   :  { %2487 = vmatpush.bf16.msrb.mxu2 %v9390_v32 }
 0x336   :  { %2520 = vmatpush.bf16.msrb.mxu1 %v7615_v46  ;;  %v9395_v46 = vld [vmem:[#allocation53_spill] sm:$0xff] }
 0x337   :  { %2505 = vmatpush.bf16.msra.mxu0 %v9392_v16  ;;  %2367 = vmatpush.bf16.msrb.mxu3 %v9394_v47  ;;  %v9416_v16 = vld [vmem:[#allocation86_spill] sm:$0xff] }
 0x338   :  { %2098 = vrot.lane.b32.xlu0 %v2095_v41, %s5625_s3  ;;  %v9407_v41 = vld [vmem:[#allocation99_spill] sm:$0xff] }
 0x339   :  { %2488 = vmatpush.bf16.msrb.mxu2 %v9393_v25 }
 0x33a   :  { %2521 = vmatpush.bf16.msrb.mxu1 %v7644_v53  ;;  %2368 = vmatmul.bf16.vlgmr.msrb.gmra.mxu3 %v7782_v49  ;;  %v1879_v53 = vpop.f32.mrf.mxu1  ;;  %v1919_v18 = vpop.f32.mrf.mxu2 }
 0x33b   :  { %2435 = vmatpush.bf16.msra.mxu3 %v9395_v46  ;;  %2506 = vmatpush.bf16.msra.mxu0 %v9396_v27  ;;  %v1920_v45 = vadd.f32 %v1919_v18, %v1905_v37  ;;  %v9418_v27 = vld [vmem:[#allocation90_spill] sm:$0xff] }
 0x33d   :  { %2489 = vmatpush.bf16.msrb.mxu2 %v9397_v59 }
 0x33e   :  { %2542 = vmatpush.bf16.msra.mxu1 %v7653_v42  ;;  %v9399_v42 = vld [vmem:[#allocation85_spill] sm:$0xff] }
 0x33f   :  { %2436 = vmatpush.bf16.msra.mxu3 %v9398_v43  ;;  %2507 = vmatpush.bf16.msra.mxu0 %v7484_v63  ;;  %v7980_v63 = vpop.f32.mrf.mxu0 }
 0x340   :  { %2091 = vrot.lane.b32.xlu0 %v2082_v62, %s5628_s30 }
 0x341   :  { %2490 = vmatpush.bf16.msrb.mxu2 %v9399_v42  ;;  %5150 = vmatmul.msk.bf16.vlgmr.msrb.gmra.mxu1 %vm1565_vm11, %v7655_v11 }
 0x342   :  { %2543 = vmatpush.bf16.msra.mxu1 %v7679_v10  ;;  %2508 = vmatmul.bf16.vlgmr.msra.gmra.mxu0 %v7757_v2  ;;  %v9402_v10 = vld [vmem:[#allocation62_spill] sm:$0xff]  ;;  %v1947_v60 = vpop.f32.mrf.mxu1  ;;  %v1921_v56 = vpop.f32.mrf.mxu2 }
 0x343   :  { %2570 = vmatpush.bf16.msrb.mxu0 %v9400_v24  ;;  %2437 = vmatpush.bf16.msra.mxu3 %v9401_v51 }
 0x345   :  { %2491 = vmatpush.bf16.msrb.mxu2 %v9403_v35 }
 0x346   :  { %2544 = vmatpush.bf16.msra.mxu1 %v7699_v22  ;;  %v1933_v22 = vpop.f32.mrf.mxu3 }
 0x347   :  { %2458 = vmatpush.bf16.msrb.mxu3 %v9402_v10  ;;  %2571 = vmatpush.bf16.msrb.mxu0 %v7532_v36  ;;  %v1880_v36 = vadd.f32 %v1879_v53, %v1865_v44  ;;  %v1934_v58 = vadd.f32 %v1933_v22, %v1920_v45  ;;  %v1977_v9 = vpop.f32.mrf.mxu0  ;;  %v9419_v44 = vld [vmem:[#allocation93_spill] sm:$0xff]  ;;  %v9420_v53 = vld [vmem:[#allocation122_spill] sm:$0xff] }
 0x348   :  { %v9421_v10 = vld [vmem:[#allocation97_spill] sm:$0xff] }
 0x349   :  { %2492 = vmatpush.bf16.msrb.mxu2 %v9405_v5  ;;  %v1894_v62 = vadd.f32 %v1893_v52, %v1880_v36  ;;  %v2025_v55 = vpack.c.bf16 %v1934_v58, %v1892_v26  ;;  %v9414_v52 = vld [vmem:[#allocation82_spill] sm:$0xff]  ;;  %v9425_v26 = vld [vmem:[#allocation111_spill] sm:$0xff] }
 0x34a   :  { %2545 = vmatpush.bf16.msra.mxu1 %v7713_v31  ;;  %v1922_v31 = vadd.f32 %v1921_v56, %v1907_v6  ;;  %5148 = vmatmul.msk.bf16.vlgmr.msra.gmra.mxu3 %vm1565_vm11, %v7655_v11  ;;  %v1949_v1 = vpop.f32.mrf.mxu1  ;;  %v1989_v21 = vpop.f32.mrf.mxu2  ;;  %v9417_v6 = vld [vmem:[#allocation120_spill] sm:$0xff] }
 0x34b   :  { %2459 = vmatpush.bf16.msrb.mxu3 %v9404_v23  ;;  %2572 = vmatpush.bf16.msrb.mxu0 %v7570_v4  ;;  %v2117_v0 = vunpack.c.h.b16 %v2025_v55  ;;  %v9422_v23 = vld [vmem:[#allocation125_spill] sm:$0xff] }
 0x34d   :  { %2493 = vmatpush.bf16.msrb.mxu2 %v9407_v41 }
 0x34e   :  { %2546 = vmatpush.bf16.msra.mxu1 %v7729_v13  ;;  %v1935_v4 = vpop.f32.mrf.mxu3  ;;  %v9408_v13 = vld [vmem:[#allocation100_spill] sm:$0xff] }
 0x34f   :  { %2460 = vmatpush.bf16.msrb.mxu3 %v9406_v12  ;;  %2573 = vmatpush.bf16.msrb.mxu0 %v7605_v20  ;;  %v1936_v28 = vadd.f32 %v1935_v4, %v1922_v31  ;;  %v2106_v20 = vunpack.c.l.b16 %v2025_v55  ;;  %v9424_v31 = vld [vmem:[#allocation107_spill] sm:$0xff]  ;;  %v9426_v4 = vld [vmem:[#allocation128_spill] sm:$0xff] }
 0x350   :  { %2494 = vmatmul.bf16.vlgmr.msrb.gmra.mxu2 %v7782_v49 }
 0x351   :  { %2561 = vmatpush.bf16.msra.mxu2 %v9408_v13  ;;  %v2030_v40 = vpack.c.bf16 %v1936_v28, %v1894_v62  ;;  %v9427_v62 = vld [vmem:[#allocation115_spill] sm:$0xff] }
 0x352   :  { %2547 = vmatpush.bf16.msra.mxu1 %v7743_v33  ;;  %v1991_v46 = vpop.f32.mrf.mxu2 }
 0x353   :  { %2461 = vmatpush.bf16.msrb.mxu3 %v9409_v38  ;;  %2574 = vmatpush.bf16.msrb.mxu0 %v7634_v19  ;;  %v2107_v33 = vunpack.c.l.b16 %v2030_v40  ;;  %v2118_v37 = vunpack.c.h.b16 %v2030_v40  ;;  %v2003_v19 = vpop.f32.mrf.mxu0  ;;  %v9430_v38 = vld [vmem:[#allocation124_spill] sm:$0xff] }
 0x355   :  { %2562 = vmatpush.bf16.msra.mxu2 %v9410_v7  ;;  %v2119_v32 = vpack.c.b16 %v2118_v37, %v2117_v0  ;;  %v8002_v17 = vpack.c.b16 %v2107_v33, %v2106_v20  ;;  %v9432_v33 = vld [vmem:[#allocation127_spill] sm:$0xff] }
 0x356   :  { %2548 = vmatpush.bf16.msra.mxu1 %v7761_v15  ;;  %v9413_v15 = vld [vmem:[#allocation112_spill] sm:$0xff]  ;;  %v1961_v25 = vpop.f32.mrf.mxu3 }
 0x357   :  { %2462 = vmatpush.bf16.msrb.mxu3 %v9411_v8  ;;  %2575 = vmatpush.bf16.msrb.mxu0 %v7659_v29  ;;  %v2017_v29 = vpop.f32.mrf.mxu1  ;;  %v1962_v47 = vadd.f32 %v1961_v25, %v1947_v60 }
 0x358   :  { %2132 = vrot.lane.b32.xlu0 %v2119_v32, %s5619_s20  ;;  %2120 = vrot.lane.b32.xlu1 %v8002_v17, %s5629_s15 }
 0x359   :  { %2563 = vmatpush.bf16.msra.mxu2 %v9412_v61  ;;  %2115 = vrot.lane.b32.xlu2 %v8002_v17, %s5630_s16  ;;  %v1976_v43 = vadd.f32 %v7980_v63, %v1962_v47 }
 0x35a   :  { %2549 = vmatpush.bf16.msra.mxu1 %v7776_v30  ;;  %v9415_v30 = vld [vmem:[#allocation116_spill] sm:$0xff]  ;;  %v2229_v41 = vpop.f32.mrf.mxu2 }
 0x35b   :  { %2463 = vmatpush.bf16.msrb.mxu3 %v9414_v52  ;;  %2576 = vmatpush.bf16.msrb.mxu0 %v7683_v48  ;;  %v2004_v48 = vadd.f32 %v2003_v19, %v1989_v21  ;;  %v2005_v59 = vpop.f32.mrf.mxu0 }
 0x35d   :  { %2584 = vmatpush.bf16.msrb.mxu2 %v9413_v15  ;;  %2550 = vmatmul.bf16.vlgmr.msra.gmra.mxu1 %v7757_v2  ;;  %v2018_v42 = vadd.f32 %v2017_v29, %v2004_v48 }
 0x35e   :  { %v1963_v18 = vpop.f32.mrf.mxu3 }
 0x35f   :  { %2464 = vmatpush.bf16.msrb.mxu3 %v9416_v16  ;;  %2577 = vmatpush.bf16.msrb.mxu0 %v7703_v50  ;;  %v2006_v50 = vadd.f32 %v2005_v59, %v1991_v46  ;;  %v1964_v24 = vadd.f32 %v1963_v18, %v1949_v1  ;;  %v2019_v51 = vpop.f32.mrf.mxu1  ;;  %v2026_v22 = vpack.c.bf16 %v2018_v42, %v1976_v43  ;;  %v9431_v1 = vld [vmem:[#allocation126_spill] sm:$0xff] }
 0x360   :  { %2125 = vrot.lane.b32.xlu0 %v2119_v32, %s5618_s4  ;;  %5151 = vmatmul.msk.bf16.vlgmr.msra.gmra.mxu2 %vm1565_vm11, %v7655_v11 }
 0x361   :  { %2585 = vmatpush.bf16.msrb.mxu2 %v9415_v30  ;;  %2111 = vrot.lane.b32.xlu2 %v8002_v17, %s5624_s27  ;;  %v2020_v35 = vadd.f32 %v2019_v51, %v2006_v50  ;;  %v1978_v60 = vadd.f32 %v1977_v9, %v1964_v24  ;;  %v2129_v63 = vunpack.c.l.b16 %v2026_v22  ;;  %v2142_v56 = vunpack.c.h.b16 %v2026_v22  ;;  %v9429_v9 = vld [vmem:[#allocation121_spill] sm:$0xff]  ;;  %v8061_v24 = vpop.permute.xlu0 %2048 }
 0x362   :  { %2578 = vmatmul.bf16.vlgmr.msrb.gmra.mxu0 %v7782_v49  ;;  %v2231_v28 = vpop.f32.mrf.mxu2 }
 0x363   :  { %2465 = vmatpush.bf16.msrb.mxu3 %v9418_v27  ;;  %v2031_v45 = vpack.c.bf16 %v2020_v35, %v1978_v60 }
 0x365   :  { %2586 = vmatpush.bf16.msrb.mxu2 %v9417_v6  ;;  %v2130_v5 = vunpack.c.l.b16 %v2031_v45  ;;  %v2143_v36 = vunpack.c.h.b16 %v2031_v45 }
 0x366   :  { %2466 = vmatmul.bf16.vlgmr.msrb.gmra.mxu3 %v7757_v2 }
 0x367   :  { %2528 = vmatpush.bf16.msra.mxu3 %v9419_v44  ;;  %v2131_v58 = vpack.c.b16 %v2130_v5, %v2129_v63  ;;  %v2144_v12 = vpack.c.b16 %v2143_v36, %v2142_v56  ;;  %v2215_v13 = vpop.f32.mrf.mxu1 }
 0x368   :  { %2122 = vrot.lane.b32.xlu0 %v2119_v32, %s5629_s15 }
 0x369   :  { %2587 = vmatpush.bf16.msrb.mxu2 %v9420_v53  ;;  %2138 = vrot.lane.b32.xlu1 %v2131_v58, %s5620_s24 }
 0x36a   :  { %2147 = vrot.lane.b32.xlu2 %v2144_v12, %s5621_s25  ;;  %v2257_v20 = vpop.f32.mrf.mxu2 }
 0x36b   :  { %2529 = vmatpush.bf16.msra.mxu3 %v9421_v10 }
 0x36d   :  { %2588 = vmatpush.bf16.msrb.mxu2 %v9422_v23 }
 0x36f   :  { %2530 = vmatpush.bf16.msra.mxu3 %v9423_v3  ;;  %v2217_v0 = vpop.f32.mrf.mxu1 }
 0x370   :  { %2145 = vrot.lane.b32.xlu0 %v2131_v58, %s5621_s25 }
 0x371   :  { %2589 = vmatpush.bf16.msrb.mxu2 %v7568_v14  ;;  %v2243_v14 = vpop.f32.mrf.mxu0  ;;  %2150 = vrot.lane.b32.xlu1 %v2144_v12, %s5631_s17  ;;  %v2201_v55 = vpop.f32.mrf.mxu3 }
 0x372   :  { %2134 = vrot.lane.b32.xlu2 %v2131_v58, %s5619_s20  ;;  %v2258_v32 = vadd.f32 %v2257_v20, %v2243_v14  ;;  %v2216_v21 = vadd.f32 %v2215_v13, %v2201_v55  ;;  %v2259_v61 = vpop.f32.mrf.mxu2  ;;  %v8080_v20 = vpop.permute.xlu2 %2057 }
 0x373   :  { %2531 = vmatpush.bf16.msra.mxu3 %v9424_v31 }
 0x374   :  { %v2230_v52 = vadd.f32 %v2229_v41, %v2216_v21 }
 0x375   :  { %2590 = vmatpush.bf16.msrb.mxu2 %v7601_v57  ;;  %v9428_v57 = vld [vmem:[#allocation119_spill] sm:$0xff] }
 0x377   :  { %2532 = vmatpush.bf16.msra.mxu3 %v9425_v26  ;;  %v2285_v8 = vpop.f32.mrf.mxu1 }
 0x378   :  { %2140 = vrot.lane.b32.xlu0 %v2131_v58, %s5622_s26 }
 0x379   :  { %2591 = vmatpush.bf16.msrb.mxu2 %v9426_v4  ;;  %v2203_v40 = vpop.f32.mrf.mxu3 }
 0x37a   :  { %v2218_v19 = vadd.f32 %v2217_v0, %v2203_v40 }
 0x37b   :  { %2533 = vmatpush.bf16.msra.mxu3 %v9427_v62 }
 0x37c   :  { %2592 = vmatmul.bf16.vlgmr.msrb.gmra.mxu2 %v7757_v2  ;;  %v2245_v2 = vpop.f32.mrf.mxu0  ;;  %v2232_v30 = vadd.f32 %v2231_v28, %v2218_v19  ;;  %v8066_v63 = vpop.permute.xlu0 %2070 }
 0x37d   :  { %v8089_v19 = vpop.permute.xlu1 %2050 }
 0x37f   :  { %2534 = vmatpush.bf16.msra.mxu3 %v9428_v57  ;;  %v2287_v6 = vpop.f32.mrf.mxu1 }
 0x381   :  { %v2271_v37 = vpop.f32.mrf.mxu3 }
 0x382   :  { %v2272_v15 = vadd.f32 %v2271_v37, %v2258_v32 }
 0x383   :  { %2535 = vmatpush.bf16.msra.mxu3 %v9429_v9 }
 0x384   :  { %v2313_v7 = vpop.f32.mrf.mxu0  ;;  %v2612_v16 = vpack.c.bf16 %v2272_v15, %v2230_v52 }
 0x386   :  { %2536 = vmatmul.bf16.vlgmr.msra.gmra.mxu3 %v7782_v49  ;;  %v2260_v49 = vadd.f32 %v2259_v61, %v2245_v2  ;;  %v2629_v27 = vunpack.c.h.b16 %v2612_v16  ;;  %v2624_v43 = vunpack.c.l.b16 %v2612_v16 }
 0x387   :  { %2603 = vmatpush.bf16.msrb.mxu3 %v9430_v38  ;;  %v2327_v44 = vpop.f32.mrf.mxu2  ;;  %v2355_v53 = vpop.f32.mrf.mxu1 }
 0x389   :  { %v2273_v29 = vpop.f32.mrf.mxu3 }
 0x38a   :  { %v2274_v25 = vadd.f32 %v2273_v29, %v2260_v49 }
 0x38b   :  { %2604 = vmatpush.bf16.msrb.mxu3 %v9431_v1 }
 0x38c   :  { %v2315_v47 = vpop.f32.mrf.mxu0  ;;  %v2617_v46 = vpack.c.bf16 %v2274_v25, %v2232_v30 }
 0x38e   :  { %v2630_v48 = vunpack.c.h.b16 %v2617_v46  ;;  %v2625_v50 = vunpack.c.l.b16 %v2617_v46 }
 0x38f   :  { %2605 = vmatpush.bf16.msrb.mxu3 %v9432_v33  ;;  %v2329_v10 = vpop.f32.mrf.mxu2  ;;  %v2357_v56 = vpop.f32.mrf.mxu1 }
 0x390   :  { %v2631_v59 = vpack.c.b16 %v2630_v48, %v2629_v27  ;;  %v8059_v42 = vpack.c.b16 %v2625_v50, %v2624_v43 }
 0x392   :  { %2646 = vrot.lane.b32.xlu0 %v2631_v59, %s5620_s24  ;;  %2639 = vrot.lane.b32.xlu1 %v2631_v59, %s5619_s20 }
 0x393   :  { %2634 = vrot.lane.b32.xlu2 %v2631_v59, %s5629_s15 }
 0x396   :  { %5152 = vmatmul.msk.bf16.vlgmr.msrb.gmra.mxu3 %vm1565_vm11, %v7655_v11  ;;  %v2341_v11 = vpop.f32.mrf.mxu0 }
 0x397   :  { %v2342_v35 = vadd.f32 %v2341_v11, %v2327_v44  ;;  %v2397_v13 = vpop.f32.mrf.mxu2  ;;  %v2383_v38 = vpop.f32.mrf.mxu1 }
 0x398   :  { %v8095_v11 = vpop.permute.xlu1 %2068 }
 0x399   :  { %v2356_v3 = vadd.f32 %v2355_v53, %v2342_v35 }
 0x39a   :  { %2632 = vrot.lane.b32.xlu0 %v8059_v42, %s5629_s15  ;;  %2637 = vrot.lane.b32.xlu1 %v2631_v59, %s5618_s4  ;;  %v8070_v14 = vpop.permute.xlu0 %2109 }
 0x39d   :  { %v2299_v18 = vpop.f32.mrf.mxu3 }
 0x39e   :  { %v2300_v51 = vadd.f32 %v2299_v18, %v2285_v8  ;;  %v2343_v22 = vpop.f32.mrf.mxu0  ;;  %v8085_v8 = vpop.permute.xlu2 %2063 }
 0x39f   :  { %v2344_v60 = vadd.f32 %v2343_v22, %v2329_v10  ;;  %v2399_v40 = vpop.f32.mrf.mxu2  ;;  %v2385_v37 = vpop.f32.mrf.mxu1 }
 0x3a0   :  { %v2314_v23 = vadd.f32 %v2313_v7, %v2300_v51 }
 0x3a1   :  { %v2358_v36 = vadd.f32 %v2357_v56, %v2344_v60  ;;  %v8104_v56 = vpop.permute.xlu1 %2059 }
 0x3a2   :  { %2627 = vrot.lane.b32.xlu0 %v8059_v42, %s5630_s16  ;;  %v2613_v58 = vpack.c.bf16 %v2356_v3, %v2314_v23  ;;  %v8074_v9 = vpop.permute.xlu0 %2102 }
 0x3a4   :  { %v2653_v26 = vunpack.c.h.b16 %v2613_v58  ;;  %v2643_v4 = vunpack.c.l.b16 %v2613_v58 }
 0x3a5   :  { %v2301_v45 = vpop.f32.mrf.mxu3 }
 0x3a6   :  { %v2302_v5 = vadd.f32 %v2301_v45, %v2287_v6  ;;  %v2411_v28 = vpop.f32.mrf.mxu0  ;;  %v8091_v6 = vpop.permute.xlu2 %2083 }
 0x3a8   :  { %v2316_v12 = vadd.f32 %v2315_v47, %v2302_v5 }
 0x3aa   :  { %v2618_v31 = vpack.c.bf16 %v2358_v36, %v2316_v12  ;;  %v8082_v0 = vpop.permute.xlu0 %2098 }
 0x3ac   :  { %v2654_v41 = vunpack.c.h.b16 %v2618_v31  ;;  %v2644_v62 = vunpack.c.l.b16 %v2618_v31 }
 0x3ae   :  { %v2655_v57 = vpack.c.b16 %v2654_v41, %v2653_v26  ;;  %v2645_v55 = vpack.c.b16 %v2644_v62, %v2643_v4  ;;  %v2413_v1 = vpop.f32.mrf.mxu0  ;;  %v2453_v15 = vpop.f32.mrf.mxu1 }
 0x3af   :  { %v8097_v45 = vpop.permute.xlu2 %2089  ;;  %v8110_v4 = vpop.permute.xlu1 %2096 }
 0x3b0   :  { %2658 = vrot.lane.b32.xlu1 %v2655_v57, %s5621_s25  ;;  %2656 = vrot.lane.b32.xlu2 %v2645_v55, %s5621_s25 }
 0x3b2   :  { %v8087_v61 = vpop.permute.xlu0 %2091 }
 0x3b3   :  { %v2425_v7 = vpop.f32.mrf.mxu2 }
 0x3b4   :  { %v2426_v49 = vadd.f32 %v2425_v7, %v2411_v28 }
 0x3b6   :  { %v2481_v32 = vpop.f32.mrf.mxu0  ;;  %v2455_v53 = vpop.f32.mrf.mxu1 }
 0x3b7   :  { %v8106_v12 = vpop.permute.xlu2 %2115 }
 0x3b8   :  { %2651 = vrot.lane.b32.xlu1 %v2645_v55, %s5622_s26  ;;  %2648 = vrot.lane.b32.xlu2 %v2645_v55, %s5620_s24 }
 0x3bb   :  { %v2427_v29 = vpop.f32.mrf.mxu2 }
 0x3bc   :  { %v2428_v25 = vadd.f32 %v2427_v29, %v2413_v1 }
 0x3bd   :  { %v2369_v2 = vpop.f32.mrf.mxu3 }
 0x3be   :  { %v2384_v52 = vadd.f32 %v2383_v38, %v2369_v2  ;;  %v2483_v50 = vpop.f32.mrf.mxu0  ;;  %v2523_v36 = vpop.f32.mrf.mxu1 }
 0x3bf   :  { %v8115_v7 = vpop.permute.xlu2 %2111 }
 0x3c0   :  { %2670 = vrot.lane.b32.xlu1 %v2655_v57, %s5623_s1  ;;  %2663 = vrot.lane.b32.xlu2 %v2655_v57, %s5632_s2  ;;  %v2398_v47 = vadd.f32 %v2397_v13, %v2384_v52  ;;  %v8117_v52 = vpop.permute.xlu1 %2085 }
 0x3c5   :  { %v2371_v33 = vpop.f32.mrf.mxu3 }
 0x3c6   :  { %v2386_v30 = vadd.f32 %v2385_v37, %v2371_v33  ;;  %v2509_v3 = vpop.f32.mrf.mxu0 }
 0x3c8   :  { %2661 = vrot.lane.b32.xlu2 %v2655_v57, %s5631_s17  ;;  %v2400_v27 = vadd.f32 %v2399_v40, %v2386_v30  ;;  %v2525_v40 = vpop.f32.mrf.mxu1 }
 0x3ca   :  { %v8093_v48 = vpop.permute.xlu0 %2132 }
 0x3cd   :  { %v2439_v21 = vpop.f32.mrf.mxu3 }
 0x3ce   :  { %v2440_v16 = vadd.f32 %v2439_v21, %v2426_v49  ;;  %v2511_v62 = vpop.f32.mrf.mxu0 }
 0x3d0   :  { %v2614_v59 = vpack.c.bf16 %v2440_v16, %v2398_v47 }
 0x3d2   :  { %v2667_v18 = vunpack.c.l.b16 %v2614_v59  ;;  %v2679_v51 = vunpack.c.h.b16 %v2614_v59  ;;  %v8102_v5 = vpop.permute.xlu0 %2125 }
 0x3d3   :  { %v2495_v23 = vpop.f32.mrf.mxu2 }
 0x3d4   :  { %v2510_v41 = vadd.f32 %v2509_v3, %v2495_v23 }
 0x3d5   :  { %v2441_v46 = vpop.f32.mrf.mxu3 }
 0x3d6   :  { %v2442_v44 = vadd.f32 %v2441_v46, %v2428_v25  ;;  %v2524_v38 = vadd.f32 %v2523_v36, %v2510_v41  ;;  %v8122_v46 = vpop.permute.xlu1 %2120 }
 0x3d8   :  { %v2619_v43 = vpack.c.bf16 %v2442_v44, %v2400_v27 }
 0x3da   :  { %v2668_v10 = vunpack.c.l.b16 %v2619_v43  ;;  %v2680_v35 = vunpack.c.h.b16 %v2619_v43  ;;  %v8112_v55 = vpop.permute.xlu0 %2122 }
 0x3db   :  { %v2497_v26 = vpop.f32.mrf.mxu2 }
 0x3dc   :  { %v2669_v22 = vpack.c.b16 %v2668_v10, %v2667_v18  ;;  %v2681_v60 = vpack.c.b16 %v2680_v35, %v2679_v51  ;;  %v2512_v57 = vadd.f32 %v2511_v62, %v2497_v26  ;;  %v2551_v10 = vpop.f32.mrf.mxu1 }
 0x3de   :  { %2687 = vrot.lane.b32.xlu0 %v2681_v60, %s5627_s29  ;;  %2682 = vrot.lane.b32.xlu1 %v2669_v22, %s5625_s3  ;;  %v2526_v1 = vadd.f32 %v2525_v40, %v2512_v57  ;;  %v2139_v43 = vpop.permute.xlu1 %2138 }
 0x3df   :  { %2694 = vrot.lane.b32.xlu2 %v2681_v60, %s5624_s27 }
 0x3e2   :  { %v2146_v29 = vpop.permute.xlu0 %2145 }
 0x3e3   :  { %v2565_v25 = vpop.f32.mrf.mxu2 }
 0x3e6   :  { %2684 = vrot.lane.b32.xlu0 %v2681_v60, %s5625_s3  ;;  %v2579_v60 = vpop.f32.mrf.mxu0  ;;  %v8133_v23 = vpop.permute.xlu1 %2150 }
 0x3e7   :  { %2677 = vrot.lane.b32.xlu2 %v2669_v22, %s5628_s30 }
 0x3e9   :  { %v2467_v58 = vpop.f32.mrf.mxu3 }
 0x3ea   :  { %v2468_v31 = vadd.f32 %v2467_v58, %v2453_v15  ;;  %v2141_v59 = vpop.permute.xlu0 %2140 }
 0x3ec   :  { %v2482_v13 = vadd.f32 %v2481_v32, %v2468_v31  ;;  %v2148_v32 = vpop.permute.xlu2 %2147  ;;  %v2553_v31 = vpop.f32.mrf.mxu1 }
 0x3ed   :  { %v2149_v18 = vsel %vm2072_vm13, %v2146_v29, %v2148_v32 }
 0x3ee   :  { %v2615_v33 = vpack.c.bf16 %v2524_v38, %v2482_v13  ;;  %2675 = vrot.lane.b32.xlu0 %v2669_v22, %s5626_s28  ;;  %v2581_v38 = vpop.f32.mrf.mxu0 }
 0x3f0   :  { %v2701_v15 = vunpack.c.h.b16 %v2615_v33  ;;  %v2691_v47 = vunpack.c.l.b16 %v2615_v33 }
 0x3f1   :  { %v2469_v28 = vpop.f32.mrf.mxu3 }
 0x3f2   :  { %v2470_v2 = vadd.f32 %v2469_v28, %v2455_v53  ;;  %v2567_v53 = vpop.f32.mrf.mxu2 }
 0x3f4   :  { %v2484_v37 = vadd.f32 %v2483_v50, %v2470_v2  ;;  %v2135_v50 = vpop.permute.xlu2 %2134 }
 0x3f5   :  { %v2137_v3 = vsel %vm2136_vm14, %v8093_v48, %v2135_v50 }
 0x3f6   :  { %v2620_v21 = vpack.c.bf16 %v2526_v1, %v2484_v37  ;;  %2672 = vrot.lane.b32.xlu0 %v2669_v22, %s5623_s1  ;;  %s5649_s1 = smov 4  }
 0x3f8   :  { %v2702_v49 = vunpack.c.h.b16 %v2620_v21  ;;  %v2692_v16 = vunpack.c.l.b16 %v2620_v21 }
 0x3fa   :  { %v2703_v30 = vpack.c.b16 %v2702_v49, %v2701_v15  ;;  %v2693_v27 = vpack.c.b16 %v2692_v16, %v2691_v47 }
 0x3fc   :  { %2709 = vrot.lane.b32.xlu1 %v2703_v30, %s5618_s4  ;;  %2706 = vrot.lane.b32.xlu2 %v2703_v30, %s5629_s15  ;;  %v8131_v35 = vpop.permute.xlu2 %2634  ;;  %s5644_s4 = smov 68  }
 0x3fe   :  { %2716 = vrot.lane.b32.xlu0 %v2703_v30, %s5619_s20 }
 0x3ff   :  { %v2593_v22 = vpop.f32.mrf.mxu2 }
 0x400   :  { %v2594_v26 = vadd.f32 %v2593_v22, %v2579_v60 }
 0x404   :  { %2699 = vrot.lane.b32.xlu1 %v2693_v27, %s5630_s16  ;;  %2164 = vrot.lane.b32.xlu2 %v2141_v59, %s5633_s0  ;;  %v2640_v57 = vpop.permute.xlu1 %2639 }
 0x406   :  { %2704 = vrot.lane.b32.xlu0 %v2693_v27, %s5629_s15 }
 0x407   :  { %v2595_v62 = vpop.f32.mrf.mxu2 }
 0x408   :  { %v2596_v2 = vadd.f32 %v2595_v62, %v2581_v38 }
 0x409   :  { %v2537_v44 = vpop.f32.mrf.mxu3 }
 0x40a   :  { %v2657_v58 = vpop.permute.xlu2 %2656  ;;  %v2552_v41 = vadd.f32 %v2551_v10, %v2537_v44  ;;  %v2647_v44 = vpop.permute.xlu0 %2646 }
 0x40c   :  { %2696 = vrot.lane.b32.xlu1 %v2693_v27, %s5624_s27  ;;  %2166 = vrot.lane.b32.xlu2 %v2149_v18, %s5633_s0  ;;  %v2566_v40 = vadd.f32 %v2565_v25, %v2552_v41  ;;  %v8140_v16 = vpop.permute.xlu1 %2637 }
 0x40e   :  { %2160 = vrot.lane.b32.xlu0 %v2137_v3, %s5633_s0 }
 0x411   :  { %v2539_v51 = vpop.f32.mrf.mxu3 }
 0x412   :  { %v2554_v13 = vadd.f32 %v2553_v31, %v2539_v51  ;;  %v2649_v15 = vpop.permute.xlu2 %2648  ;;  %v2633_v10 = vpop.permute.xlu0 %2632 }
 0x414   :  { %2735 = vrot.lane.b32.xlu1 %v2693_v27, %s5633_s0  ;;  %v2568_v48 = vadd.f32 %v2567_v53, %v2554_v13  ;;  %v2650_v53 = vsel %vm2061_vm15, %v2647_v44, %v2649_v15 }
 0x419   :  { %v2607_v36 = vpop.f32.mrf.mxu3 }
 0x41a   :  { %v2608_v28 = vadd.f32 %v2607_v36, %v2594_v26  ;;  %v8145_v25 = vpop.permute.xlu2 %2663  ;;  %v8159_v60 = vpop.permute.xlu0 %2627 }
 0x41c   :  { %2162 = vrot.lane.b32.xlu1 %v2139_v43, %s5633_s0  ;;  %v2616_v33 = vpack.c.bf16 %v2608_v28, %v2566_v40 }
 0x41e   :  { %v2713_v49 = vunpack.c.l.b16 %v2616_v33  ;;  %v2725_v29 = vunpack.c.h.b16 %v2616_v33 }
 0x421   :  { %v2609_v1 = vpop.f32.mrf.mxu3 }
 0x422   :  { %v2610_v37 = vadd.f32 %v2609_v1, %v2596_v2  ;;  %v2659_v59 = vpop.permute.xlu1 %2658  ;;  %v8150_v50 = vpop.permute.xlu2 %2661 }
 0x423   :  { %v2660_v51 = vsel %vm2072_vm13, %v2657_v58, %v2659_v59 }
 0x424   :  { %v2621_v21 = vpack.c.bf16 %v2610_v37, %v2568_v48 }
 0x426   :  { %v2714_v30 = vunpack.c.l.b16 %v2621_v21  ;;  %v2726_v32 = vunpack.c.h.b16 %v2621_v21 }
 0x428   :  { %v2715_v47 = vpack.c.b16 %v2714_v30, %v2713_v49  ;;  %v2727_v27 = vpack.c.b16 %v2726_v32, %v2725_v29 }
 0x42a   :  { %2730 = vrot.lane.b32.xlu1 %v2727_v27, %s5621_s25  ;;  %2728 = vrot.lane.b32.xlu2 %v2715_v47, %s5621_s25  ;;  %v2652_v43 = vpop.permute.xlu1 %2651  ;;  %s5647_s25 = smov 64  }
 0x42b   :  { %2733 = vrot.lane.b32.xlu0 %v2727_v27, %s5631_s17 }
 0x432   :  { %2721 = vrot.lane.b32.xlu1 %v2715_v47, %s5620_s24  ;;  %2723 = vrot.lane.b32.xlu2 %v2715_v47, %s5622_s26  ;;  %v2671_v3 = vpop.permute.xlu1 %2670  ;;  %s5646_s24 = smov 76   ;;  %s5648_s26 = smov 80  }
 0x433   :  { %2761 = vrot.lane.b32.xlu0 %v2640_v57, %s5634_s18 }
 0x439   :  { %v2695_v18 = vpop.permute.xlu2 %2694 }
 0x43a   :  { %2765 = vrot.lane.b32.xlu1 %v2652_v43, %s5634_s18  ;;  %2718 = vrot.lane.b32.xlu2 %v2715_v47, %s5619_s20  ;;  %v2073_v47 = vsel %vm2072_vm13, %v8095_v11, %v8066_v63  ;;  %s5645_s20 = smov 72  }
 0x43b   :  { %2763 = vrot.lane.b32.xlu0 %v2650_v53, %s5634_s18  ;;  %v2636_v53 = vsel %vm2046_vm2, %v2633_v10, %v8131_v35  ;;  %v2062_v35 = vsel %vm2061_vm15, %v8080_v20, %v8104_v56 }
 0x441   :  { %v2678_v22 = vpop.permute.xlu2 %2677 }
 0x442   :  { %2767 = vrot.lane.b32.xlu2 %v2660_v51, %s5634_s18  ;;  %2777 = vrot.lane.b32.xlu1 %v2678_v22, %s5634_s18 }
 0x450   :  { %v2688_v36 = vpop.permute.xlu0 %2687  ;;  %v2683_v31 = vpop.permute.xlu1 %2682 }
 0x451   :  { %2781 = vrot.lane.b32.xlu2 %v2688_v36, %s5634_s18 }
 0x456   :  { %v2707_v58 = vpop.permute.xlu2 %2706 }
 0x458   :  { %v2685_v26 = vpop.permute.xlu0 %2684 }
 0x459   :  { %v2686_v41 = vsel %vm2100_vm0, %v2683_v31, %v2685_v26 }
 0x45a   :  { %2779 = vrot.lane.b32.xlu1 %v2686_v41, %s5634_s18 }
 0x45e   :  { %v8167_v38 = vpop.permute.xlu2 %2164 }
 0x460   :  { %v2676_v62 = vpop.permute.xlu0 %2675 }
 0x461   :  { %2775 = vrot.lane.b32.xlu0 %v2676_v62, %s5634_s18 }
 0x466   :  { %v8171_v1 = vpop.permute.xlu2 %2166 }
 0x468   :  { %v2673_v57 = vpop.permute.xlu0 %2672 }
 0x469   :  { %v2674_v28 = vsel %vm2087_vm1, %v2671_v3, %v2673_v57 }
 0x46a   :  { %2773 = vrot.lane.b32.xlu2 %v2674_v28, %s5634_s18 }
 0x46e   :  { %v2710_v13 = vpop.permute.xlu1 %2709 }
 0x46f   :  { %2741 = vrot.lane.b32.xlu1 %v2710_v13, %s5633_s0 }
 0x470   :  { %v2717_v2 = vpop.permute.xlu0 %2716 }
 0x476   :  { %v2700_v40 = vpop.permute.xlu1 %2699 }
 0x477   :  { %2737 = vrot.lane.b32.xlu0 %v2700_v40, %s5633_s0 }
 0x478   :  { %v2705_v48 = vpop.permute.xlu0 %2704 }
 0x479   :  { %v2708_v37 = vsel %vm2046_vm2, %v2705_v48, %v2707_v58 }
 0x47a   :  { %2739 = vrot.lane.b32.xlu1 %v2708_v37, %s5633_s0 }
 0x47e   :  { %v2697_v33 = vpop.permute.xlu1 %2696 }
 0x47f   :  { %2158 = vrot.lane.b32.xlu0 %v8102_v5, %s5633_s0  ;;  %v2698_v15 = vsel %vm1565_vm11, %v2695_v18, %v2697_v33 }
 0x480   :  { %v8188_v32 = vpop.permute.xlu0 %2160 }
 0x482   :  { %2783 = vrot.lane.b32.xlu1 %v2698_v15, %s5634_s18  ;;  %v3038_v15 = vld [vmem:[%s9041_s7 + $0x8] sm:$0xff] }
 0x484   :  { %v2729_v21 = vpop.permute.xlu2 %2728 }
 0x486   :  { %v8180_v49 = vpop.permute.xlu1 %2735 }
 0x487   :  { %2042 = vrot.lane.b32.xlu0 %v7838_v39, %s5629_s15 }
 0x48c   :  { %v2724_v29 = vpop.permute.xlu2 %2723 }
 0x48d   :  { %2747 = vrot.lane.b32.xlu1 %v2724_v29, %s5633_s0 }
 0x48e   :  { %v8186_v5 = vpop.permute.xlu1 %2162 }
 0x48f   :  { %2074 = vrot.lane.b32.xlu0 %v7899_v54, %s5631_s17 }
 0x494   :  { %v2719_v30 = vpop.permute.xlu2 %2718 }
 0x495   :  { %2076 = vrot.lane.b32.xlu1 %v7899_v54, %s5632_s2  ;;  %s5637_s2 = smov 124  }
 0x49c   :  { %v2731_v27 = vpop.permute.xlu1 %2730  ;;  %v2768_v59 = vpop.permute.xlu2 %2767 }
 0x49d   :  { %v2734_v44 = vpop.permute.xlu0 %2733  ;;  %v2834_v43 = vsel %vm2803_vm3, %v2073_v47, %v2768_v59  ;;  %2757 = vrot.lane.b32.xlu1 %v2636_v53, %s5634_s18  ;;  %v2732_v22 = vsel %vm2072_vm13, %v2729_v21, %v2731_v27  ;;  %v5467_v53 = vld [vmem:[%s9042_s5 + $0x4] sm:$0xf] }
 0x49e   :  { %2957 = vmatpush.bf16.msrb.mxu1 %v2834_v43 }
 0x4a4   :  { %v2722_v18 = vpop.permute.xlu1 %2721 }
 0x4a5   :  { %v2762_v51 = vpop.permute.xlu0 %2761  ;;  %2745 = vrot.lane.b32.xlu2 %v2722_v18, %s5633_s0  ;;  %2769 = vrot.lane.b32.xlu1 %v8150_v50, %s5634_s18  ;;  %v5157_v18 = vld [vmem:[%s9042_s5 + $0x10] sm:$0xf0] }
 0x4a6   :  { %v2822_v50 = vsel %vm2803_vm3, %v8089_v19, %v2762_v51  ;;  %v2124_v19 = vsel %vm2046_vm2, %v8122_v46, %v8112_v55  ;;  %v5160_v51 = vor.u32 %v5467_v53, %v5157_v18 }
 0x4ac   :  { %v2766_v54 = vpop.permute.xlu1 %2765 }
 0x4ad   :  { %2751 = vrot.lane.b32.xlu2 %v2734_v44, %s5633_s0  ;;  %v2830_v63 = vsel %vm2803_vm3, %v8085_v8, %v2766_v54  ;;  %v2764_v11 = vpop.permute.xlu0 %2763  ;;  %v2720_v8 = vsel %vm2136_vm14, %v2717_v2, %v2719_v30 }
 0x4ae   :  { %2958 = vmatpush.bf16.msrb.mxu1 %v2830_v63  ;;  %v2826_v10 = vsel %vm2803_vm3, %v2062_v35, %v2764_v11  ;;  %v5155_v63 = vld [vmem:[%s9042_s5] sm:$0xf] }
 0x4b2   :  { %2959 = vmatpush.bf16.msrb.mxu1 %v2826_v10 }
 0x4b4   :  { %v2778_v20 = vpop.permute.xlu1 %2777 }
 0x4b5   :  { %2749 = vrot.lane.b32.xlu2 %v2732_v22, %s5633_s0  ;;  %v2854_v62 = vsel %vm2803_vm3, %v8087_v61, %v2778_v20  ;;  %v5173_v20 = vld [vmem:[%s9042_s5 + $0x30] sm:$0xf0] }
 0x4b6   :  { %2960 = vmatpush.bf16.msrb.mxu1 %v2822_v50 }
 0x4bd   :  { %2759 = vrot.lane.b32.xlu2 %v8140_v16, %s5634_s18  ;;  %v2782_v16 = vpop.permute.xlu2 %2781 }
 0x4be   :  { %v2862_v46 = vsel %vm2803_vm3, %v8074_v9, %v2782_v16 }
 0x4c5   :  { %2743 = vrot.lane.b32.xlu2 %v2720_v8, %s5633_s0  ;;  %v5471_v8 = vld [vmem:[%s9042_s5 + $0x24] sm:$0xf] }
 0x4cc   :  { %v2780_v56 = vpop.permute.xlu1 %2779 }
 0x4cd   :  { %2771 = vrot.lane.b32.xlu2 %v8145_v25, %s5634_s18  ;;  %v2774_v25 = vpop.permute.xlu2 %2773 }
 0x4d3   :  { %v2776_v58 = vpop.permute.xlu0 %2775 }
 0x4d4   :  { %v2850_v57 = vsel %vm2803_vm3, %v8097_v45, %v2776_v58  ;;  %v5163_v58 = vld [vmem:[%s9042_s5 + $0x8] sm:$0xf] }
 0x4d5   :  { %2044 = vrot.lane.b32.xlu2 %v7836_v34, %s5629_s15  ;;  %v2114_v34 = vsel %vm1565_vm11, %v8070_v14, %v8115_v7 }
 0x4dd   :  { %2156 = vrot.lane.b32.xlu2 %v2124_v19, %s5633_s0  ;;  %v5176_v19 = vor.u32 %v5471_v8, %v5173_v20  ;;  %v3039_v8 = vld [vmem:[%s9041_s7 + $0x10] sm:$0xff]  ;;  %v3040_v20 = vld [vmem:[%s9041_s7 + $0x18] sm:$0xff] }
 0x4e1   :  { %v2742_v3 = vpop.permute.xlu1 %2741 }
 0x4e2   :  { %2791 = vrot.lane.b32.xlu1 %v2742_v3, %s5634_s18 }
 0x4e9   :  { %v2738_v9 = vpop.permute.xlu0 %2737 }
 0x4ea   :  { %2755 = vrot.lane.b32.xlu1 %v8159_v60, %s5634_s18  ;;  %v2101_v60 = vsel %vm2100_vm0, %v8110_v4, %v8082_v0  ;;  %v2088_v4 = vsel %vm2087_vm1, %v8091_v6, %v8117_v52 }
 0x4eb   :  { %v2858_v14 = vsel %vm2803_vm3, %v2101_v60, %v2780_v56  ;;  %v2846_v13 = vsel %vm2803_vm3, %v2088_v4, %v2774_v25  ;;  %v5181_v4 = vld [vmem:[%s9042_s5 + $0x38] sm:$0xf0] }
 0x4ec   :  { %v2740_v36 = vpop.permute.xlu1 %2739 }
 0x4f1   :  { %v8253_v28 = vpop.permute.xlu0 %2158 }
 0x4f4   :  { %v2784_v31 = vpop.permute.xlu1 %2783 }
 0x4f5   :  { %v2866_v26 = vsel %vm2803_vm3, %v2114_v34, %v2784_v31  ;;  %v5468_v34 = vld [vmem:[%s9042_s5 + $0xc] sm:$0xf]  ;;  %v5165_v31 = vld [vmem:[%s9042_s5 + $0x18] sm:$0xf0] }
 0x4f6   :  { %2976 = vmatpush.bf16.msra.mxu3 %v2866_v26 }
 0x4fa   :  { %2977 = vmatpush.bf16.msra.mxu3 %v2862_v46 }
 0x4fe   :  { %2978 = vmatpush.bf16.msra.mxu3 %v2858_v14  ;;  %v5470_v14 = vld [vmem:[%s9042_s5 + $0x14] sm:$0xf0] }
 0x4ff   :  { %v2746_v55 = vpop.permute.xlu2 %2745  ;;  %v2748_v41 = vpop.permute.xlu1 %2747 }
 0x500   :  { %2795 = vrot.lane.b32.xlu2 %v2746_v55, %s5634_s18  ;;  %2797 = vrot.lane.b32.xlu0 %v2748_v41, %s5634_s18 }
 0x502   :  { %2979 = vmatpush.bf16.msra.mxu3 %v2854_v62 }
 0x506   :  { %2980 = vmatpush.bf16.msra.mxu3 %v2850_v57  ;;  %v5164_v57 = vor.u32 %v5470_v14, %v5163_v58 }
 0x507   :  { %v2752_v7 = vpop.permute.xlu2 %2751  ;;  %v2077_v61 = vpop.permute.xlu1 %2076 }
 0x508   :  { %2037 = vrot.lane.b32.xlu2 %v7838_v39, %s5630_s16 }
 0x50a   :  { %2981 = vmatpush.bf16.msra.mxu3 %v2846_v13 }
 0x50f   :  { %v2750_v0 = vpop.permute.xlu2 %2749  ;;  %v2758_v45 = vpop.permute.xlu1 %2757 }
 0x510   :  { %2168 = vrot.lane.b32.xlu2 %v8133_v23, %s5633_s0  ;;  %2799 = vrot.lane.b32.xlu0 %v2750_v0, %s5634_s18  ;;  %v2043_v23 = vpop.permute.xlu0 %2042  ;;  %v5472_v0 = vld [vmem:[%s9042_s5 + $0x2c] sm:$0xf] }
 0x511   :  { %v5184_v13 = vor.u32 %v5472_v0, %v5181_v4 }
 0x517   :  { %v2760_v2 = vpop.permute.xlu2 %2759  ;;  %v2770_v48 = vpop.permute.xlu1 %2769 }
 0x518   :  { %2753 = vrot.lane.b32.xlu2 %v8059_v42, %s5634_s18  ;;  %2789 = vrot.lane.b32.xlu0 %v2740_v36, %s5634_s18  ;;  %v2818_v6 = vsel %vm2803_vm3, %v8061_v24, %v2760_v2  ;;  %v2075_v33 = vpop.permute.xlu0 %2074 }
 0x519   :  { %2961 = vmatpush.bf16.msrb.mxu1 %v2818_v6  ;;  %v2838_v24 = vsel %vm2803_vm3, %v2075_v33, %v2770_v48 }
 0x51f   :  { %v2744_v52 = vpop.permute.xlu2 %2743 }
 0x520   :  { %2793 = vrot.lane.b32.xlu1 %v2744_v52, %s5634_s18  ;;  %2154 = vrot.lane.b32.xlu0 %v8106_v12, %s5633_s0 }
 0x527   :  { %v2772_v40 = vpop.permute.xlu2 %2771 }
 0x528   :  { %2787 = vrot.lane.b32.xlu1 %v2738_v9, %s5634_s18  ;;  %2801 = vrot.lane.b32.xlu0 %v2752_v7, %s5634_s18  ;;  %v2842_v42 = vsel %vm2803_vm3, %v2077_v61, %v2772_v40  ;;  %v5179_v61 = vld [vmem:[%s9042_s5 + $0x28] sm:$0xf] }
 0x529   :  { %2982 = vmatpush.bf16.msra.mxu3 %v2842_v42 }
 0x52d   :  { %2983 = vmatpush.bf16.msra.mxu3 %v2838_v24 }
 0x52f   :  { %v2045_v37 = vpop.permute.xlu2 %2044 }
 0x530   :  { %v2047_v21 = vsel %vm2046_vm2, %v2043_v23, %v2045_v37  ;;  %2152 = vrot.lane.b32.xlu1 %v8002_v17, %s5633_s0  ;;  %2785 = vrot.lane.b32.xlu0 %v8180_v49, %s5634_s18  ;;  %s5638_s18 = smov 108   ;;  %vm3601_vm2 = vcmask 31744  }
 0x531   :  { %v2814_v12 = vsel %vm2803_vm3, %v2047_v21, %v2758_v45  ;;  %2984 = vmatmul.bf16.vlgmr.msra.gmra.mxu3 %v5160_v51 }
 0x532   :  { %2962 = vmatpush.bf16.msrb.mxu1 %v2814_v12 }
 0x537   :  { %v2157_v29 = vpop.permute.xlu2 %2156 }
 0x538   :  { %3161 = vperm.xlu0 %5533, %v3038_v15  }
 0x541   :  { %2989 = vmatmul.bf16.gmra.mxu3 %v5176_v19 }
 0x554   :  { %v2792_v30 = vpop.permute.xlu1 %2791 }
 0x55a   :  { %v2796_v47 = vpop.permute.xlu2 %2795 }
 0x55b   :  { %v2890_v56 = vsel %vm2803_vm3, %v8186_v5, %v2796_v47  ;;  %v2882_v5 = vsel %vm2803_vm3, %v8253_v28, %v2792_v30  ;;  %v5474_v28 = vld [vmem:[%s9042_s5 + $0x34] sm:$0xf0] }
 0x55c   :  { %v2756_v27 = vpop.permute.xlu1 %2755  ;;  %v5180_v2 = vor.u32 %v5474_v28, %v5179_v61 }
 0x562   :  { %v2038_v59 = vpop.permute.xlu2 %2037 }
 0x563   :  { %v2810_v44 = vsel %vm2803_vm3, %v2038_v59, %v2756_v27 }
 0x564   :  { %2963 = vmatpush.bf16.msrb.mxu1 %v2810_v44 }
 0x56a   :  { %v2169_v17 = vpop.permute.xlu2 %2168 }
 0x572   :  { %v2754_v43 = vpop.permute.xlu2 %2753  ;;  %v2798_v54 = vpop.permute.xlu0 %2797 }
 0x573   :  { %v2806_v49 = vsel %vm2803_vm3, %v7838_v39, %v2754_v43  ;;  %v5469_v39 = vld [vmem:[%s9042_s5 + $0xc] sm:$0xf0]  ;;  %v2894_v22 = vsel %vm2803_vm3, %v8167_v38, %v2798_v54  ;;  %v5171_v38 = vld [vmem:[%s9042_s5 + $0x20] sm:$0xf] }
 0x574   :  { %2964 = vmatpush.bf16.msrb.mxu1 %v2806_v49  ;;  %v5156_v11 = vor.u32 %v5469_v39, %v5155_v63 }
 0x577   :  { %2965 = vmatmul.bf16.vlgmr.msrb.gmra.mxu1 %v5156_v11 }
 0x582   :  { %v2800_v35 = vpop.permute.xlu0 %2799 }
 0x583   :  { %v2898_v10 = vsel %vm2803_vm3, %v8171_v1, %v2800_v35  ;;  %v5473_v1 = vld [vmem:[%s9042_s5 + $0x2c] sm:$0xf0] }
 0x584   :  { %2995 = vmatpush.bf16.msra.mxu0 %v2898_v10  ;;  %v5172_v3 = vor.u32 %v5473_v1, %v5171_v38 }
 0x587   :  { %2970 = vmatmul.bf16.gmra.mxu1 %v5172_v3 }
 0x588   :  { %2996 = vmatpush.bf16.msra.mxu0 %v2894_v22 }
 0x58a   :  { %v2790_v50 = vpop.permute.xlu0 %2789 }
 0x58b   :  { %v2878_v60 = vsel %vm2803_vm3, %v2157_v29, %v2790_v50  ;;  %v3037_v50 = vld [vmem:[%s9041_s7] sm:$0xff]  ;;  %s5642_s7 = smov 92  }
 0x58c   :  { %2997 = vmatpush.bf16.msra.mxu0 %v2890_v56 }
 0x592   :  { %v2794_v16 = vpop.permute.xlu1 %2793  ;;  %v2155_v36 = vpop.permute.xlu0 %2154 }
 0x593   :  { %v2886_v25 = vsel %vm2803_vm3, %v8188_v32, %v2794_v16  ;;  %v5168_v32 = vor.u32 %v5468_v34, %v5165_v31 }
 0x594   :  { %2998 = vmatpush.bf16.msra.mxu0 %v2886_v25 }
 0x598   :  { %2999 = vmatpush.bf16.msra.mxu0 %v2882_v5 }
 0x59a   :  { %v2788_v26 = vpop.permute.xlu1 %2787  ;;  %v2802_v55 = vpop.permute.xlu0 %2801 }
 0x59b   :  { %v2902_v46 = vsel %vm2803_vm3, %v2169_v17, %v2802_v55  ;;  %v2874_v41 = vsel %vm2803_vm3, %v2155_v36, %v2788_v26 }
 0x59c   :  { %3000 = vmatpush.bf16.msra.mxu0 %v2878_v60  ;;  %3021 = vmatpush.bf16.msra.mxu2 %v2902_v46 }
 0x59f   :  { %5185 = vmatmul.msk.bf16.vlgmr.msra.gmra.mxu2 %vm2950_vm4, %v5168_v32 }
 0x5a0   :  { %3001 = vmatpush.bf16.msra.mxu0 %v2874_v41 }
 0x5a2   :  { %v2153_v7 = vpop.permute.xlu1 %2152  ;;  %v2786_v62 = vpop.permute.xlu0 %2785 }
 0x5a3   :  { %v2870_v9 = vsel %vm2803_vm3, %v2153_v7, %v2786_v62 }
 0x5a4   :  { %3002 = vmatpush.bf16.msra.mxu0 %v2870_v9 }
 0x5a7   :  { %3003 = vmatmul.bf16.vlgmr.msra.gmra.mxu0 %v5164_v57 }
 0x5aa   :  { %v8359_v16 = vpop.permute.xlu0 %3161 }
 0x5af   :  { %5186 = vmatmul.msk.bf16.gmra.mxu2 %vm2950_vm4, %v5184_v13  ;;  %vm4036_vm4 = vcmask 64512  }
 0x5b4   :  { %v2985_v45 = vpop.f32.mrf.mxu3 }
 0x5b7   :  { %3008 = vmatmul.bf16.gmra.mxu0 %v5180_v2 }
 0x5bc   :  { %v2987_v42 = vpop.f32.mrf.mxu3 }
 0x5c4   :  { %v2990_v30 = vpop.f32.mrf.mxu3 }
 0x5cc   :  { %v2992_v18 = vpop.f32.mrf.mxu3 }
 0x5f4   :  { %v2966_v6 = vpop.f32.mrf.mxu1 }
 0x5f5   :  { %v2986_v52 = vadd.f32 %v2985_v45, %v2966_v6 }
 0x5fc   :  { %v2968_v40 = vpop.f32.mrf.mxu1 }
 0x5fd   :  { %v2988_v12 = vadd.f32 %v2987_v42, %v2968_v40 }
 0x604   :  { %v2971_v15 = vpop.f32.mrf.mxu1 }
 0x605   :  { %v2991_v59 = vadd.f32 %v2990_v30, %v2971_v15 }
 0x60c   :  { %v2973_v53 = vpop.f32.mrf.mxu1 }
 0x60d   :  { %v2993_v54 = vadd.f32 %v2992_v18, %v2973_v53  ;;  %v3034_v18 = vld [vmem:[%s9043_s6 + $0x8] sm:$0xff] }
 0x622   :  { %v3023_v23 = vpop.f32.mrf.mxu2 }
 0x624   :  { %v3004_v48 = vpop.f32.mrf.mxu0 }
 0x625   :  { %v3005_v33 = vadd.f32 %v3004_v48, %v2986_v52 }
 0x627   :  { %v3024_v24 = vadd.f32 %v3023_v23, %v3005_v33 }
 0x629   :  { %v3042_v37 = vsel %vm3041_vm5, %v3024_v24, 0.0 }
 0x62a   :  { %v3025_v21 = vpop.f32.mrf.mxu2  ;;  %3043 = vadd.xlane.f32.xlu2 %v3042_v37 }
 0x62c   :  { %v3006_v29 = vpop.f32.mrf.mxu0 }
 0x62d   :  { %v3007_v47 = vadd.f32 %v3006_v29, %v2988_v12  ;;  %v3033_v12 = vld [vmem:[%s9043_s6] sm:$0xff] }
 0x62f   :  { %v3026_v27 = vadd.f32 %v3025_v21, %v3007_v47 }
 0x631   :  { %v3045_v44 = vsel %vm3041_vm5, %v3026_v27, 0.0 }
 0x632   :  { %3046 = vadd.xlane.f32.xlu1 %v3045_v44  ;;  %v3028_v17 = vpop.f32.mrf.mxu2 }
 0x634   :  { %v3009_v43 = vpop.f32.mrf.mxu0 }
 0x635   :  { %v3010_v49 = vadd.f32 %v3009_v43, %v2991_v59 }
 0x637   :  { %v3029_v51 = vadd.f32 %v3028_v17, %v3010_v49 }
 0x639   :  { %v3048_v63 = vsel %vm3041_vm5, %v3029_v51, 0.0 }
 0x63a   :  { %3049 = vadd.xlane.f32.xlu0 %v3048_v63  ;;  %v3030_v11 = vpop.f32.mrf.mxu2 }
 0x63c   :  { %v3011_v39 = vpop.f32.mrf.mxu0 }
 0x63d   :  { %v3012_v35 = vadd.f32 %v3011_v39, %v2993_v54 }
 0x63f   :  { %v3031_v10 = vadd.f32 %v3030_v11, %v3012_v35 }
 0x641   :  { %v3051_v22 = vsel %vm3041_vm5, %v3031_v10, 0.0 }
 0x642   :  { %3052 = vadd.xlane.f32.xlu2 %v3051_v22 }
 0x64b   :  { %3156 = vperm.xlu1 %5534, %v3037_v50   ;;  %v3035_v50 = vld [vmem:[%s9043_s6 + $0x10] sm:$0xff] }
 0x64e   :  { %3166 = vperm.xlu0 %5533, %v3039_v8  }
 0x65a   :  { %3171 = vperm.xlu2 %5532, %v3040_v20  }
 0x69d   :  { %v3044_v56 = vpop.xlane.xlu2 %3043 }
 0x69e   :  { %v3054_v19 = vmul.f32 0.010204081, %v3044_v56 }
 0x6a0   :  { %v8354_v38 = vsub.f32 %v3024_v24, %v3054_v19 }
 0x6a2   :  { %v3062_v1 = vmul.f32 %v8354_v38, %v8354_v38 }
 0x6a4   :  { %v3066_v3 = vsel %vm3041_vm5, %v3062_v1, 0.0 }
 0x6a5   :  { %v3047_v36 = vpop.xlane.xlu1 %3046  ;;  %3067 = vadd.xlane.f32.xlu1 %v3066_v3 }
 0x6a6   :  { %v3055_v25 = vmul.f32 0.010204081, %v3047_v36  ;;  %v3036_v36 = vld [vmem:[%s9043_s6 + $0x18] sm:$0xff] }
 0x6a8   :  { %v8361_v5 = vsub.f32 %v3026_v27, %v3055_v25 }
 0x6aa   :  { %v3063_v34 = vmul.f32 %v8361_v5, %v8361_v5 }
 0x6ac   :  { %v3069_v31 = vsel %vm3041_vm5, %v3063_v34, 0.0 }
 0x6ad   :  { %3070 = vadd.xlane.f32.xlu2 %v3069_v31  ;;  %v3050_v26 = vpop.xlane.xlu0 %3049 }
 0x6ae   :  { %v3056_v55 = vmul.f32 0.010204081, %v3050_v26  ;;  %v3192_v26 = vld [vmem:[%s9044_s8 + $0x18] sm:$0x1] }
 0x6b0   :  { %v8366_v46 = vsub.f32 %v3029_v51, %v3056_v55  ;;  %v3216_v55 = vunpack.c.l.b16 %v3192_v26 }
 0x6b2   :  { %v3064_v60 = vmul.f32 %v8366_v46, %v8366_v46 }
 0x6b4   :  { %v3072_v32 = vsel %vm3041_vm5, %v3064_v60, 0.0  ;;  %v3220_v60 = vpack.c.b16 %v3216_v55, %v3216_v55 }
 0x6b5   :  { %v3053_v41 = vpop.xlane.xlu2 %3052  ;;  %3073 = vadd.xlane.f32.xlu0 %v3072_v32  ;;  %v9433_v32 = vld [vmem:[#allocation5_spill] sm:$0xff] }
 0x6b6   :  { %v3057_v58 = vmul.f32 0.010204081, %v3053_v41  ;;  %v3231_v41 = vand.u32 %v3220_v60, %v9433_v32 }
 0x6b8   :  { %v8371_v14 = vsub.f32 %v3031_v10, %v3057_v58  ;;  %3237 = vmatpush.bf16.msra.mxu1 %v3231_v41  ;;  %3376 = vmatpush.bf16.msrb.mxu2 %v3231_v41  ;;  %v5477_v58 = vld [vmem:[%s9044_s8 + $0x10] sm:$0xff] }
 0x6ba   :  { %v3065_v7 = vmul.f32 %v8371_v14, %v8371_v14 }
 0x6bc   :  { %v3075_v62 = vsel %vm3041_vm5, %v3065_v7, 0.0  ;;  %3238 = vmatpush.bf16.msra.mxu1 %v5477_v58  ;;  %3377 = vmatpush.bf16.msrb.mxu2 %v5477_v58  ;;  %v5476_v7 = vld [vmem:[%s9044_s8 + $0x8] sm:$0xff] }
 0x6bd   :  { %3076 = vadd.xlane.f32.xlu1 %v3075_v62  ;;  %v8376_v9 = vpop.permute.xlu1 %3156  ;;  %v8378_v57 = vpop.permute.xlu2 %3171  ;;  %v5475_v62 = vld [vmem:[%s9044_s8] sm:$0xff]  ;;  %s5635_s8 = smov 100  }
 0x6c0   :  { %v8380_v61 = vpop.permute.xlu0 %3166  ;;  %3239 = vmatpush.bf16.msra.mxu1 %v5476_v7  ;;  %3378 = vmatpush.bf16.msrb.mxu2 %v5476_v7 }
 0x6c4   :  { %3240 = vmatpush.bf16.msra.mxu1 %v5475_v62  ;;  %3379 = vmatpush.bf16.msrb.mxu2 %v5475_v62 }
 0x718   :  { %v3068_v0 = vpop.xlane.xlu1 %3067 }
 0x719   :  { %v3078_v4 = vmul.f32 0.010204081, %v3068_v0 }
 0x71b   :  { %v3082_v13 = vadd.f32 1e-05, %v3078_v4 }
 0x71d   :  { %5599 = vrsqrt.f32 %v3082_v13  ;;  %vm3092_vm7 = vweird.f32 %v3082_v13 }
 0x720   :  { %v3071_v28 = vpop.xlane.xlu2 %3070 }
 0x721   :  { %v3079_v2 = vmul.f32 0.010204081, %v3071_v28 }
 0x723   :  { %v5600_v6 = vpop.eup %5599  ;;  %v3083_v45 = vadd.f32 1e-05, %v3079_v2 }
 0x724   :  { %v3087_v52 = vmul.f32 %v5600_v6, %v3082_v13  ;;  %vm3093_vm6 = vweird.f32 %v5600_v6 }
 0x725   :  { %5601 = vrsqrt.f32 %v3083_v45  ;;  %vm3094_vm8 = vmor %vm3092_vm7, %vm3093_vm6  ;;  %vm3102_vm10 = vweird.f32 %v3083_v45 }
 0x726   :  { %v3088_v23 = vmul.f32 %v5600_v6, %v3087_v52 }
 0x728   :  { %v3089_v40 = vmul.f32 0.5, %v3088_v23  ;;  %v3074_v42 = vpop.xlane.xlu0 %3073 }
 0x729   :  { %v3080_v48 = vmul.f32 0.010204081, %v3074_v42 }
 0x72a   :  { %v3090_v33 = vsub.f32 1.5, %v3089_v40 }
 0x72b   :  { %v5602_v24 = vpop.eup %5601  ;;  %v3084_v37 = vadd.f32 1e-05, %v3080_v48 }
 0x72c   :  { %v3097_v21 = vmul.f32 %v5602_v24, %v3083_v45  ;;  %v3091_v15 = vmul.f32 %v5600_v6, %v3090_v33  ;;  %vm3103_vm9 = vweird.f32 %v5602_v24 }
 0x72d   :  { %5603 = vrsqrt.f32 %v3084_v37  ;;  %vm3104_vm11 = vmor %vm3102_vm10, %vm3103_vm9  ;;  %vm3112_vm13 = vweird.f32 %v3084_v37 }
 0x72e   :  { %v3098_v29 = vmul.f32 %v5602_v24, %v3097_v21  ;;  %v3095_v30 = vsel %vm3094_vm8, %v5600_v6, %v3091_v15 }
 0x72f   :  { %v3126_v47 = vmul.f32 %v3095_v30, %v3033_v12 }
 0x730   :  { %v3099_v27 = vmul.f32 0.5, %v3098_v29  ;;  %v3077_v59 = vpop.xlane.xlu1 %3076 }
 0x731   :  { %v3081_v44 = vmul.f32 0.010204081, %v3077_v59  ;;  %3132 = vperm.xlu2 %5532, %v3126_v47  }
 0x732   :  { %v3100_v17 = vsub.f32 1.5, %v3099_v27 }
 0x733   :  { %v5604_v43 = vpop.eup %5603  ;;  %v3085_v49 = vadd.f32 1e-05, %v3081_v44 }
 0x734   :  { %v3107_v53 = vmul.f32 %v5604_v43, %v3084_v37  ;;  %v3101_v51 = vmul.f32 %v5602_v24, %v3100_v17  ;;  %vm3113_vm12 = vweird.f32 %v5604_v43 }
 0x735   :  { %5605 = vrsqrt.f32 %v3085_v49  ;;  %vm3114_vm14 = vmor %vm3112_vm13, %vm3113_vm12  ;;  %vm3122_vm0 = vweird.f32 %v3085_v49 }
 0x736   :  { %v3108_v54 = vmul.f32 %v5604_v43, %v3107_v53  ;;  %v3105_v63 = vsel %vm3104_vm11, %v5602_v24, %v3101_v51 }
 0x737   :  { %v3127_v39 = vmul.f32 %v3105_v63, %v3034_v18 }
 0x738   :  { %v3109_v11 = vmul.f32 0.5, %v3108_v54 }
 0x739   :  { %3137 = vperm.xlu0 %5533, %v3127_v39  }
 0x73a   :  { %v3110_v35 = vsub.f32 1.5, %v3109_v11 }
 0x73b   :  { %v5606_v10 = vpop.eup %5605 }
 0x73c   :  { %v3117_v22 = vmul.f32 %v5606_v10, %v3085_v49  ;;  %v3111_v8 = vmul.f32 %v5604_v43, %v3110_v35  ;;  %vm3123_vm15 = vweird.f32 %v5606_v10 }
 0x73d   :  { %vm3124_vm1 = vmor %vm3122_vm0, %vm3123_vm15 }
 0x73e   :  { %v3118_v20 = vmul.f32 %v5606_v10, %v3117_v22  ;;  %v3115_v56 = vsel %vm3114_vm14, %v5604_v43, %v3111_v8 }
 0x73f   :  { %v3128_v19 = vmul.f32 %v3115_v56, %v3035_v50 }
 0x740   :  { %v3119_v1 = vmul.f32 0.5, %v3118_v20 }
 0x741   :  { %3142 = vperm.xlu2 %5532, %v3128_v19  }
 0x742   :  { %v3120_v3 = vsub.f32 1.5, %v3119_v1 }
 0x744   :  { %v3121_v25 = vmul.f32 %v5606_v10, %v3120_v3 }
 0x746   :  { %v3125_v34 = vsel %vm3124_vm1, %v5606_v10, %v3121_v25  ;;  %vm4193_vm1 = vcmask 7168  }
 0x747   :  { %v3129_v31 = vmul.f32 %v3125_v34, %v3036_v36 }
 0x749   :  { %3147 = vperm.xlu1 %5534, %v3129_v31  }
 0x78b   :  { %v3133_v0 = vpop.permute.xlu2 %3132 }
 0x78c   :  { %v3150_v4 = vmul.f32 %v3133_v0, %v8354_v38 }
 0x78e   :  { %v3174_v13 = vadd.f32 %v8376_v9, %v3150_v4 }
 0x790   :  { %v3178_v2 = vmax.f32 %v3174_v13, 0.0 }
 0x792   :  { %v3182_v52 = vpack.c.bf16 %v3178_v2, %v3178_v2 }
 0x794   :  { %v3197_v48 = vunpack.c.l.b16 %v3182_v52 }
 0x79b   :  { %v3143_v40 = vpop.permute.xlu2 %3142 }
 0x79c   :  { %v3152_v33 = vmul.f32 %v3143_v40, %v8366_v46 }
 0x79e   :  { %v3176_v21 = vadd.f32 %v8380_v61, %v3152_v33 }
 0x7a0   :  { %v3180_v9 = vmax.f32 %v3176_v21, 0.0 }
 0x7a2   :  { %v3184_v12 = vpack.c.bf16 %v3180_v9, %v3180_v9 }
 0x7a4   :  { %v3199_v30 = vunpack.c.l.b16 %v3184_v12 }
 0x7ab   :  { %v3138_v28 = vpop.permute.xlu0 %3137 }
 0x7ac   :  { %v3151_v6 = vmul.f32 %v3138_v28, %v8361_v5 }
 0x7ae   :  { %v3175_v45 = vadd.f32 %v8359_v16, %v3151_v6 }
 0x7b0   :  { %v3179_v23 = vmax.f32 %v3175_v45, 0.0 }
 0x7b2   :  { %v3183_v42 = vpack.c.bf16 %v3179_v23, %v3179_v23 }
 0x7b4   :  { %v3198_v24 = vunpack.c.l.b16 %v3183_v42 }
 0x7b6   :  { %v3201_v37 = vpack.c.b16 %v3198_v24, %v3197_v48 }
 0x7b8   :  { %3362 = vrot.lane.b32.xlu1 %v3201_v37, %s5630_s16  ;;  %5199 = vmatmul.msk.bf16.vlgmr.msra.gmra.mxu1 %vm2803_vm3, %v3201_v37 }
 0x7bb   :  { %v3148_v38 = vpop.permute.xlu1 %3147 }
 0x7bc   :  { %v3153_v5 = vmul.f32 %v3148_v38, %v8371_v14 }
 0x7be   :  { %v3177_v16 = vadd.f32 %v8378_v57, %v3153_v5 }
 0x7c0   :  { %v3181_v15 = vmax.f32 %v3177_v16, 0.0 }
 0x7c2   :  { %v3185_v29 = vpack.c.bf16 %v3181_v15, %v3181_v15 }
 0x7c4   :  { %v3200_v47 = vunpack.c.l.b16 %v3185_v29 }
 0x7c6   :  { %v3202_v46 = vpack.c.b16 %v3200_v47, %v3199_v30 }
 0x7c8   :  { %3364 = vrot.lane.b32.xlu0 %v3202_v46, %s5630_s16  ;;  %5200 = vmatmul.msk.bf16.gmra.mxu1 %vm2803_vm3, %v3202_v46  ;;  %s5636_s16 = smov 116  }
 0x82a   :  { %v3363_v61 = vpop.permute.xlu1 %3362 }
 0x82b   :  { %5201 = vmatmul.msk.bf16.vlgmr.msrb.gmra.mxu2 %vm2803_vm3, %v3363_v61 }
 0x835   :  { %v3242_v27 = vpop.f32.mrf.mxu1 }
 0x836   :  { %v3252_v14 = vpack.c.bf16 %v3242_v27, %v3242_v27 }
 0x838   :  { %v3260_v17 = vunpack.c.l.b16 %v3252_v14 }
 0x83a   :  { %v3365_v59 = vpop.permute.xlu0 %3364 }
 0x83b   :  { %5202 = vmatmul.msk.bf16.gmra.mxu2 %vm2803_vm3, %v3365_v59  ;;  %vm3888_vm3 = vcmask 261120  }
 0x83d   :  { %v3244_v44 = vpop.f32.mrf.mxu1 }
 0x83e   :  { %v3253_v57 = vpack.c.bf16 %v3244_v44, %v3244_v44 }
 0x840   :  { %v3261_v43 = vunpack.c.l.b16 %v3253_v57 }
 0x842   :  { %v8421_v49 = vpack.c.b16 %v3261_v43, %v3260_v17 }
 0x844   :  { %3290 = vrot.lane.b32.xlu1 %v8421_v49, %s5635_s8  ;;  %3270 = vrot.lane.b32.xlu2 %v8421_v49, %s5631_s17 }
 0x845   :  { %3274 = vrot.lane.b32.xlu0 %v8421_v49, %s5636_s16  ;;  %v3247_v53 = vpop.f32.mrf.mxu1 }
 0x846   :  { %v3254_v18 = vpack.c.bf16 %v3247_v53, %v3247_v53 }
 0x848   :  { %v3262_v63 = vunpack.c.l.b16 %v3254_v18 }
 0x84c   :  { %3266 = vrot.lane.b32.xlu1 %v8421_v49, %s5637_s2  ;;  %3282 = vrot.lane.b32.xlu2 %v8421_v49, %s5638_s18 }
 0x84d   :  { %3286 = vrot.lane.b32.xlu0 %v8421_v49, %s5639_s19  ;;  %v3249_v51 = vpop.f32.mrf.mxu1 }
 0x84e   :  { %v3255_v54 = vpack.c.bf16 %v3249_v51, %v3249_v51 }
 0x850   :  { %v3263_v39 = vunpack.c.l.b16 %v3255_v54 }
 0x852   :  { %v8435_v11 = vpack.c.b16 %v3263_v39, %v3262_v63 }
 0x854   :  { %3302 = vrot.lane.b32.xlu2 %v8421_v49, %s5640_s21  ;;  %3292 = vrot.lane.b32.xlu1 %v8435_v11, %s5635_s8 }
 0x855   :  { %3306 = vrot.lane.b32.xlu0 %v8421_v49, %s5641_s22 }
 0x85c   :  { %3278 = vrot.lane.b32.xlu2 %v8421_v49, %s5633_s0  ;;  %3268 = vrot.lane.b32.xlu1 %v8435_v11, %s5637_s2 }
 0x85d   :  { %3298 = vrot.lane.b32.xlu0 %v8421_v49, %s5642_s7 }
 0x864   :  { %3294 = vrot.lane.b32.xlu2 %v8421_v49, %s5643_s23  ;;  %3284 = vrot.lane.b32.xlu1 %v8435_v11, %s5638_s18 }
 0x865   :  { %3322 = vrot.lane.b32.xlu0 %v8421_v49, %s5644_s4 }
 0x86c   :  { %3318 = vrot.lane.b32.xlu2 %v8421_v49, %s5645_s20  ;;  %3304 = vrot.lane.b32.xlu1 %v8435_v11, %s5640_s21 }
 0x86d   :  { %3276 = vrot.lane.b32.xlu0 %v8435_v11, %s5636_s16 }
 0x874   :  { %3314 = vrot.lane.b32.xlu2 %v8421_v49, %s5646_s24  ;;  %3280 = vrot.lane.b32.xlu1 %v8435_v11, %s5633_s0 }
 0x875   :  { %3288 = vrot.lane.b32.xlu0 %v8435_v11, %s5639_s19 }
 0x87c   :  { %3272 = vrot.lane.b32.xlu2 %v8435_v11, %s5631_s17 }
 0x87d   :  { %3308 = vrot.lane.b32.xlu0 %v8435_v11, %s5641_s22 }
 0x884   :  { %3300 = vrot.lane.b32.xlu2 %v8435_v11, %s5642_s7 }
 0x885   :  { %3296 = vrot.lane.b32.xlu0 %v8435_v11, %s5643_s23 }
 0x88c   :  { %3324 = vrot.lane.b32.xlu2 %v8435_v11, %s5644_s4 }
 0x88d   :  { %3320 = vrot.lane.b32.xlu0 %v8435_v11, %s5645_s20 }
 0x894   :  { %3316 = vrot.lane.b32.xlu2 %v8435_v11, %s5646_s24 }
 0x895   :  { %3328 = vrot.lane.b32.xlu0 %v8435_v11, %s5647_s25 }
 0x89c   :  { %3312 = vrot.lane.b32.xlu2 %v8435_v11, %s5648_s26 }
 0x89e   :  { %v8485_v35 = vpop.permute.xlu2 %3270 }
 0x8a6   :  { %v8487_v10 = vpop.permute.xlu2 %3282 }
 0x8ae   :  { %v3381_v22 = vpop.f32.mrf.mxu2  ;;  %v8489_v50 = vpop.permute.xlu2 %3302 }
 0x8af   :  { %v3391_v8 = vpack.c.bf16 %v3381_v22, %v3381_v22 }
 0x8b1   :  { %v3399_v3 = vunpack.c.l.b16 %v3391_v8 }
 0x8b6   :  { %v3383_v20 = vpop.f32.mrf.mxu2  ;;  %v8491_v56 = vpop.permute.xlu1 %3290 }
 0x8b7   :  { %v3392_v19 = vpack.c.bf16 %v3383_v20, %v3383_v20  ;;  %v8493_v1 = vpop.permute.xlu0 %3274  ;;  %3354 = vrot.lane.b32.xlu2 %v8491_v56, %s5647_s25  ;;  %v8499_v25 = vpop.permute.xlu2 %3278 }
 0x8b8   :  { %3338 = vrot.lane.b32.xlu0 %v8493_v1, %s5647_s25 }
 0x8b9   :  { %v3400_v36 = vunpack.c.l.b16 %v3392_v19 }
 0x8bb   :  { %v3403_v34 = vpack.c.b16 %v3400_v36, %v3399_v3 }
 0x8bd   :  { %3413 = vrot.lane.b32.xlu1 %v3403_v34, %s5636_s16 }
 0x8be   :  { %v8511_v55 = vpop.permute.xlu1 %3266  ;;  %v3386_v4 = vpop.f32.mrf.mxu2 }
 0x8bf   :  { %v8502_v31 = vpop.permute.xlu0 %3286  ;;  %v8508_v26 = vpop.permute.xlu2 %3294  ;;  %v3393_v40 = vpack.c.bf16 %v3386_v4, %v3386_v4 }
 0x8c0   :  { %3334 = vrot.lane.b32.xlu0 %v8485_v35, %s5647_s25  ;;  %3350 = vrot.lane.b32.xlu2 %v8502_v31, %s5647_s25 }
 0x8c1   :  { %v3401_v48 = vunpack.c.l.b16 %v3393_v40 }
 0x8c5   :  { %3409 = vrot.lane.b32.xlu1 %v3403_v34, %s5631_s17 }
 0x8c6   :  { %v8532_v62 = vpop.permute.xlu1 %3292  ;;  %v3388_v6 = vpop.f32.mrf.mxu2 }
 0x8c7   :  { %v8513_v60 = vpop.permute.xlu0 %3306  ;;  %v8518_v32 = vpop.permute.xlu2 %3318  ;;  %v3394_v52 = vpack.c.bf16 %v3388_v6, %v3388_v6 }
 0x8c8   :  { %3330 = vrot.lane.b32.xlu0 %v8511_v55, %s5647_s25  ;;  %3405 = vrot.lane.b32.xlu2 %v3403_v34, %s5637_s2 }
 0x8c9   :  { %v3402_v42 = vunpack.c.l.b16 %v3394_v52 }
 0x8cb   :  { %v3404_v24 = vpack.c.b16 %v3402_v42, %v3401_v48 }
 0x8cd   :  { %3425 = vrot.lane.b32.xlu1 %v3403_v34, %s5639_s19 }
 0x8ce   :  { %v8542_v28 = vpop.permute.xlu1 %3268 }
 0x8cf   :  { %v8521_v41 = vpop.permute.xlu0 %3298  ;;  %v8526_v58 = vpop.permute.xlu2 %3314 }
 0x8d0   :  { %3429 = vrot.lane.b32.xlu0 %v3403_v34, %s5635_s8  ;;  %3441 = vrot.lane.b32.xlu2 %v3403_v34, %s5640_s21 }
 0x8d5   :  { %3417 = vrot.lane.b32.xlu1 %v3403_v34, %s5633_s0 }
 0x8d6   :  { %v8553_v23 = vpop.permute.xlu1 %3284 }
 0x8d7   :  { %v8528_v7 = vpop.permute.xlu0 %3322  ;;  %v8540_v13 = vpop.permute.xlu2 %3272 }
 0x8d8   :  { %3445 = vrot.lane.b32.xlu0 %v3403_v34, %s5641_s22  ;;  %3449 = vrot.lane.b32.xlu2 %v3403_v34, %s5648_s26 }
 0x8dd   :  { %3433 = vrot.lane.b32.xlu1 %v3403_v34, %s5643_s23 }
 0x8de   :  { %v8592_v15 = vpop.permute.xlu1 %3304 }
 0x8df   :  { %v8535_v0 = vpop.permute.xlu0 %3276  ;;  %v8550_v45 = vpop.permute.xlu2 %3300 }
 0x8e0   :  { %3421 = vrot.lane.b32.xlu0 %v3403_v34, %s5638_s18  ;;  %3356 = vrot.lane.b32.xlu2 %v8532_v62, %s5647_s25 }
 0x8e5   :  { %3461 = vrot.lane.b32.xlu1 %v3403_v34, %s5644_s4 }
 0x8e6   :  { %v8600_v47 = vpop.permute.xlu1 %3280 }
 0x8e7   :  { %v8545_v2 = vpop.permute.xlu0 %3288  ;;  %v8559_v33 = vpop.permute.xlu2 %3324 }
 0x8e8   :  { %3437 = vrot.lane.b32.xlu0 %v3403_v34, %s5642_s7  ;;  %3352 = vrot.lane.b32.xlu2 %v8545_v2, %s5647_s25 }
 0x8ed   :  { %3457 = vrot.lane.b32.xlu1 %v3403_v34, %s5645_s20 }
 0x8ef   :  { %v8566_v37 = vpop.permute.xlu2 %3316  ;;  %v8571_v21 = vpop.permute.xlu0 %3308 }
 0x8f0   :  { %3340 = vrot.lane.b32.xlu0 %v8535_v0, %s5647_s25  ;;  %3348 = vrot.lane.b32.xlu2 %v8553_v23, %s5647_s25 }
 0x8f5   :  { %3453 = vrot.lane.b32.xlu1 %v3403_v34, %s5646_s24 }
 0x8f7   :  { %v8576_v38 = vpop.permute.xlu2 %3312  ;;  %v8579_v9 = vpop.permute.xlu0 %3296 }
 0x8f8   :  { %3336 = vrot.lane.b32.xlu0 %v8540_v13, %s5647_s25  ;;  %3415 = vrot.lane.b32.xlu2 %v3404_v24, %s5636_s16 }
 0x8fd   :  { %3465 = vrot.lane.b32.xlu1 %v3403_v34, %s5647_s25 }
 0x8ff   :  { %v8586_v16 = vpop.permute.xlu0 %3320 }
 0x900   :  { %3332 = vrot.lane.b32.xlu0 %v8542_v28, %s5647_s25  ;;  %3431 = vrot.lane.b32.xlu2 %v3404_v24, %s5635_s8 }
 0x905   :  { %3501 = vrot.lane.b32.xlu1 %v3403_v34, %s5649_s1 }
 0x907   :  { %v8597_v29 = vpop.permute.xlu0 %3328 }
 0x908   :  { %3411 = vrot.lane.b32.xlu0 %v3404_v24, %s5631_s17  ;;  %3407 = vrot.lane.b32.xlu2 %v3404_v24, %s5637_s2  ;;  %s5653_s17 = smov 123  }
 0x90d   :  { %3427 = vrot.lane.b32.xlu1 %v3404_v24, %s5639_s19 }
 0x910   :  { %3447 = vrot.lane.b32.xlu0 %v3404_v24, %s5641_s22  ;;  %3423 = vrot.lane.b32.xlu2 %v3404_v24, %s5638_s18 }
 0x911   :  { %v8583_v5 = vpop.permute.xlu2 %3354 }
 0x915   :  { %3443 = vrot.lane.b32.xlu1 %v3404_v24, %s5640_s21 }
 0x918   :  { %3439 = vrot.lane.b32.xlu0 %v3404_v24, %s5642_s7  ;;  %3435 = vrot.lane.b32.xlu2 %v3404_v24, %s5643_s23 }
 0x91a   :  { %v8590_v12 = vpop.permute.xlu2 %3350 }
 0x91b   :  { %9434 = vst [vmem:[#allocation6_spill] sm:$0xff] %v8590_v12 }
 0x91d   :  { %3419 = vrot.lane.b32.xlu1 %v3404_v24, %s5633_s0  ;;  %s5654_s0 = smov 127  }
 0x920   :  { %3467 = vrot.lane.b32.xlu0 %v3404_v24, %s5647_s25  ;;  %3463 = vrot.lane.b32.xlu2 %v3404_v24, %s5644_s4 }
 0x922   :  { %v3406_v30 = vpop.permute.xlu2 %3405 }
 0x925   :  { %3459 = vrot.lane.b32.xlu1 %v3404_v24, %s5645_s20 }
 0x928   :  { %3503 = vrot.lane.b32.xlu0 %v3404_v24, %s5649_s1 }
 0x92a   :  { %v3442_v46 = vpop.permute.xlu2 %3441  ;;  %v8603_v61 = vpop.permute.xlu0 %3338 }
 0x92d   :  { %3455 = vrot.lane.b32.xlu1 %v3404_v24, %s5646_s24 }
 0x92f   :  { %v3414_v27 = vpop.permute.xlu1 %3413 }
 0x930   :  { %3513 = vrot.lane.b32.xlu0 %v3414_v27, %s5649_s1  ;;  %3477 = vrot.lane.b32.xlu2 %v3414_v27, %s5647_s25 }
 0x932   :  { %v8608_v59 = vpop.permute.xlu0 %3334  ;;  %v8610_v14 = vpop.permute.xlu2 %3449 }
 0x935   :  { %3451 = vrot.lane.b32.xlu1 %v3404_v24, %s5648_s26 }
 0x937   :  { %v3410_v44 = vpop.permute.xlu1 %3409 }
 0x938   :  { %3473 = vrot.lane.b32.xlu0 %v3410_v44, %s5647_s25 }
 0x93a   :  { %v8614_v57 = vpop.permute.xlu0 %3330  ;;  %v8616_v17 = vpop.permute.xlu2 %3356 }
 0x93f   :  { %v3426_v43 = vpop.permute.xlu1 %3425 }
 0x940   :  { %3489 = vrot.lane.b32.xlu1 %v3426_v43, %s5647_s25  ;;  %3509 = vrot.lane.b32.xlu0 %v3410_v44, %s5649_s1 }
 0x942   :  { %v3430_v53 = vpop.permute.xlu0 %3429  ;;  %v8621_v18 = vpop.permute.xlu2 %3352 }
 0x943   :  { %3493 = vrot.lane.b32.xlu2 %v3430_v53, %s5647_s25 }
 0x947   :  { %v3418_v51 = vpop.permute.xlu1 %3417 }
 0x948   :  { %3505 = vrot.lane.b32.xlu1 %v3406_v30, %s5649_s1  ;;  %3525 = vrot.lane.b32.xlu0 %v3426_v43, %s5649_s1 }
 0x94a   :  { %v3446_v54 = vpop.permute.xlu0 %3445  ;;  %v8627_v39 = vpop.permute.xlu2 %3348 }
 0x94b   :  { %3529 = vrot.lane.b32.xlu2 %v3430_v53, %s5649_s1  ;;  %9435 = vst [vmem:[#allocation20_spill] sm:$0xff] %v8627_v39 }
 0x94f   :  { %v3434_v63 = vpop.permute.xlu1 %3433 }
 0x950   :  { %3541 = vrot.lane.b32.xlu1 %v3442_v46, %s5649_s1 }
 0x952   :  { %v3422_v22 = vpop.permute.xlu0 %3421  ;;  %v3416_v19 = vpop.permute.xlu2 %3415 }
 0x953   :  { %3469 = vrot.lane.b32.xlu2 %v3406_v30, %s5647_s25  ;;  %3485 = vrot.lane.b32.xlu0 %v3422_v22, %s5647_s25 }
 0x957   :  { %v3462_v8 = vpop.permute.xlu1 %3461 }
 0x958   :  { %3481 = vrot.lane.b32.xlu1 %v3418_v51, %s5647_s25 }
 0x95a   :  { %v3438_v20 = vpop.permute.xlu0 %3437  ;;  %v3432_v34 = vpop.permute.xlu2 %3431 }
 0x95b   :  { %3545 = vrot.lane.b32.xlu2 %v3446_v54, %s5649_s1  ;;  %3521 = vrot.lane.b32.xlu0 %v3422_v22, %s5649_s1 }
 0x95f   :  { %v3458_v3 = vpop.permute.xlu1 %3457 }
 0x960   :  { %3537 = vrot.lane.b32.xlu1 %v3438_v20, %s5649_s1 }
 0x962   :  { %v8635_v36 = vpop.permute.xlu0 %3340  ;;  %v3408_v52 = vpop.permute.xlu2 %3407 }
 0x963   :  { %3517 = vrot.lane.b32.xlu2 %v3418_v51, %s5649_s1  ;;  %3515 = vrot.lane.b32.xlu0 %v3416_v19, %s5649_s1 }
 0x967   :  { %v3454_v4 = vpop.permute.xlu1 %3453 }
 0x968   :  { %3497 = vrot.lane.b32.xlu1 %v3434_v63, %s5647_s25 }
 0x96a   :  { %v8640_v6 = vpop.permute.xlu0 %3336  ;;  %v3424_v24 = vpop.permute.xlu2 %3423 }
 0x96b   :  { %3533 = vrot.lane.b32.xlu2 %v3434_v63, %s5649_s1 }
 0x96f   :  { %v3466_v40 = vpop.permute.xlu1 %3465 }
 0x970   :  { %3561 = vrot.lane.b32.xlu1 %v3462_v8, %s5649_s1 }
 0x972   :  { %v8644_v42 = vpop.permute.xlu0 %3332  ;;  %v3436_v44 = vpop.permute.xlu2 %3435 }
 0x973   :  { %3479 = vrot.lane.b32.xlu2 %v3416_v19, %s5647_s25 }
 0x977   :  { %v8647_v48 = vpop.permute.xlu1 %3501 }
 0x978   :  { %3557 = vrot.lane.b32.xlu1 %v3458_v3, %s5649_s1 }
 0x97a   :  { %v3412_v30 = vpop.permute.xlu0 %3411  ;;  %v3464_v51 = vpop.permute.xlu2 %3463 }
 0x97b   :  { %3495 = vrot.lane.b32.xlu2 %v3432_v34, %s5647_s25  ;;  %3475 = vrot.lane.b32.xlu0 %v3412_v30, %s5647_s25 }
 0x97f   :  { %v3428_v46 = vpop.permute.xlu1 %3427 }
 0x980   :  { %3553 = vrot.lane.b32.xlu1 %v3454_v4, %s5649_s1 }
 0x982   :  { %v3448_v27 = vpop.permute.xlu0 %3447 }
 0x983   :  { %3531 = vrot.lane.b32.xlu2 %v3432_v34, %s5649_s1  ;;  %3511 = vrot.lane.b32.xlu0 %v3412_v30, %s5649_s1 }
 0x987   :  { %v3444_v43 = vpop.permute.xlu1 %3443 }
 0x988   :  { %3491 = vrot.lane.b32.xlu1 %v3428_v46, %s5647_s25 }
 0x98a   :  { %v3440_v53 = vpop.permute.xlu0 %3439  ;;  %v3478_v22 = vpop.permute.xlu2 %3477 }
 0x98b   :  { %3471 = vrot.lane.b32.xlu2 %v3408_v52, %s5647_s25  ;;  %3507 = vrot.lane.b32.xlu0 %v3408_v52, %s5649_s1 }
 0x98f   :  { %v3420_v54 = vpop.permute.xlu1 %3419 }
 0x990   :  { %3539 = vrot.lane.b32.xlu1 %v3440_v53, %s5649_s1 }
 0x992   :  { %v3468_v63 = vpop.permute.xlu0 %3467 }
 0x993   :  { %3543 = vrot.lane.b32.xlu0 %v3444_v43, %s5649_s1  ;;  %3547 = vrot.lane.b32.xlu2 %v3448_v27, %s5649_s1 }
 0x997   :  { %v3460_v8 = vpop.permute.xlu1 %3459 }
 0x998   :  { %3549 = vrot.lane.b32.xlu1 %v8610_v14, %s5649_s1 }
 0x99a   :  { %v8663_v20 = vpop.permute.xlu0 %3503 }
 0x99b   :  { %3483 = vrot.lane.b32.xlu0 %v3420_v54, %s5647_s25  ;;  %3527 = vrot.lane.b32.xlu2 %v3428_v46, %s5649_s1 }
 0x99d   :  { %v3494_v19 = vpop.permute.xlu2 %3493 }
 0x99f   :  { %v3456_v3 = vpop.permute.xlu1 %3455 }
 0x9a0   :  { %3565 = vrot.lane.b32.xlu1 %v3466_v40, %s5649_s1 }
 0x9a2   :  { %v3514_v34 = vpop.permute.xlu0 %3513 }
 0x9a3   :  { %3563 = vrot.lane.b32.xlu0 %v3464_v51, %s5649_s1  ;;  %3487 = vrot.lane.b32.xlu2 %v3424_v24, %s5647_s25 }
 0x9a5   :  { %v3530_v4 = vpop.permute.xlu2 %3529 }
 0x9a7   :  { %v3452_v52 = vpop.permute.xlu1 %3451 }
 0x9a8   :  { %3559 = vrot.lane.b32.xlu1 %v3460_v8, %s5649_s1 }
 0x9aa   :  { %v3474_v14 = vpop.permute.xlu0 %3473 }
 0x9ab   :  { %3326 = vrot.lane.b32.xlu0 %v8421_v49, %s5647_s25  ;;  %3523 = vrot.lane.b32.xlu2 %v3424_v24, %s5649_s1 }
 0x9ad   :  { %v3470_v30 = vpop.permute.xlu2 %3469 }
 0x9b0   :  { %3555 = vrot.lane.b32.xlu1 %v3456_v3, %s5649_s1 }
 0x9b2   :  { %v3490_v46 = vpop.permute.xlu1 %3489  ;;  %v3510_v40 = vpop.permute.xlu0 %3509 }
 0x9b3   :  { %3593 = vrot.lane.b32.xlu0 %v3494_v19, %s5649_s1  ;;  %3499 = vrot.lane.b32.xlu2 %v3436_v44, %s5647_s25 }
 0x9b5   :  { %v3546_v27 = vpop.permute.xlu2 %3545 }
 0x9b8   :  { %3551 = vrot.lane.b32.xlu1 %v3452_v52, %s5649_s1 }
 0x9ba   :  { %v8678_v43 = vpop.permute.xlu1 %3505  ;;  %v3526_v53 = vpop.permute.xlu0 %3525 }
 0x9bb   :  { %3589 = vrot.lane.b32.xlu0 %v3490_v46, %s5649_s1  ;;  %3519 = vrot.lane.b32.xlu2 %v3420_v54, %s5649_s1 }
 0x9bd   :  { %v8682_v24 = vpop.permute.xlu2 %3517 }
 0x9c0   :  { %3567 = vrot.lane.b32.xlu1 %v3468_v63, %s5649_s1 }
 0x9c2   :  { %v8685_v51 = vpop.permute.xlu1 %3541 }
 0x9c3   :  { %3535 = vrot.lane.b32.xlu2 %v3436_v44, %s5649_s1 }
 0x9c5   :  { %v8688_v8 = vpop.permute.xlu2 %3533  ;;  %v3486_v19 = vpop.permute.xlu0 %3485 }
 0x9c6   :  { %3585 = vrot.lane.b32.xlu0 %v3486_v19, %s5649_s1 }
 0x9c8   :  { %3577 = vrot.lane.b32.xlu1 %v3478_v22, %s5649_s1 }
 0x9ca   :  { %v8692_v3 = vpop.permute.xlu1 %3481 }
 0x9cb   :  { %3310 = vrot.lane.b32.xlu2 %v8421_v49, %s5648_s26 }
 0x9cd   :  { %v3480_v54 = vpop.permute.xlu2 %3479  ;;  %v8696_v52 = vpop.permute.xlu0 %3521 }
 0x9d0   :  { %3573 = vrot.lane.b32.xlu1 %v3474_v14, %s5649_s1  ;;  %v3628_v14 = vsel %vm3601_vm2, %v8493_v1, %v3514_v34 }
 0x9d2   :  { %v8699_v63 = vpop.permute.xlu1 %3537 }
 0x9d3   :  { %3346 = vrot.lane.b32.xlu2 %v8487_v10, %s5647_s25 }
 0x9d5   :  { %v3496_v44 = vpop.permute.xlu2 %3495  ;;  %v3516_v46 = vpop.permute.xlu0 %3515 }
 0x9d6   :  { %v3632_v22 = vsel %vm3601_vm2, %v8535_v0, %v3516_v46  ;;  %3595 = vrot.lane.b32.xlu0 %v3496_v44, %s5649_s1  ;;  %v3660_v0 = vsel %vm3601_vm2, %v8491_v56, %v3530_v4 }
 0x9d7   :  { %3895 = vmatpush.bf16.msrb.mxu3 %v3632_v22 }
 0x9d8   :  { %3569 = vrot.lane.b32.xlu1 %v3470_v30, %s5649_s1 }
 0x9da   :  { %v8707_v19 = vpop.permute.xlu1 %3497 }
 0x9db   :  { %3344 = vrot.lane.b32.xlu2 %v8600_v47, %s5647_s25  ;;  %3896 = vmatpush.bf16.msrb.mxu3 %v3628_v14  ;;  %v3620_v14 = vsel %vm3601_vm2, %v8485_v35, %v3510_v40  ;;  %v3612_v35 = vsel %vm3601_vm2, %v8511_v55, %v8678_v43  ;;  %v3604_v55 = vsel %vm3601_vm2, %v8421_v49, %v8647_v48 }
 0x9dc   :  { %v3644_v43 = vsel %vm3601_vm2, %v8487_v10, %v8696_v52  ;;  %v3676_v48 = vsel %vm3601_vm2, %v8521_v41, %v8699_v63 }
 0x9dd   :  { %v3532_v39 = vpop.permute.xlu2 %3531 }
 0x9de   :  { %v3664_v12 = vsel %vm3601_vm2, %v8532_v62, %v3532_v39 }
 0x9df   :  { %3914 = vmatpush.bf16.msrb.mxu0 %v3664_v12  ;;  %v3692_v12 = vsel %vm3601_vm2, %v8513_v60, %v3546_v27  ;;  %v3652_v60 = vsel %vm3601_vm2, %v8502_v31, %v3526_v53  ;;  %v3608_v53 = vsel %vm3601_vm2, %v8435_v11, %v8663_v20  ;;  %v3684_v11 = vsel %vm3601_vm2, %v8489_v50, %v8685_v51 }
 0x9e0   :  { %3579 = vrot.lane.b32.xlu1 %v3480_v54, %s5649_s1 }
 0x9e2   :  { %v8718_v30 = vpop.permute.xlu1 %3561 }
 0x9e3   :  { %3915 = vmatpush.bf16.msrb.mxu0 %v3660_v0 }
 0x9e5   :  { %v3472_v44 = vpop.permute.xlu2 %3471 }
 0x9ea   :  { %v8720_v46 = vpop.permute.xlu1 %3557 }
 0x9ed   :  { %v3548_v1 = vpop.permute.xlu2 %3547  ;;  %v3476_v34 = vpop.permute.xlu0 %3475 }
 0x9ee   :  { %v3696_v22 = vsel %vm3601_vm2, %v8571_v21, %v3548_v1  ;;  %3575 = vrot.lane.b32.xlu1 %v3476_v34, %s5649_s1 }
 0x9ef   :  { %3933 = vmatpush.bf16.msrb.mxu1 %v3696_v22 }
 0x9f2   :  { %v8725_v62 = vpop.permute.xlu1 %3553 }
 0x9f3   :  { %3934 = vmatpush.bf16.msrb.mxu1 %v3692_v12 }
 0x9f5   :  { %v3528_v56 = vpop.permute.xlu2 %3527  ;;  %v3512_v39 = vpop.permute.xlu0 %3511 }
 0x9f6   :  { %3571 = vrot.lane.b32.xlu1 %v3472_v44, %s5649_s1  ;;  %v3624_v4 = vsel %vm3601_vm2, %v8540_v13, %v3512_v39  ;;  %v3656_v54 = vsel %vm3601_vm2, %v8545_v2, %v3528_v56  ;;  %v5215_v39 = vld [vmem:[%s9045_s9 + $0x24] sm:$0xf0] }
 0x9f7   :  { %3897 = vmatpush.bf16.msrb.mxu3 %v3624_v4  ;;  %3916 = vmatpush.bf16.msrb.mxu0 %v3656_v54  ;;  %v5478_v54 = vld [vmem:[%s9045_s9 + $0x4] sm:$0xf] }
 0x9fa   :  { %v3492_v21 = vpop.permute.xlu1 %3491 }
 0x9fb   :  { %3898 = vmatpush.bf16.msrb.mxu3 %v3620_v14  ;;  %3917 = vmatpush.bf16.msrb.mxu0 %v3652_v60 }
 0x9fc   :  { %3591 = vrot.lane.b32.xlu0 %v3492_v21, %s5649_s1  ;;  %v5207_v21 = vld [vmem:[%s9045_s9 + $0x1c] sm:$0xf0] }
 0x9fd   :  { %v3488_v27 = vpop.permute.xlu2 %3487  ;;  %v3508_v0 = vpop.permute.xlu0 %3507  ;;  %v5210_v60 = vor.u32 %v5478_v54, %v5207_v21 }
 0x9fe   :  { %3342 = vrot.lane.b32.xlu1 %v8499_v25, %s5647_s25  ;;  %v3616_v13 = vsel %vm3601_vm2, %v8542_v28, %v3508_v0  ;;  %v5482_v0 = vld [vmem:[%s9045_s9 + $0x20] sm:$0xf0] }
 0x9ff   :  { %3899 = vmatpush.bf16.msrb.mxu3 %v3616_v13 }
 0xa02   :  { %v3540_v2 = vpop.permute.xlu1 %3539 }
 0xa03   :  { %3900 = vmatpush.bf16.msrb.mxu3 %v3612_v35  ;;  %v3680_v49 = vsel %vm3601_vm2, %v8550_v45, %v3540_v2  ;;  %v5233_v35 = vld [vmem:[%s9045_s9 + $0x38] sm:$0xf] }
 0xa04   :  { %3587 = vrot.lane.b32.xlu0 %v3488_v27, %s5649_s1  ;;  %v5213_v27 = vld [vmem:[%s9045_s9 + $0x8] sm:$0xf] }
 0xa05   :  { %v3524_v31 = vpop.permute.xlu2 %3523  ;;  %v3544_v40 = vpop.permute.xlu0 %3543  ;;  %v5214_v2 = vor.u32 %v5482_v0, %v5213_v27  ;;  %v5251_v27 = vld [vmem:[%s9045_s9 + $0x64] sm:$0xf0]  ;;  %v5257_v0 = vld [vmem:[%s9045_s9 + $0x50] sm:$0xf] }
 0xa06   :  { %v3648_v44 = vsel %vm3601_vm2, %v8553_v23, %v3524_v31  ;;  %v3688_v28 = vsel %vm3601_vm2, %v8592_v15, %v3544_v40  ;;  %v5488_v31 = vld [vmem:[%s9045_s9 + $0x50] sm:$0xf0] }
 0xa07   :  { %3901 = vmatpush.bf16.msrb.mxu3 %v3608_v53  ;;  %3918 = vmatpush.bf16.msrb.mxu0 %v3648_v44  ;;  %v5234_v53 = vor.u32 %v5488_v31, %v5233_v35 }
 0xa08   :  { %3935 = vmatpush.bf16.msrb.mxu1 %v3688_v28 }
 0xa0a   :  { %v3550_v1 = vpop.permute.xlu1 %3549 }
 0xa0b   :  { %3902 = vmatpush.bf16.msrb.mxu3 %v3604_v55  ;;  %3919 = vmatpush.bf16.msrb.mxu0 %v3644_v43  ;;  %v5486_v55 = vld [vmem:[%s9045_s9 + $0x44] sm:$0xf]  ;;  %v5243_v43 = vld [vmem:[%s9045_s9 + $0x5c] sm:$0xf0] }
 0xa0c   :  { %3936 = vmatpush.bf16.msrb.mxu1 %v3684_v11  ;;  %3360 = vrot.lane.b32.xlu0 %v8579_v9, %s5647_s25  ;;  %v5246_v11 = vor.u32 %v5486_v55, %v5243_v43 }
 0xa0d   :  { %v3500_v23 = vpop.permute.xlu2 %3499  ;;  %v3484_v15 = vpop.permute.xlu0 %3483 }
 0xa0e   :  { %3599 = vrot.lane.b32.xlu2 %v3500_v23, %s5649_s1  ;;  %3583 = vrot.lane.b32.xlu1 %v3484_v15, %s5649_s1  ;;  %v5235_v23 = vld [vmem:[%s9045_s9 + $0x54] sm:$0xf0] }
 0xa10   :  { %3937 = vmatpush.bf16.msrb.mxu1 %v3680_v49  ;;  %v5489_v49 = vld [vmem:[%s9045_s9 + $0x58] sm:$0xf0] }
 0xa12   :  { %v3566_v10 = vpop.permute.xlu1 %3565 }
 0xa14   :  { %3938 = vmatpush.bf16.msrb.mxu1 %v3676_v48  ;;  %3581 = vrot.lane.b32.xlu0 %v8692_v3, %s5649_s1  ;;  %v3636_v3 = vsel %vm3601_vm2, %v8499_v25, %v8682_v24  ;;  %v3716_v24 = vsel %vm3601_vm2, %v8518_v32, %v8720_v46 }
 0xa15   :  { %v3520_v50 = vpop.permute.xlu2 %3519  ;;  %v3564_v20 = vpop.permute.xlu0 %3563 }
 0xa16   :  { %v3728_v51 = vsel %vm3601_vm2, %v8559_v33, %v3564_v20  ;;  %3358 = vrot.lane.b32.xlu2 %v8508_v26, %s5647_s25  ;;  %3597 = vrot.lane.b32.xlu1 %v8707_v19, %s5649_s1  ;;  %v3640_v45 = vsel %vm3601_vm2, %v8600_v47, %v3520_v50  ;;  %v3724_v33 = vsel %vm3601_vm2, %v8528_v7, %v8718_v30  ;;  %s5652_s1 = smov 126  }
 0xa17   :  { %3920 = vmatpush.bf16.msrb.mxu0 %v3640_v45  ;;  %3952 = vmatpush.bf16.msra.mxu2 %v3728_v51  ;;  %v3668_v7 = vsel %vm3601_vm2, %v8508_v26, %v8688_v8  ;;  %v3708_v30 = vsel %vm3601_vm2, %v8526_v58, %v8725_v62  ;;  %v5481_v58 = vld [vmem:[%s9045_s9 + $0x18] sm:$0xf0] }
 0xa1a   :  { %v3560_v41 = vpop.permute.xlu1 %3559 }
 0xa1b   :  { %3921 = vmatpush.bf16.msrb.mxu0 %v3636_v3  ;;  %3953 = vmatpush.bf16.msra.mxu2 %v3724_v33  ;;  %v3720_v47 = vsel %vm3601_vm2, %v8586_v16, %v3560_v41 }
 0xa1d   :  { %v3536_v52 = vpop.permute.xlu2 %3535  ;;  %v3327_v63 = vpop.permute.xlu0 %3326 }
 0xa1e   :  { %v3672_v19 = vsel %vm3601_vm2, %v8579_v9, %v3536_v52  ;;  %v8793_v34 = vsel %vm3601_vm2, %v3327_v63, %v3566_v10  ;;  %3922 = vmatmul.bf16.vlgmr.msrb.gmra.mxu0 %v5210_v60  ;;  %v5487_v60 = vld [vmem:[%s9045_s9 + $0x4c] sm:$0xf] }
 0xa1f   :  { %3939 = vmatpush.bf16.msrb.mxu1 %v3672_v19  ;;  %3954 = vmatpush.bf16.msra.mxu2 %v3720_v47 }
 0xa22   :  { %v3556_v25 = vpop.permute.xlu1 %3555 }
 0xa23   :  { %3940 = vmatpush.bf16.msrb.mxu1 %v3668_v7  ;;  %3955 = vmatpush.bf16.msra.mxu2 %v3716_v24  ;;  %v3712_v9 = vsel %vm3601_vm2, %v8566_v37, %v3556_v25  ;;  %v5205_v37 = vld [vmem:[%s9045_s9] sm:$0xf]  ;;  %v9437_v7 = vld [vmem:[#allocation20_spill] sm:$0xff] }
 0xa24   :  { %v5206_v46 = vor.u32 %v5481_v58, %v5205_v37  ;;  %v5223_v37 = vld [vmem:[%s9045_s9 + $0x2c] sm:$0xf0] }
 0xa25   :  { %v3594_v22 = vpop.permute.xlu0 %3593  ;;  %v3311_v8 = vpop.permute.xlu2 %3310 }
 0xa26   :  { %v3700_v32 = vsel %vm3601_vm2, %v3311_v8, %v3550_v1  ;;  %3903 = vmatmul.bf16.vlgmr.msrb.gmra.mxu3 %v5206_v46  ;;  %3941 = vmatmul.bf16.vlgmr.msrb.gmra.mxu1 %v5214_v2  ;;  %v3788_v1 = vsel %vm3601_vm2, %v8583_v5, %v3594_v22  ;;  %v5241_v5 = vld [vmem:[%s9045_s9 + $0x40] sm:$0xf]  ;;  %v5254_v2 = vor.u32 %v5487_v60, %v5251_v27 }
 0xa27   :  { %3956 = vmatpush.bf16.msra.mxu2 %v3712_v9  ;;  %v5242_v48 = vor.u32 %v5489_v49, %v5241_v5 }
 0xa2a   :  { %v3552_v16 = vpop.permute.xlu1 %3551 }
 0xa2b   :  { %3957 = vmatpush.bf16.msra.mxu2 %v3708_v30  ;;  %v3704_v26 = vsel %vm3601_vm2, %v8576_v38, %v3552_v16  ;;  %v5479_v38 = vld [vmem:[%s9045_s9 + $0xc] sm:$0xf] }
 0xa2c   :  { %v5218_v4 = vor.u32 %v5479_v38, %v5215_v39 }
 0xa2d   :  { %v3590_v62 = vpop.permute.xlu0 %3589 }
 0xa2f   :  { %3958 = vmatpush.bf16.msra.mxu2 %v3704_v26 }
 0xa32   :  { %v8808_v12 = vpop.permute.xlu1 %3567 }
 0xa33   :  { %3959 = vmatpush.bf16.msra.mxu2 %v3700_v32  ;;  %v5480_v32 = vld [vmem:[%s9045_s9 + $0x14] sm:$0xf] }
 0xa34   :  { %v5226_v39 = vor.u32 %v5480_v32, %v5223_v37 }
 0xa36   :  { %3960 = vmatmul.bf16.vlgmr.msra.gmra.mxu2 %v5218_v4  ;;  %3908 = vmatmul.bf16.gmra.mxu3 %v5234_v53 }
 0xa37   :  { %3946 = vmatmul.bf16.gmra.mxu1 %v5242_v48 }
 0xa38   :  { %v8829_v14 = vpop.permute.xlu0 %3585 }
 0xa3a   :  { %v3578_v56 = vpop.permute.xlu1 %3577 }
 0xa3b   :  { %v3756_v20 = vsel %vm3601_vm2, %v8603_v61, %v3578_v56  ;;  %v5484_v56 = vld [vmem:[%s9045_s9 + $0x30] sm:$0xf0] }
 0xa42   :  { %v3574_v13 = vpop.permute.xlu1 %3573 }
 0xa43   :  { %v3748_v41 = vsel %vm3601_vm2, %v8608_v59, %v3574_v13  ;;  %v3736_v59 = vsel %vm3601_vm2, %v8597_v29, %v8808_v12  ;;  %v5490_v12 = vld [vmem:[%s9045_s9 + $0x60] sm:$0xf0]  ;;  %v5491_v13 = vld [vmem:[%s9045_s9 + $0x68] sm:$0xf0] }
 0xa44   :  { %v5258_v35 = vor.u32 %v5491_v13, %v5257_v0 }
 0xa46   :  { %3965 = vmatmul.bf16.gmra.mxu2 %v5246_v11 }
 0xa48   :  { %v3596_v40 = vpop.permute.xlu0 %3595 }
 0xa49   :  { %v3792_v44 = vsel %vm3601_vm2, %v8616_v17, %v3596_v40  ;;  %v5485_v17 = vld [vmem:[%s9045_s9 + $0x3c] sm:$0xf] }
 0xa4a   :  { %3990 = vmatpush.bf16.msra.mxu0 %v3792_v44  ;;  %v3570_v28 = vpop.permute.xlu1 %3569  ;;  %v5238_v15 = vor.u32 %v5485_v17, %v5235_v23 }
 0xa4b   :  { %v3740_v52 = vsel %vm3601_vm2, %v8614_v57, %v3570_v28  ;;  %v9436_v57 = vld [vmem:[#allocation6_spill] sm:$0xff] }
 0xa4c   :  { %3927 = vmatmul.bf16.gmra.mxu0 %v5238_v15  ;;  %v3780_v19 = vsel %vm3601_vm2, %v9436_v57, %v3590_v62  ;;  %v5229_v62 = vld [vmem:[%s9045_s9 + $0x18] sm:$0xf] }
 0xa4e   :  { %3991 = vmatpush.bf16.msra.mxu0 %v3788_v1 }
 0xa52   :  { %v3580_v10 = vpop.permute.xlu1 %3579 }
 0xa53   :  { %v3760_v50 = vsel %vm3601_vm2, %v8635_v36, %v3580_v10  ;;  %v3347_v36 = vpop.permute.xlu2 %3346 }
 0xa54   :  { %3971 = vmatpush.bf16.msra.mxu3 %v3760_v50  ;;  %v3772_v9 = vsel %vm3601_vm2, %v3347_v36, %v8829_v14  ;;  %v5230_v14 = vor.u32 %v5484_v56, %v5229_v62 }
 0xa58   :  { %3972 = vmatpush.bf16.msra.mxu3 %v3756_v20 }
 0xa60   :  { %v3576_v51 = vpop.permute.xlu1 %3575 }
 0xa61   :  { %v3752_v45 = vsel %vm3601_vm2, %v8640_v6, %v3576_v51  ;;  %v5221_v6 = vld [vmem:[%s9045_s9 + $0x10] sm:$0xf] }
 0xa62   :  { %3973 = vmatpush.bf16.msra.mxu3 %v3752_v45 }
 0xa66   :  { %3974 = vmatpush.bf16.msra.mxu3 %v3748_v41 }
 0xa68   :  { %v3572_v3 = vpop.permute.xlu1 %3571 }
 0xa69   :  { %v3744_v33 = vsel %vm3601_vm2, %v8644_v42, %v3572_v3  ;;  %v5483_v42 = vld [vmem:[%s9045_s9 + $0x28] sm:$0xf0] }
 0xa6a   :  { %3975 = vmatpush.bf16.msra.mxu3 %v3744_v33  ;;  %v5222_v47 = vor.u32 %v5483_v42, %v5221_v6 }
 0xa6e   :  { %3976 = vmatpush.bf16.msra.mxu3 %v3740_v52  ;;  %v3592_v61 = vpop.permute.xlu0 %3591 }
 0xa6f   :  { %v3784_v63 = vsel %vm3601_vm2, %v8621_v18, %v3592_v61  ;;  %v3345_v18 = vpop.permute.xlu2 %3344 }
 0xa70   :  { %3992 = vmatpush.bf16.msra.mxu0 %v3784_v63  ;;  %v3343_v24 = vpop.permute.xlu1 %3342 }
 0xa72   :  { %3977 = vmatpush.bf16.msra.mxu3 %v3736_v59 }
 0xa74   :  { %3993 = vmatpush.bf16.msra.mxu0 %v3780_v19 }
 0xa76   :  { %3978 = vmatpush.bf16.msra.mxu3 %v8793_v34  ;;  %v3588_v25 = vpop.permute.xlu0 %3587  ;;  %v5249_v34 = vld [vmem:[%s9045_s9 + $0x48] sm:$0xf] }
 0xa77   :  { %v3776_v29 = vsel %vm3601_vm2, %v9437_v7, %v3588_v25  ;;  %v3600_v16 = vpop.permute.xlu2 %3599  ;;  %v5250_v58 = vor.u32 %v5490_v12, %v5249_v34 }
 0xa78   :  { %3994 = vmatpush.bf16.msra.mxu0 %v3776_v29 }
 0xa79   :  { %3979 = vmatmul.bf16.vlgmr.msra.gmra.mxu3 %v5222_v47 }
 0xa7c   :  { %3995 = vmatpush.bf16.msra.mxu0 %v3772_v9 }
 0xa7e   :  { %v3361_v30 = vpop.permute.xlu0 %3360 }
 0xa7f   :  { %v3800_v22 = vsel %vm3601_vm2, %v3361_v30, %v3600_v16  ;;  %v3359_v4 = vpop.permute.xlu2 %3358 }
 0xa80   :  { %v3584_v26 = vpop.permute.xlu1 %3583  ;;  %4015 = vmatpush.bf16.msra.mxu1 %v3800_v22 }
 0xa81   :  { %v3768_v8 = vsel %vm3601_vm2, %v3345_v18, %v3584_v26 }
 0xa82   :  { %3996 = vmatpush.bf16.msra.mxu0 %v3768_v8 }
 0xa86   :  { %v3582_v46 = vpop.permute.xlu0 %3581 }
 0xa87   :  { %v3764_v38 = vsel %vm3601_vm2, %v3343_v24, %v3582_v46 }
 0xa88   :  { %v3598_v54 = vpop.permute.xlu1 %3597  ;;  %3997 = vmatpush.bf16.msra.mxu0 %v3764_v38 }
 0xa89   :  { %3984 = vmatmul.bf16.gmra.mxu3 %v5250_v58  ;;  %v3796_v21 = vsel %vm3601_vm2, %v3359_v4, %v3598_v54  ;;  %vm4298_vm2 = vcmask 11264  }
 0xa8a   :  { %4016 = vmatpush.bf16.msra.mxu1 %v3796_v21 }
 0xa8b   :  { %3998 = vmatmul.bf16.vlgmr.msra.gmra.mxu0 %v5226_v39 }
 0xa8d   :  { %5259 = vmatmul.msk.bf16.vlgmr.msra.gmra.mxu1 %vm3888_vm3, %v5230_v14 }
 0xa9b   :  { %4003 = vmatmul.bf16.gmra.mxu0 %v5254_v2  ;;  %v3923_v53 = vpop.f32.mrf.mxu0 }
 0xa9d   :  { %5260 = vmatmul.msk.bf16.gmra.mxu1 %vm3888_vm3, %v5258_v35 }
 0xaa3   :  { %v3942_v44 = vpop.f32.mrf.mxu1  ;;  %v3925_v1 = vpop.f32.mrf.mxu0 }
 0xaa9   :  { %v3904_v31 = vpop.f32.mrf.mxu3 }
 0xaaa   :  { %v3924_v15 = vadd.f32 %v3923_v53, %v3904_v31 }
 0xaab   :  { %v3944_v55 = vpop.f32.mrf.mxu1 }
 0xaac   :  { %v3943_v10 = vadd.f32 %v3942_v44, %v3924_v15 }
 0xab1   :  { %v3906_v40 = vpop.f32.mrf.mxu3 }
 0xab2   :  { %v3926_v6 = vadd.f32 %v3925_v1, %v3906_v40 }
 0xab4   :  { %v3947_v17 = vpop.f32.mrf.mxu1  ;;  %v3945_v47 = vadd.f32 %v3944_v55, %v3926_v6  ;;  %v4035_v55 = vld [vmem:[%s9046_s11 + $0x18] sm:$0xff] }
 0xab9   :  { %v3909_v28 = vpop.f32.mrf.mxu3  ;;  %v3961_v23 = vpop.f32.mrf.mxu2 }
 0xaba   :  { %v3962_v50 = vadd.f32 %v3961_v23, %v3943_v10 }
 0xabc   :  { %v3949_v48 = vpop.f32.mrf.mxu1 }
 0xac1   :  { %v3911_v43 = vpop.f32.mrf.mxu3  ;;  %v3963_v20 = vpop.f32.mrf.mxu2 }
 0xac2   :  { %v3964_v24 = vadd.f32 %v3963_v20, %v3945_v47 }
 0xac9   :  { %v3928_v11 = vpop.f32.mrf.mxu0  ;;  %v3966_v63 = vpop.f32.mrf.mxu2 }
 0xaca   :  { %v3929_v52 = vadd.f32 %v3928_v11, %v3909_v28 }
 0xacc   :  { %v3948_v42 = vadd.f32 %v3947_v17, %v3929_v52 }
 0xace   :  { %v3967_v25 = vadd.f32 %v3966_v63, %v3948_v42  ;;  %v4028_v63 = vld [vmem:[%s9047_s10] sm:$0xff] }
 0xad1   :  { %v3930_v49 = vpop.f32.mrf.mxu0  ;;  %v3968_v30 = vpop.f32.mrf.mxu2 }
 0xad2   :  { %v3931_v18 = vadd.f32 %v3930_v49, %v3911_v43  ;;  %v4034_v49 = vld [vmem:[%s9046_s11 + $0x10] sm:$0xff] }
 0xad4   :  { %v3950_v9 = vadd.f32 %v3949_v48, %v3931_v18 }
 0xad6   :  { %v3969_v12 = vadd.f32 %v3968_v30, %v3950_v9 }
 0xafc   :  { %v3980_v5 = vpop.f32.mrf.mxu3 }
 0xafd   :  { %v3981_v51 = vadd.f32 %v3980_v5, %v3962_v50 }
 0xb04   :  { %v3982_v45 = vpop.f32.mrf.mxu3 }
 0xb05   :  { %v3983_v26 = vadd.f32 %v3982_v45, %v3964_v24 }
 0xb08   :  { %v3999_v41 = vpop.f32.mrf.mxu0 }
 0xb09   :  { %v4000_v3 = vadd.f32 %v3999_v41, %v3981_v51 }
 0xb0a   :  { %v4018_v33 = vpop.f32.mrf.mxu1 }
 0xb0b   :  { %v4019_v36 = vadd.f32 %v4018_v33, %v4000_v3 }
 0xb0c   :  { %v3985_v57 = vpop.f32.mrf.mxu3 }
 0xb0d   :  { %v4037_v61 = vsel %vm4036_vm4, %v4019_v36, 0.0  ;;  %v3986_v7 = vadd.f32 %v3985_v57, %v3967_v25 }
 0xb0e   :  { %4038 = vadd.xlane.f32.xlu1 %v4037_v61 }
 0xb10   :  { %v4001_v59 = vpop.f32.mrf.mxu0 }
 0xb11   :  { %v4002_v32 = vadd.f32 %v4001_v59, %v3983_v26 }
 0xb12   :  { %v4020_v19 = vpop.f32.mrf.mxu1 }
 0xb13   :  { %v4021_v62 = vadd.f32 %v4020_v19, %v4002_v32 }
 0xb14   :  { %v3987_v34 = vpop.f32.mrf.mxu3 }
 0xb15   :  { %v3988_v58 = vadd.f32 %v3987_v34, %v3969_v12  ;;  %v4040_v54 = vsel %vm4036_vm4, %v4021_v62, 0.0  ;;  %v4030_v34 = vld [vmem:[%s9047_s10 + $0x10] sm:$0xff] }
 0xb18   :  { %v4004_v29 = vpop.f32.mrf.mxu0 }
 0xb19   :  { %v4005_v16 = vadd.f32 %v4004_v29, %v3986_v7 }
 0xb1a   :  { %v4023_v22 = vpop.f32.mrf.mxu1 }
 0xb1b   :  { %v4024_v8 = vadd.f32 %v4023_v22, %v4005_v16 }
 0xb1d   :  { %v4043_v37 = vsel %vm4036_vm4, %v4024_v8, 0.0 }
 0xb1e   :  { %4044 = vadd.xlane.f32.xlu0 %v4043_v37 }
 0xb20   :  { %v4006_v46 = vpop.f32.mrf.mxu0 }
 0xb21   :  { %v4007_v56 = vadd.f32 %v4006_v46, %v3988_v58 }
 0xb22   :  { %v4025_v38 = vpop.f32.mrf.mxu1 }
 0xb23   :  { %v4026_v39 = vadd.f32 %v4025_v38, %v4007_v56 }
 0xb25   :  { %v4046_v4 = vsel %vm4036_vm4, %v4026_v39, 0.0 }
 0xb26   :  { %4047 = vadd.xlane.f32.xlu2 %v4046_v4  ;;  %4041 = vadd.xlane.f32.xlu0 %v4040_v54  ;;  %v4029_v54 = vld [vmem:[%s9047_s10 + $0x8] sm:$0xff] }
 0xb81   :  { %v4039_v21 = vpop.xlane.xlu1 %4038 }
 0xb82   :  { %v4049_v14 = vmul.f32 0.125, %v4039_v21 }
 0xb84   :  { %v8933_v60 = vsub.f32 %v4019_v36, %v4049_v14  ;;  %v4031_v14 = vld [vmem:[%s9047_s10 + $0x18] sm:$0xff]  ;;  %s5650_s10 = smov 122  }
 0xb86   :  { %v4057_v27 = vmul.f32 %v8933_v60, %v8933_v60 }
 0xb88   :  { %v4061_v0 = vsel %vm4036_vm4, %v4057_v27, 0.0 }
 0xb89   :  { %4062 = vadd.xlane.f32.xlu0 %v4061_v0  ;;  %v4033_v0 = vld [vmem:[%s9046_s11 + $0x8] sm:$0xff] }
 0xb91   :  { %v4045_v13 = vpop.xlane.xlu0 %4044 }
 0xb92   :  { %v4051_v2 = vmul.f32 0.125, %v4045_v13 }
 0xb94   :  { %v8938_v35 = vsub.f32 %v4024_v8, %v4051_v2 }
 0xb96   :  { %v4059_v31 = vmul.f32 %v8938_v35, %v8938_v35 }
 0xb98   :  { %v4067_v40 = vsel %vm4036_vm4, %v4059_v31, 0.0 }
 0xb99   :  { %v4048_v53 = vpop.xlane.xlu2 %4047  ;;  %4068 = vadd.xlane.f32.xlu2 %v4067_v40  ;;  %v4042_v44 = vpop.xlane.xlu0 %4041  ;;  %v4032_v40 = vld [vmem:[%s9046_s11] sm:$0xff]  ;;  %s5651_s11 = smov 125  }
 0xb9a   :  { %v4052_v28 = vmul.f32 0.125, %v4048_v53  ;;  %v4050_v1 = vmul.f32 0.125, %v4042_v44 }
 0xb9c   :  { %v8946_v43 = vsub.f32 %v4026_v39, %v4052_v28  ;;  %v8948_v11 = vsub.f32 %v4021_v62, %v4050_v1 }
 0xb9d   :  { %4166 = vperm.xlu0 %5533, %v4035_v55  }
 0xb9e   :  { %v4058_v17 = vmul.f32 %v8948_v11, %v8948_v11  ;;  %v4060_v23 = vmul.f32 %v8946_v43, %v8946_v43 }
 0xba0   :  { %v4064_v15 = vsel %vm4036_vm4, %v4058_v17, 0.0  ;;  %v4070_v5 = vsel %vm4036_vm4, %v4060_v23, 0.0 }
 0xba1   :  { %4065 = vadd.xlane.f32.xlu2 %v4064_v15  ;;  %4071 = vadd.xlane.f32.xlu1 %v4070_v5 }
 0xbb9   :  { %4161 = vperm.xlu2 %5532, %v4034_v49  }
 0xbfc   :  { %v4063_v10 = vpop.xlane.xlu0 %4062 }
 0xbfd   :  { %v4073_v48 = vmul.f32 0.125, %v4063_v10 }
 0xbff   :  { %v4077_v50 = vadd.f32 1e-05, %v4073_v48 }
 0xc01   :  { %5607 = vrsqrt.f32 %v4077_v50  ;;  %vm4087_vm6 = vweird.f32 %v4077_v50 }
 0xc07   :  { %v5608_v20 = vpop.eup %5607 }
 0xc08   :  { %v4082_v51 = vmul.f32 %v5608_v20, %v4077_v50  ;;  %vm4088_vm5 = vweird.f32 %v5608_v20 }
 0xc09   :  { %vm4089_vm7 = vmor %vm4087_vm6, %vm4088_vm5 }
 0xc0a   :  { %v4083_v45 = vmul.f32 %v5608_v20, %v4082_v51 }
 0xc0c   :  { %v4084_v41 = vmul.f32 0.5, %v4083_v45  ;;  %v4069_v3 = vpop.xlane.xlu2 %4068 }
 0xc0d   :  { %v4075_v33 = vmul.f32 0.125, %v4069_v3 }
 0xc0e   :  { %v4085_v36 = vsub.f32 1.5, %v4084_v41 }
 0xc0f   :  { %v4079_v52 = vadd.f32 1e-05, %v4075_v33  ;;  %v4167_v44 = vpop.permute.xlu0 %4166  ;;  %v4279_v33 = vld [vmem:[%s9048_s13] sm:$0xf] }
 0xc10   :  { %v4086_v61 = vmul.f32 %v5608_v20, %v4085_v36 }
 0xc11   :  { %5609 = vrsqrt.f32 %v4079_v52  ;;  %vm4107_vm9 = vweird.f32 %v4079_v52 }
 0xc12   :  { %v4090_v59 = vsel %vm4089_vm7, %v5608_v20, %v4086_v61 }
 0xc13   :  { %v4121_v6 = vmul.f32 %v4090_v59, %v4028_v63 }
 0xc14   :  { %v4066_v42 = vpop.xlane.xlu2 %4065  ;;  %v4072_v57 = vpop.xlane.xlu1 %4071 }
 0xc15   :  { %v4074_v19 = vmul.f32 0.125, %v4066_v42  ;;  %v4076_v47 = vmul.f32 0.125, %v4072_v57  ;;  %4127 = vperm.xlu1 %5534, %v4121_v6  }
 0xc17   :  { %v5610_v18 = vpop.eup %5609  ;;  %v4078_v25 = vadd.f32 1e-05, %v4074_v19  ;;  %v4080_v7 = vadd.f32 1e-05, %v4076_v47 }
 0xc18   :  { %v4102_v29 = vmul.f32 %v5610_v18, %v4079_v52  ;;  %vm4108_vm8 = vweird.f32 %v5610_v18 }
 0xc19   :  { %5611 = vrsqrt.f32 %v4078_v25  ;;  %vm4109_vm10 = vmor %vm4107_vm9, %vm4108_vm8  ;;  %vm4097_vm13 = vweird.f32 %v4078_v25  ;;  %vm4117_vm15 = vweird.f32 %v4080_v7 }
 0xc1a   :  { %v4103_v24 = vmul.f32 %v5610_v18, %v4102_v29  ;;  %5613 = vrsqrt.f32 %v4080_v7 }
 0xc1c   :  { %v4104_v9 = vmul.f32 0.5, %v4103_v24  ;;  %v4162_v28 = vpop.permute.xlu2 %4161 }
 0xc1e   :  { %v4105_v16 = vsub.f32 1.5, %v4104_v9 }
 0xc1f   :  { %v5612_v30 = vpop.eup %5611 }
 0xc20   :  { %v5614_v22 = vpop.eup %5613  ;;  %v4106_v26 = vmul.f32 %v5610_v18, %v4105_v16  ;;  %v4092_v8 = vmul.f32 %v5612_v30, %v4078_v25  ;;  %vm4098_vm11 = vweird.f32 %v5612_v30 }
 0xc21   :  { %v4112_v12 = vmul.f32 %v5614_v22, %v4080_v7  ;;  %vm4118_vm12 = vweird.f32 %v5614_v22  ;;  %vm4099_vm14 = vmor %vm4097_vm13, %vm4098_vm11 }
 0xc22   :  { %v4093_v32 = vmul.f32 %v5612_v30, %v4092_v8  ;;  %v4110_v37 = vsel %vm4109_vm10, %v5610_v18, %v4106_v26  ;;  %vm4119_vm0 = vmor %vm4117_vm15, %vm4118_vm12 }
 0xc23   :  { %v4113_v58 = vmul.f32 %v5614_v22, %v4112_v12  ;;  %v4123_v46 = vmul.f32 %v4110_v37, %v4030_v34 }
 0xc24   :  { %v4094_v62 = vmul.f32 0.5, %v4093_v32 }
 0xc25   :  { %v4114_v56 = vmul.f32 0.5, %v4113_v58  ;;  %4137 = vperm.xlu1 %5534, %v4123_v46  }
 0xc26   :  { %v4095_v38 = vsub.f32 1.5, %v4094_v62 }
 0xc27   :  { %v4115_v39 = vsub.f32 1.5, %v4114_v56 }
 0xc28   :  { %v4096_v4 = vmul.f32 %v5612_v30, %v4095_v38 }
 0xc29   :  { %v4116_v21 = vmul.f32 %v5614_v22, %v4115_v39 }
 0xc2a   :  { %v4100_v27 = vsel %vm4099_vm14, %v5612_v30, %v4096_v4 }
 0xc2b   :  { %v4122_v13 = vmul.f32 %v4100_v27, %v4029_v54  ;;  %v4120_v2 = vsel %vm4119_vm0, %v5614_v22, %v4116_v21 }
 0xc2c   :  { %v4124_v31 = vmul.f32 %v4120_v2, %v4031_v14 }
 0xc2d   :  { %4132 = vperm.xlu2 %5532, %v4122_v13   ;;  %4156 = vperm.xlu1 %5534, %v4033_v0  }
 0xc2e   :  { %4142 = vperm.xlu0 %5533, %v4124_v31  }
 0xc36   :  { %4151 = vperm.xlu0 %5533, %v4032_v40  }
 0xc87   :  { %v4128_v53 = vpop.permute.xlu1 %4127  ;;  %v4133_v5 = vpop.permute.xlu2 %4132 }
 0xc88   :  { %v4146_v48 = vmul.f32 %v4133_v5, %v8948_v11  ;;  %v4145_v51 = vmul.f32 %v4128_v53, %v8933_v60 }
 0xc97   :  { %v4138_v1 = vpop.permute.xlu1 %4137 }
 0xc98   :  { %v4147_v55 = vmul.f32 %v4138_v1, %v8938_v35 }
 0xc9a   :  { %v8978_v23 = vadd.f32 %v4162_v28, %v4147_v55 }
 0xc9c   :  { %v4175_v50 = vmax.f32 %v8978_v23, 0.0  ;;  %v4278_v23 = vld [vmem:[%s9049_s12] sm:$0x3] }
 0xc9f   :  { %v4157_v10 = vpop.permute.xlu1 %4156 }
 0xca0   :  { %v4143_v17 = vpop.permute.xlu0 %4142  ;;  %v8987_v45 = vadd.f32 %v4157_v10, %v4146_v48 }
 0xca1   :  { %v4148_v15 = vmul.f32 %v4143_v17, %v8946_v43 }
 0xca2   :  { %v4174_v11 = vmax.f32 %v8987_v45, 0.0 }
 0xca3   :  { %v8981_v49 = vadd.f32 %v4167_v44, %v4148_v15 }
 0xca5   :  { %v4176_v20 = vmax.f32 %v8981_v49, 0.0 }
 0xca7   :  { %v5555_v35 = vpack.i.bf16 %v4176_v20, %v4175_v50 }
 0xca8   :  { %v4152_v43 = vpop.permute.xlu0 %4151 }
 0xca9   :  { %v8993_v41 = vadd.f32 %v4152_v43, %v4145_v51  ;;  %5556 = vrot.lane.b32.xlu0 %v5555_v35, %s5650_s10 }
 0xcab   :  { %v4173_v3 = vmax.f32 %v8993_v41, 0.0 }
 0xcad   :  { %v5540_v60 = vpack.i.bf16 %v4174_v11, %v4173_v3 }
 0xcaf   :  { %5541 = vrot.lane.b32.xlu2 %v5540_v60, %s5650_s10  ;;  %5536 = vrot.lane.b32.xlu1 %v5540_v60, %s5651_s11 }
 0xcb1   :  { %5561 = vrot.lane.b32.xlu0 %v5555_v35, %s5652_s1 }
 0xcb7   :  { %5546 = vrot.lane.b32.xlu2 %v5555_v35, %s5651_s11  ;;  %5571 = vrot.lane.b32.xlu1 %v5555_v35, %s5653_s17 }
 0xcb9   :  { %5566 = vrot.lane.b32.xlu0 %v5540_v60, %s5653_s17 }
 0xcbf   :  { %5551 = vrot.lane.b32.xlu2 %v5540_v60, %s5652_s1  ;;  %5576 = vrot.lane.b32.xlu1 %v5555_v35, %s5654_s0 }
 0xcc1   :  { %5586 = vrot.lane.b32.xlu0 %v5540_v60, %s5654_s0 }
 0xcc7   :  { %5581 = vrot.lane.b32.xlu2 %v5555_v35, %s5637_s2  ;;  %5591 = vrot.lane.b32.xlu1 %v5540_v60, %s5637_s2 }
 0xccf   :  { %4282 = vperm.xlu2 %5532, %v4279_v33  }
 0xd09   :  { %v5542_v36 = vpop.permute.xlu2 %5541 }
 0xd0a   :  { %v5544_v25 = vunpack.i.h.bf16 %v5542_v36  ;;  %v5543_v7 = vunpack.i.l.bf16 %v5542_v36 }
 0xd11   :  { %v5547_v52 = vpop.permute.xlu2 %5546 }
 0xd12   :  { %v5549_v63 = vunpack.i.h.bf16 %v5547_v52  ;;  %v5548_v59 = vunpack.i.l.bf16 %v5547_v52 }
 0xd14   :  { %v4196_v60 = vsel %vm4193_vm1, %v4175_v50, %v5548_v59  ;;  %v4197_v33 = vsel %vm4193_vm1, %v4176_v20, %v5549_v63 }
 0xd15   :  { %v4271_v36 = vpack.c.bf16 %v4197_v33, %v4196_v60 }
 0xd19   :  { %v5552_v22 = vpop.permute.xlu2 %5551 }
 0xd1a   :  { %v5554_v58 = vunpack.i.h.bf16 %v5552_v22  ;;  %v5553_v46 = vunpack.i.l.bf16 %v5552_v22 }
 0xd1b   :  { %v5557_v61 = vpop.permute.xlu0 %5556 }
 0xd1c   :  { %v5559_v6 = vunpack.i.h.bf16 %v5557_v61  ;;  %v5558_v42 = vunpack.i.l.bf16 %v5557_v61 }
 0xd1e   :  { %v4268_v57 = vsel %vm4193_vm1, %v5548_v59, %v5558_v42  ;;  %v4269_v19 = vsel %vm4193_vm1, %v5549_v63, %v5559_v6 }
 0xd1f   :  { %v4277_v47 = vpack.c.bf16 %v4269_v19, %v4268_v57 }
 0xd21   :  { %4285 = vmatpush.bf16.msrb.mxu2 %v4277_v47  ;;  %v5537_v18 = vpop.permute.xlu1 %5536  ;;  %v5582_v27 = vpop.permute.xlu2 %5581 }
 0xd22   :  { %v5539_v29 = vunpack.i.h.bf16 %v5537_v18  ;;  %v5538_v24 = vunpack.i.l.bf16 %v5537_v18  ;;  %v5584_v2 = vunpack.i.h.bf16 %v5582_v27  ;;  %v5583_v31 = vunpack.i.l.bf16 %v5582_v27 }
 0xd23   :  { %v5562_v9 = vpop.permute.xlu0 %5561 }
 0xd24   :  { %v4266_v16 = vsel %vm4193_vm1, %v5538_v24, %v5543_v7  ;;  %v4267_v30 = vsel %vm4193_vm1, %v5539_v29, %v5544_v25  ;;  %v5564_v34 = vunpack.i.h.bf16 %v5562_v9  ;;  %v5563_v12 = vunpack.i.l.bf16 %v5562_v9 }
 0xd25   :  { %v4276_v26 = vpack.c.bf16 %v4267_v30, %v4266_v16  ;;  %v4194_v52 = vsel %vm4193_vm1, %v4173_v3, %v5538_v24  ;;  %v4195_v61 = vsel %vm4193_vm1, %v4174_v11, %v5539_v29 }
 0xd26   :  { %v4270_v6 = vpack.c.bf16 %v4195_v61, %v4194_v52 }
 0xd27   :  { %4286 = vmatpush.bf16.msrb.mxu2 %v4276_v26 }
 0xd29   :  { %v5572_v8 = vpop.permute.xlu1 %5571  ;;  %v4283_v49 = vpop.permute.xlu2 %4282 }
 0xd2a   :  { %v5574_v32 = vunpack.i.h.bf16 %v5572_v8  ;;  %v5573_v37 = vunpack.i.l.bf16 %v5572_v8 }
 0xd2b   :  { %v5567_v62 = vpop.permute.xlu0 %5566 }
 0xd2c   :  { %v5569_v56 = vunpack.i.h.bf16 %v5567_v62  ;;  %v5568_v38 = vunpack.i.l.bf16 %v5567_v62  ;;  %v4252_v39 = vsel %vm4193_vm1, %v5563_v12, %v5573_v37  ;;  %v4253_v4 = vsel %vm4193_vm1, %v5564_v34, %v5574_v32 }
 0xd2d   :  { %v4275_v54 = vpack.c.bf16 %v4253_v4, %v4252_v39 }
 0xd2e   :  { %v4250_v21 = vsel %vm4193_vm1, %v5553_v46, %v5568_v38  ;;  %v4251_v14 = vsel %vm4193_vm1, %v5554_v58, %v5569_v56 }
 0xd2f   :  { %4287 = vmatpush.bf16.msrb.mxu2 %v4275_v54  ;;  %v4274_v13 = vpack.c.bf16 %v4251_v14, %v4250_v21 }
 0xd31   :  { %v5577_v0 = vpop.permute.xlu1 %5576 }
 0xd32   :  { %v5579_v40 = vunpack.i.h.bf16 %v5577_v0  ;;  %v5578_v53 = vunpack.i.l.bf16 %v5577_v0 }
 0xd33   :  { %4288 = vmatpush.bf16.msrb.mxu2 %v4274_v13  ;;  %v5587_v55 = vpop.permute.xlu0 %5586 }
 0xd34   :  { %v4224_v44 = vsel %vm4193_vm1, %v5578_v53, %v5583_v31  ;;  %v4225_v28 = vsel %vm4193_vm1, %v5579_v40, %v5584_v2  ;;  %v5589_v15 = vunpack.i.h.bf16 %v5587_v55  ;;  %v5588_v5 = vunpack.i.l.bf16 %v5587_v55 }
 0xd35   :  { %v4273_v1 = vpack.c.bf16 %v4225_v28, %v4224_v44 }
 0xd37   :  { %4289 = vmatpush.bf16.msrb.mxu2 %v4273_v1 }
 0xd39   :  { %v5592_v17 = vpop.permute.xlu1 %5591 }
 0xd3a   :  { %v5594_v10 = vunpack.i.h.bf16 %v5592_v17  ;;  %v5593_v48 = vunpack.i.l.bf16 %v5592_v17 }
 0xd3c   :  { %v4222_v51 = vsel %vm4193_vm1, %v5588_v5, %v5593_v48  ;;  %v4223_v35 = vsel %vm4193_vm1, %v5589_v15, %v5594_v10 }
 0xd3d   :  { %v4272_v43 = vpack.c.bf16 %v4223_v35, %v4222_v51 }
 0xd3f   :  { %4290 = vmatpush.bf16.msrb.mxu2 %v4272_v43 }
 0xd43   :  { %4291 = vmatpush.bf16.msrb.mxu2 %v4271_v36 }
 0xd47   :  { %4292 = vmatpush.bf16.msrb.mxu2 %v4270_v6 }
 0xd4a   :  { %4293 = vmatmul.bf16.vlgmr.msrb.gmra.mxu2 %v4278_v23 }
 0xdcd   :  { %v4294_v50 = vpop.f32.mrf.mxu2 }
 0xdce   :  { %v4295_v20 = vadd.f32 %v4294_v50, %v4283_v49 }
 0xdd0   :  { %4299 = vst.msk [vmem:[%s9050_s14] sm:$0xf] %vm4298_vm2, %v4295_v20 }
 0xdd5   :  { %v4296_v41 = vpop.f32.mrf.mxu2 }

</bundles_post_ra>
